<compile_context>
chip_gen: v7x
topology: tpu7x:2x2x1
jax: 0.10.0
libtpu: 0.0.40
codegen_flags: <defaults>
</compile_context>

<pallas_src>
import math
from functools import partial

import jax
import jax.numpy as jnp
import numpy as np
from jax.experimental import pallas as pl
from jax.experimental.pallas import tpu as pltpu


# ----------------------------------------------------------------------------
# In-kernel helpers
# ----------------------------------------------------------------------------
_GELU_K = math.sqrt(2.0 / math.pi)


def _dot(a, b):
    # f32 x f32 -> request full fp32 contraction (faithful to PyTorch f32);
    # bf16 path uses the native MXU bf16 rate. Accumulation is always f32.
    prec = jax.lax.Precision.HIGHEST if a.dtype == jnp.float32 else None
    return jnp.dot(a, b, precision=prec, preferred_element_type=jnp.float32)


def _gelu_tanh(x):
    # Exactly the GELU written in the PyTorch module (tanh approximation).
    return 0.5 * x * (1.0 + jnp.tanh(_GELU_K * (x + 0.044715 * x * x * x)))


# ----------------------------------------------------------------------------
# Kernels (all row-tiled over M = B*S; weights/biases resident in VMEM)
# ----------------------------------------------------------------------------
def mlp_kernel(x_ref, w1_ref, b1_ref, w2_ref, b2_ref, o_ref):
    """o = gelu(x @ W1 + b1) @ W2 + b2   (both MLP Linears fused; Dropout = id)."""
    h = _dot(x_ref[...], w1_ref[...]) + b1_ref[...]
    h = _gelu_tanh(h)
    y = _dot(h.astype(w2_ref.dtype), w2_ref[...]) + b2_ref[...]
    o_ref[...] = y.astype(o_ref.dtype)


def matmul_bias_kernel(x_ref, w_ref, b_ref, o_ref, *, relu):
    """o = [relu](x @ W + b) — causal conv (im2col) or 1x1 conv as a matmul."""
    y = _dot(x_ref[...], w_ref[...]) + b_ref[...]
    if relu:
        y = jnp.maximum(y, 0.0)
    o_ref[...] = y.astype(o_ref.dtype)


def dual_matmul_add_relu_kernel(x1_ref, x2_ref, w1_ref, b1_ref, w2_ref, b2_ref, o_ref):
    """o = relu( relu(x1 @ W1 + b1) + (x2 @ W2 + b2) )

    x1 = im2col of the hidden activation (second causal conv of a TemporalBlock),
    x2 = the block input (1x1 downsample) -> fused conv2 + downsample + residual + ReLU.
    """
    y = jnp.maximum(_dot(x1_ref[...], w1_ref[...]) + b1_ref[...], 0.0)
    r = _dot(x2_ref[...], w2_ref[...]) + b2_ref[...]
    o_ref[...] = jnp.maximum(y + r, 0.0).astype(o_ref.dtype)


# ----------------------------------------------------------------------------
# pallas_call wrapper shared by all layers
# ----------------------------------------------------------------------------
def _round_up(n, m):
    return ((n + m - 1) // m) * m


def _choose_tm(M, target=512):
    # Large row tiles keep the MXU fed (256-row systolic array on v6e/v7x) and
    # amortize the ~0.35us per-grid-step overhead (512 rows ~ 85% of the HBM
    # roofline for streaming kernels). Tiny M (unit test) -> single 16-aligned
    # tile (16 also satisfies bf16 sublane packing).
    if M >= target:
        return target
    return _round_up(M, 16)


def _dense_call(kernel, row_inputs, const_inputs, out_dim, *, M, tm,
                flops_per_row, transc_per_row=0, out_dtype=jnp.float32):
    """Run `kernel` over M rows: row_inputs are tiled (tm, D) over a 1-D grid,
    const_inputs (weights / biases) are fully VMEM-resident and single-buffered."""
    grid_m = pl.cdiv(M, tm)
    m_pad = grid_m * tm

    def pad_rows(a):
        return a if a.shape[0] == m_pad else jnp.pad(a, ((0, m_pad - a.shape[0]), (0, 0)))

    rows = [pad_rows(a) for a in row_inputs]

    in_specs = []
    for a in rows:
        in_specs.append(pl.BlockSpec((tm, a.shape[1]), lambda i: (i, 0)))
    for c in const_inputs:
        # Constant across the grid: one VMEM copy, no double buffering.
        in_specs.append(pl.BlockSpec(c.shape, lambda i: (0, 0),
                                     pipeline_mode=pl.Buffered(1)))
    out_spec = pl.BlockSpec((tm, out_dim), lambda i: (i, 0))

    # --- explicit VMEM budget (sized conservatively for v7x's 64 MiB VMEM) ---
    def tile_bytes(shape, dtype):
        sub = _round_up(shape[0], 8)
        lane = _round_up(shape[1], 128)
        return sub * lane * np.dtype(dtype).itemsize

    vmem = 2 * tile_bytes((tm, out_dim), out_dtype)          # double-buffered output
    for a in rows:
        vmem += 2 * tile_bytes((tm, a.shape[1]), a.dtype)    # double-buffered inputs
    for c in const_inputs:
        vmem += tile_bytes(c.shape, c.dtype)                 # single-buffered constants
    vmem_limit = int(min(max(2 * vmem, 16 * 1024 * 1024), 48 * 1024 * 1024))

    bytes_accessed = (sum(a.size * a.dtype.itemsize for a in rows)
                      + sum(c.size * c.dtype.itemsize for c in const_inputs)
                      + m_pad * out_dim * np.dtype(out_dtype).itemsize)

    out = pl.pallas_call(
        kernel,
        out_shape=jax.ShapeDtypeStruct((m_pad, out_dim), out_dtype),
        grid_spec=pltpu.PrefetchScalarGridSpec(
            num_scalar_prefetch=0,
            grid=(grid_m,),
            in_specs=in_specs,
            out_specs=out_spec,
        ),
        compiler_params=pltpu.CompilerParams(
            dimension_semantics=("parallel",),   # shards the M axis across TCs on v7x
            vmem_limit_bytes=vmem_limit,
        ),
        cost_estimate=pl.CostEstimate(
            flops=int(flops_per_row) * int(m_pad),
            transcendentals=int(transc_per_row) * int(m_pad),
            bytes_accessed=int(bytes_accessed),
        ),
    )(*rows, *const_inputs)

    return out[:M] if m_pad != M else out


# ----------------------------------------------------------------------------
# Conv1d (causal, dilated) -> matmul plumbing
# ----------------------------------------------------------------------------
def _causal_shift_concat(x, kernel_size, dilation):
    """(B, S, C) -> (B, S, K*C); slot k at time t holds x[:, t-(K-1-k)*dilation, :]
    (zero for negative time). Exactly Conv1d(padding=(K-1)*d) + Chomp1d."""
    B, S, C = x.shape
    p = (kernel_size - 1) * dilation
    xp = jnp.pad(x, ((0, 0), (p, 0), (0, 0)))
    cols = [xp[:, k * dilation:k * dilation + S, :] for k in range(kernel_size)]
    return jnp.concatenate(cols, axis=-1)


def _conv_w_to_mat(w):
    """PyTorch Conv1d weight (C_out, C_in, K) -> (K*C_in, C_out) matmul operand."""
    c_out, c_in, k = w.shape
    return jnp.transpose(w, (2, 1, 0)).reshape(k * c_in, c_out)


# ----------------------------------------------------------------------------
# GAP_TCN forward (Pallas)
# ----------------------------------------------------------------------------
def gap_tcn_forward(x, params, *, tm_target=512, matmul_dtype=jnp.float32):
    """x: (B, S, num_inputs) f32 -> (B, S, mlp_dim).
    matmul_dtype=jnp.bfloat16 halves HBM traffic / ~2x MXU rate on v6e/v7x
    (accumulation stays f32 inside the kernels)."""
    B, S, d_in = x.shape
    M = B * S
    tm = _choose_tm(M, target=tm_target)
    out_dtype = x.dtype
    cast = lambda a: a.astype(matmul_dtype)

    # -------- MLP: Linear -> GELU -> (Dropout = id) -> Linear, one fused kernel
    w1 = jnp.transpose(params["mlp_w1"])          # (d_in, H)   (PyTorch stores (H, d_in))
    b1 = params["mlp_b1"].reshape(1, -1)
    w2 = jnp.transpose(params["mlp_w2"])          # (H, mlp_dim)
    b2 = params["mlp_b2"].reshape(1, -1)
    H, d_mlp = w1.shape[1], w2.shape[1]
    y = _dense_call(
        mlp_kernel, [cast(x.reshape(M, d_in))], [cast(w1), b1, cast(w2), b2], d_mlp,
        M=M, tm=tm,
        flops_per_row=2 * d_in * H + 2 * H * d_mlp + 8 * H,
        transc_per_row=H, out_dtype=out_dtype,
    ).reshape(B, S, d_mlp)

    # -------- TCN: stack of TemporalBlocks (causal dilated convs as matmuls)
    for i, blk in enumerate(params["blocks"]):
        d = 2 ** i
        K = blk["conv1_w"].shape[2]
        c_in = y.shape[-1]
        c_out = blk["conv1_w"].shape[0]

        # conv1 + chomp + ReLU
        y_cat = _causal_shift_concat(y, K, d).reshape(M, K * c_in)
        h1 = _dense_call(
            partial(matmul_bias_kernel, relu=True),
            [cast(y_cat)],
            [cast(_conv_w_to_mat(blk["conv1_w"])), blk["conv1_b"].reshape(1, -1)],
            c_out, M=M, tm=tm, flops_per_row=2 * K * c_in * c_out, out_dtype=out_dtype,
        ).reshape(B, S, c_out)

        # conv2 + chomp + ReLU  fused with 1x1 downsample + residual add + ReLU
        h1_cat = _causal_shift_concat(h1, K, d).reshape(M, K * c_out)
        if blk["down_w"] is not None:
            wd = jnp.transpose(blk["down_w"][:, :, 0])        # (c_in, c_out)
            bd = blk["down_b"].reshape(1, -1)
        else:                                                 # identity residual (c_in == c_out)
            wd = jnp.eye(c_in, dtype=out_dtype)
            bd = jnp.zeros((1, c_in), out_dtype)
        y = _dense_call(
            dual_matmul_add_relu_kernel,
            [cast(h1_cat), cast(y.reshape(M, c_in))],
            [cast(_conv_w_to_mat(blk["conv2_w"])), blk["conv2_b"].reshape(1, -1),
             cast(wd), bd],
            c_out, M=M, tm=tm,
            flops_per_row=2 * K * c_out * c_out + 2 * c_in * c_out, out_dtype=out_dtype,
        ).reshape(B, S, c_out)

    # -------- optional last 1x1 conv back to mlp_dim channels
    if params["last_w"] is not None:
        c_last = y.shape[-1]
        wl = jnp.transpose(params["last_w"][:, :, 0])         # (c_last, mlp_dim)
        bl = params["last_b"].reshape(1, -1)
        y = _dense_call(
            partial(matmul_bias_kernel, relu=False),
            [cast(y.reshape(M, c_last))], [cast(wl), bl], wl.shape[1],
            M=M, tm=tm, flops_per_row=2 * c_last * wl.shape[1], out_dtype=out_dtype,
        ).reshape(B, S, wl.shape[1])
    return y


# ----------------------------------------------------------------------------
# Deterministic parameter init (PyTorch layouts) + float64 NumPy reference
# ----------------------------------------------------------------------------
def init_gap_tcn_params(key, num_inputs, hidden_dim, mlp_dim, num_channels, kernel_size):
    keys = iter(jax.random.split(key, 64))

    def dense(c_out, c_in):
        w = jax.random.normal(next(keys), (c_out, c_in), jnp.float32) / math.sqrt(c_in)
        b = jax.random.normal(next(keys), (c_out,), jnp.float32) * 0.01
        return w, b

    def conv(c_out, c_in, k):
        w = jax.random.normal(next(keys), (c_out, c_in, k), jnp.float32) / math.sqrt(c_in * k)
        b = jax.random.normal(next(keys), (c_out,), jnp.float32) * 0.01
        return w, b

    p = {}
    p["mlp_w1"], p["mlp_b1"] = dense(hidden_dim, num_inputs)
    p["mlp_w2"], p["mlp_b2"] = dense(mlp_dim, hidden_dim)
    blocks, c_in = [], mlp_dim
    for c_out in num_channels:
        blk = {}
        blk["conv1_w"], blk["conv1_b"] = conv(c_out, c_in, kernel_size)
        blk["conv2_w"], blk["conv2_b"] = conv(c_out, c_out, kernel_size)
        if c_in != c_out:
            blk["down_w"], blk["down_b"] = conv(c_out, c_in, 1)
        else:
            blk["down_w"], blk["down_b"] = None, None
        blocks.append(blk)
        c_in = c_out
    p["blocks"] = blocks
    if num_channels[-1] != mlp_dim:
        p["last_w"], p["last_b"] = conv(mlp_dim, num_channels[-1], 1)
    else:
        p["last_w"], p["last_b"] = None, None
    return p


def _np_gelu(x):
    return 0.5 * x * (1.0 + np.tanh(_GELU_K * (x + 0.044715 * x ** 3)))


def _np_causal_conv1d(x, w, b, dilation):
    # x: (B, C_in, L), w: (C_out, C_in, K) — Conv1d(padding=(K-1)*d) + Chomp1d.
    B, c_in, L = x.shape
    c_out, _, K = w.shape
    p = (K - 1) * dilation
    xp = np.pad(x, ((0, 0), (0, 0), (p, 0)))
    y = np.zeros((B, c_out, L), dtype=x.dtype)
    for k in range(K):
        y += np.einsum("bcl,oc->bol", xp[:, :, k * dilation:k * dilation + L], w[:, :, k])
    return y + b[None, :, None]


def gap_tcn_reference(x, params):
    f64 = lambda a: np.asarray(a, np.float64)
    x = f64(x)
    h = x @ f64(params["mlp_w1"]).T + f64(params["mlp_b1"])
    h = _np_gelu(h)
    h = h @ f64(params["mlp_w2"]).T + f64(params["mlp_b2"])
    y = np.transpose(h, (0, 2, 1))                       # (B, C, S) Conv1d layout
    for i, blk in enumerate(params["blocks"]):
        d = 2 ** i
        out = np.maximum(_np_causal_conv1d(y, f64(blk["conv1_w"]), f64(blk["conv1_b"]), d), 0.0)
        out = np.maximum(_np_causal_conv1d(out, f64(blk["conv2_w"]), f64(blk["conv2_b"]), d), 0.0)
        if blk["down_w"] is not None:
            res = (np.einsum("bcl,oc->bol", y, f64(blk["down_w"])[:, :, 0])
                   + f64(blk["down_b"])[None, :, None])
        else:
            res = y
        y = np.maximum(out + res, 0.0)
    if params["last_w"] is not None:
        y = (np.einsum("bcl,oc->bol", y, f64(params["last_w"])[:, :, 0])
             + f64(params["last_b"])[None, :, None])
    return np.transpose(y, (0, 2, 1))


# ----------------------------------------------------------------------------
if __name__ == "__main__":
    key = jax.random.PRNGKey(0)
    k_x, k_p = jax.random.split(key)

    # GAP_TCN defaults, small batch/sequence.
    B, S = 2, 8
    num_inputs, hidden_dim, mlp_dim = 49, 256, 512
    num_channels, kernel_size = [25, 50, 100], 3

    x = jax.random.normal(k_x, (B, S, num_inputs), dtype=jnp.float32)
    params = init_gap_tcn_params(k_p, num_inputs, hidden_dim, mlp_dim,
                                 num_channels, kernel_size)

    out = gap_tcn_forward(x, params)          # f32 path; matmul_dtype=jnp.bfloat16 for throughput
    out = jax.block_until_ready(out)

    ref = gap_tcn_reference(np.asarray(x), params)
    assert out.shape == (B, S, mlp_dim), out.shape
    err = np.max(np.abs(np.asarray(out, np.float64) - ref))
    assert np.allclose(np.asarray(out, np.float64), ref, atol=1e-2, rtol=1e-2), float(err)

    print("KERNEL_OK")
</pallas_src>

<mosaic_0001>
module attributes {stable_mosaic.version = 11 : i64} {
  func.func @mlp_kernel(%arg0: i32, %arg1: memref<16x49xf32, #tpu.memory_space<vmem>>, %arg2: memref<49x256xf32, #tpu.memory_space<vmem>>, %arg3: memref<1x256xf32, #tpu.memory_space<vmem>>, %arg4: memref<256x512xf32, #tpu.memory_space<vmem>>, %arg5: memref<1x512xf32, #tpu.memory_space<vmem>>, %arg6: memref<16x512xf32, #tpu.memory_space<vmem>>) attributes {dimension_semantics = [#tpu.dimension_semantics<parallel>], iteration_bounds = array<i64: 1>, scalar_prefetch = 0 : i64, scratch_operands = 0 : i64, tpu.core_type = #tpu.core_type<tc>, window_params = [{transform_indices = @transform_0, window_bounds = array<i64: 16, 49>}, {pipeline_mode = #tpu.pipeline_mode<synchronous>, transform_indices = @transform_1, window_bounds = array<i64: 49, 256>}, {pipeline_mode = #tpu.pipeline_mode<synchronous>, transform_indices = @transform_2, window_bounds = array<i64: 1, 256>}, {pipeline_mode = #tpu.pipeline_mode<synchronous>, transform_indices = @transform_3, window_bounds = array<i64: 256, 512>}, {pipeline_mode = #tpu.pipeline_mode<synchronous>, transform_indices = @transform_4, window_bounds = array<i64: 1, 512>}, {transform_indices = @transform_5, window_bounds = array<i64: 16, 512>}]} {
    %c0 = arith.constant 0 : index
    %c0_0 = arith.constant 0 : index
    %0 = vector.load %arg1[%c0, %c0_0] : memref<16x49xf32, #tpu.memory_space<vmem>>, vector<16x49xf32>
    %c0_1 = arith.constant 0 : index
    %c0_2 = arith.constant 0 : index
    %1 = vector.load %arg2[%c0_1, %c0_2] : memref<49x256xf32, #tpu.memory_space<vmem>>, vector<49x256xf32>
    %cst = arith.constant dense<0.000000e+00> : vector<16x256xf32>
    %2 = tpu.matmul %0, %1, %cst {dimension_numbers = #tpu.dot_dimension_numbers<[1], [0], [0], [1], [0, 0, 1, 1], [], []>, precision = #tpu.contract_precision<fp32>} : vector<16x49xf32>, vector<49x256xf32>, vector<16x256xf32> -> vector<16x256xf32>
    %c0_3 = arith.constant 0 : index
    %c0_4 = arith.constant 0 : index
    %3 = vector.load %arg3[%c0_3, %c0_4] : memref<1x256xf32, #tpu.memory_space<vmem>>, vector<1x256xf32>
    %4 = vector.broadcast %3 : vector<1x256xf32> to vector<16x256xf32>
    %5 = arith.addf %2, %4 : vector<16x256xf32>
    %cst_5 = arith.constant 5.000000e-01 : f32
    %6 = vector.broadcast %cst_5 : f32 to vector<16x256xf32>
    %7 = arith.mulf %6, %5 : vector<16x256xf32>
    %cst_6 = arith.constant 4.471500e-02 : f32
    %8 = vector.broadcast %cst_6 : f32 to vector<16x256xf32>
    %9 = arith.mulf %8, %5 : vector<16x256xf32>
    %10 = arith.mulf %9, %5 : vector<16x256xf32>
    %11 = arith.mulf %10, %5 : vector<16x256xf32>
    %12 = arith.addf %5, %11 : vector<16x256xf32>
    %cst_7 = arith.constant 0.797884583 : f32
    %13 = vector.broadcast %cst_7 : f32 to vector<16x256xf32>
    %14 = arith.mulf %13, %12 : vector<16x256xf32>
    %15 = math.tanh %14 : vector<16x256xf32>
    %cst_8 = arith.constant 1.000000e+00 : f32
    %16 = vector.broadcast %cst_8 : f32 to vector<16x256xf32>
    %17 = arith.addf %16, %15 : vector<16x256xf32>
    %18 = arith.mulf %7, %17 : vector<16x256xf32>
    %c0_9 = arith.constant 0 : index
    %c0_10 = arith.constant 0 : index
    %19 = vector.load %arg4[%c0_9, %c0_10] : memref<256x512xf32, #tpu.memory_space<vmem>>, vector<256x512xf32>
    %cst_11 = arith.constant dense<0.000000e+00> : vector<16x512xf32>
    %20 = tpu.matmul %18, %19, %cst_11 {dimension_numbers = #tpu.dot_dimension_numbers<[1], [0], [0], [1], [0, 0, 1, 1], [], []>, precision = #tpu.contract_precision<fp32>} : vector<16x256xf32>, vector<256x512xf32>, vector<16x512xf32> -> vector<16x512xf32>
    %c0_12 = arith.constant 0 : index
    %c0_13 = arith.constant 0 : index
    %21 = vector.load %arg5[%c0_12, %c0_13] : memref<1x512xf32, #tpu.memory_space<vmem>>, vector<1x512xf32>
    %22 = vector.broadcast %21 : vector<1x512xf32> to vector<16x512xf32>
    %23 = arith.addf %20, %22 : vector<16x512xf32>
    %c0_14 = arith.constant 0 : index
    %c0_15 = arith.constant 0 : index
    %24 = vector.load %arg6[%c0_14, %c0_15] : memref<16x512xf32, #tpu.memory_space<vmem>>, vector<16x512xf32>
    tpu.vector_store %arg6[%c0_14, %c0_15], %23 {strides = array<i32>} : memref<16x512xf32, #tpu.memory_space<vmem>>, vector<16x512xf32>,
    return
  }
  func.func @transform_0(%arg0: i32) -> (i32, i32) {
    %c0_i32 = arith.constant 0 : i32
    %c0_i32_0 = arith.constant 0 : i32
    return %arg0, %c0_i32 : i32, i32
  }
  func.func @transform_1(%arg0: i32) -> (i32, i32) {
    %c0_i32 = arith.constant 0 : i32
    %c0_i32_0 = arith.constant 0 : i32
    %c0_i32_1 = arith.constant 0 : i32
    return %c0_i32, %c0_i32_0 : i32, i32
  }
  func.func @transform_2(%arg0: i32) -> (i32, i32) {
    %c0_i32 = arith.constant 0 : i32
    %c0_i32_0 = arith.constant 0 : i32
    %c0_i32_1 = arith.constant 0 : i32
    return %c0_i32, %c0_i32_0 : i32, i32
  }
  func.func @transform_3(%arg0: i32) -> (i32, i32) {
    %c0_i32 = arith.constant 0 : i32
    %c0_i32_0 = arith.constant 0 : i32
    %c0_i32_1 = arith.constant 0 : i32
    return %c0_i32, %c0_i32_0 : i32, i32
  }
  func.func @transform_4(%arg0: i32) -> (i32, i32) {
    %c0_i32 = arith.constant 0 : i32
    %c0_i32_0 = arith.constant 0 : i32
    %c0_i32_1 = arith.constant 0 : i32
    return %c0_i32, %c0_i32_0 : i32, i32
  }
  func.func @transform_5(%arg0: i32) -> (i32, i32) {
    %c0_i32 = arith.constant 0 : i32
    %c0_i32_0 = arith.constant 0 : i32
    return %arg0, %c0_i32 : i32, i32
  }
}

</mosaic_0001>

<bundles_post_ra>
// kernel: tpu_custom_call.1
= control target key start
LH: loop header
LB: loop body
LE: loop exit
PB: predicated region body
PF: predicated region fallthrough
CT: control target
= control target key end

     0   :  { %10 = vsyncpa [#allocation3], 0  ;;  %s7531_s0 = inlined_call_operand.hbm [shape: f32[16,49], index: 0, kind: input, shape index: {}]   ;;  %s7532_s1 = inlined_call_operand.hbm [shape: f32[49,256], index: 1, kind: input, shape index: {}]   ;;  %s7533_s2 = inlined_call_operand.vmem [shape: f32[1,256], index: 2, kind: input, shape index: {}]   ;;  %s7534_s3 = inlined_call_operand.hbm [shape: f32[256,512], index: 3, kind: input, shape index: {}]   ;;  %s7535_s4 = inlined_call_operand.vmem [shape: f32[1,512], index: 4, kind: input, shape index: {}]   ;;  %s7536_s5 = inlined_call_operand.hbm [shape: f32[16,512], index: 5, kind: output, shape index: {}]  }
   0x1   :  { %11 = vsyncpa [#allocation6], 0 }
   0x2   :  { %12 = vsyncpa [#allocation4], 0  ;;  %s4703_s18 = smov [#allocation5]   ;;  %s4609_s22 = scalar_lea.hbm %s7532_s1, 1792 }
   0x3   :  { %s30_s19 = sshll.u32 %s4703_s18, 4  ;;  %p4610_p0 = scmp.ne.s32.totalorder %s7532_s1, %s4609_s22  ;;  %s31_s19 = int_to_ptr.vmem [resolvable:$true] %s30_s19 }
   0x4   :  { %p4613_p1 = scmp.lt.u32.totalorder %s4609_s22, %s7532_s1 }
   0x6   :  { %p4615_p2 = pnand %p4613_p1, %p4610_p0 }
   0x8   :  { %4618 = shalt.err (!%p4615_p2)
}
   0x9   :  { %s4619_s27 = scalar_lea.vmem %s31_s19, 1792  ;;  %p4624_p4 = scmp.lt.s32.totalorder %s31_s19, %s31_s19 }
   0xa   :  { %p4620_p3 = scmp.ne.s32.totalorder %s31_s19, %s4619_s27  ;;  %p4625_p5 = scmp.lt.s32.totalorder %s4619_s27, %s4619_s27 }
   0xc   :  { %p4626_p6 = por %p4625_p5, %p4624_p4 }
   0xe   :  { %p4627_p7 = pnand %p4626_p6, %p4620_p3 }
  0x10   :  { %4630 = shalt.err (!%p4627_p7)
}
  0x11   :  { %s4704_s28 = smov 256   ;;  %s4705_s29 = smov 16  }
  0x12   :  { %36 = dma.hbm_to_vmem [thread:$0]  %s7532_s1, 1792, %s31_s19, [#allocation6], %s4704_s28, %s4704_s28, %s4705_s29  }
  0x13   :  { %s4706_s7 = smov [#allocation2]   ;;  %s4631_s11 = scalar_lea.hbm %s7531_s0, 256 }
  0x14   :  { %s18_s8 = sshll.u32 %s4706_s7, 4  ;;  %p4632_p8 = scmp.ne.s32.totalorder %s7531_s0, %s4631_s11  ;;  %s19_s8 = int_to_ptr.vmem [resolvable:$true] %s18_s8 }
  0x15   :  { %p4635_p9 = scmp.lt.u32.totalorder %s4631_s11, %s7531_s0 }
  0x17   :  { %p4637_p10 = pnand %p4635_p9, %p4632_p8 }
  0x19   :  { %4640 = shalt.err (!%p4637_p10)
}
  0x1a   :  { %s4641_s16 = scalar_lea.vmem %s19_s8, 256  ;;  %p4646_p12 = scmp.lt.s32.totalorder %s19_s8, %s19_s8 }
  0x1b   :  { %p4642_p11 = scmp.ne.s32.totalorder %s19_s8, %s4641_s16  ;;  %p4647_p13 = scmp.lt.s32.totalorder %s4641_s16, %s4641_s16 }
  0x1d   :  { %p4648_p0 = por %p4647_p13, %p4646_p12 }
  0x1f   :  { %p4649_p1 = pnand %p4648_p0, %p4642_p11 }
  0x21   :  { %4652 = shalt.err (!%p4649_p1)
}
  0x22   :  { %s4707_s1 = smov 128   ;;  %s4708_s17 = smov 8  }
  0x23   :  { %24 = dma.hbm_to_vmem [thread:$0]  %s7531_s0, 256, %s19_s8, [#allocation3], %s4707_s1, %s4707_s1, %s4708_s17  }
  0x24   :  { %s4709_s20 = smov [#allocation7]   ;;  %s4653_s24 = scalar_lea.hbm %s7534_s3, 16384 }
  0x25   :  { %s44_s21 = sshll.u32 %s4709_s20, 4  ;;  %p4654_p2 = scmp.ne.s32.totalorder %s7534_s3, %s4653_s24  ;;  %s45_s21 = int_to_ptr.vmem [resolvable:$true] %s44_s21 }
  0x26   :  { %p4657_p3 = scmp.lt.u32.totalorder %s4653_s24, %s7534_s3 }
  0x28   :  { %p4659_p4 = pnand %p4657_p3, %p4654_p2 }
  0x2a   :  { %4662 = shalt.err (!%p4659_p4)
}
  0x2b   :  { %s4663_s29 = scalar_lea.vmem %s45_s21, 16384  ;;  %p4668_p6 = scmp.lt.s32.totalorder %s45_s21, %s45_s21 }
  0x2c   :  { %p4664_p5 = scmp.ne.s32.totalorder %s45_s21, %s4663_s29  ;;  %p4669_p7 = scmp.lt.s32.totalorder %s4663_s29, %s4663_s29 }
  0x2e   :  { %p4670_p8 = por %p4669_p7, %p4668_p6 }
  0x30   :  { %p4671_p9 = pnand %p4670_p8, %p4664_p5 }
  0x32   :  { %4674 = shalt.err (!%p4671_p9)
}
  0x33   :  { %s4710_s0 = smov 512   ;;  %s4711_s30 = smov 32  }
  0x34   :  { %50 = dma.hbm_to_vmem [thread:$0]  %s7534_s3, 16384, %s45_s21, [#allocation6], %s4710_s0, %s4710_s0, %s4711_s30  }
  0x35   :  { %4697 = dma.done.wait [#allocation3], 256  }
  0x36   :  { %4698 = vsyncadd [#allocation3], 4294967040 }
  0x37   :  { %4699 = dma.done.wait [#allocation6], 18176  }
  0x38   :  { %4700 = vsyncadd [#allocation6], 4294949120  ;;  %v7557_v0 = vmov 0.0   ;;  %v65_v1 = vld [vmem:[#allocation5 + $0x8] sm:$0xff]  ;;  %v67_v2 = vld [vmem:[#allocation5 + $0x18] sm:$0xff]  ;;  %vm97_vm0 = vcmask 1040384  }
  0x39   :  { %182 = vmatprep.mubr.f32.mxu0 %v7557_v0  ;;  %v64_v3 = vld [vmem:[#allocation5] sm:$0xff]  ;;  %vm90_vm1 = vcmask 400384   ;;  %v104_v4 = vand.u32 4294901760, %v65_v1  ;;  %v108_v5 = vand.u32 4294901760, %v67_v2  ;;  %v66_v6 = vld [vmem:[#allocation5 + $0x10] sm:$0xff]  ;;  %v69_v8 = vld [vmem:[#allocation5 + $0x28] sm:$0xff] }
  0x3a   :  { %v106_v7 = vand.u32 4294901760, %v64_v3  ;;  %v71_v9 = vld [vmem:[#allocation5 + $0x38] sm:$0xff]  ;;  %v110_v10 = vand.u32 4294901760, %v66_v6  ;;  %v112_v11 = vand.u32 4294901760, %v69_v8  ;;  %v68_v13 = vld [vmem:[#allocation5 + $0x20] sm:$0xff]  ;;  %v70_v14 = vld [vmem:[#allocation5 + $0x30] sm:$0xff] }
  0x3b   :  { %v116_v12 = vand.u32 4294901760, %v71_v9  ;;  %v73_v15 = vld [vmem:[#allocation5 + $0x48] sm:$0xff]  ;;  %v4784_v16 = vpack.c.bf16 %v108_v5, %v104_v4  ;;  %v4786_v17 = vsub.f32 %v65_v1, %v104_v4  ;;  %v4788_v18 = vsub.f32 %v67_v2, %v108_v5  ;;  %v75_v20 = vld [vmem:[#allocation5 + $0x58] sm:$0xff]  ;;  %v72_v21 = vld [vmem:[#allocation5 + $0x40] sm:$0xff] }
  0x3c   :  { %v4790_v19 = vsub.f32 %v64_v3, %v106_v7  ;;  %v74_v22 = vld [vmem:[#allocation5 + $0x50] sm:$0xff]  ;;  %v4792_v23 = vpack.c.bf16 %v110_v10, %v106_v7  ;;  %v4794_v24 = vsub.f32 %v66_v6, %v110_v10  ;;  %v4798_v26 = vsub.f32 %v69_v8, %v112_v11  ;;  %v77_v27 = vld [vmem:[#allocation5 + $0x68] sm:$0x1]  ;;  %v76_v36 = vld [vmem:[#allocation5 + $0x60] sm:$0x1] }
  0x3d   :  { %v4796_v25 = vpack.c.bf16 %v116_v12, %v112_v11  ;;  %3679 = vmatprep.subr.bf16.mxu0 %v4784_v16  ;;  %v4801_v28 = vsub.f32 %v71_v9, %v116_v12  ;;  %v114_v29 = vand.u32 4294901760, %v68_v13  ;;  %v118_v30 = vand.u32 4294901760, %v70_v14  ;;  %v62_v41 = vld [vmem:[#allocation2] sm:$0xff] }
  0x3e   :  { %v120_v31 = vand.u32 4294901760, %v73_v15  ;;  %3681 = vmatpush1.bf16.msra.mxu0 %v4792_v23  ;;  %v124_v32 = vand.u32 4294901760, %v75_v20  ;;  %v122_v33 = vand.u32 4294901760, %v72_v21  ;;  %v126_v34 = vand.u32 4294901760, %v74_v22 }
  0x3f   :  { %v4805_v35 = vsel %vm97_vm0, %v77_v27, 0  ;;  %3683 = vmatprep.subr.bf16.mxu0 %v4796_v25  ;;  %v4808_v37 = vpack.c.bf16 %v118_v30, %v114_v29  ;;  %v4810_v38 = vsub.f32 %v68_v13, %v114_v29  ;;  %v4812_v39 = vsub.f32 %v70_v14, %v118_v30  ;;  %v63_v27 = vld [vmem:[#allocation2 + $0x8] sm:$0xff] }
  0x40   :  { %v4814_v40 = vsub.f32 %v73_v15, %v120_v31  ;;  %v4816_v42 = vpack.c.bf16 %v124_v32, %v120_v31  ;;  %v4818_v43 = vsub.f32 %v75_v20, %v124_v32  ;;  %v4820_v44 = vpack.c.bf16 %v126_v34, %v122_v33 }
  0x41   :  { %v4822_v45 = vsub.f32 %v72_v21, %v122_v33  ;;  %v4824_v46 = vsub.f32 %v74_v22, %v126_v34  ;;  %v4827_v47 = vand.u32 4294901760, %v4805_v35  ;;  %v99_v48 = vsel %vm97_vm0, %v76_v36, 0 }
  0x42   :  { %v207_v49 = vand.u32 4294901760, %v4786_v17  ;;  %3685 = vmatpush1.bf16.msra.mxu0 %v4808_v37  ;;  %v4832_v50 = vand.u32 4294901760, %v99_v48  ;;  %v219_v51 = vand.u32 4294901760, %v4788_v18  ;;  %v92_v52 = vsel %vm90_vm1, %v62_v41, 0 }
  0x43   :  { %v213_v53 = vand.u32 4294901760, %v4790_v19  ;;  %3687 = vmatprep.subr.bf16.mxu0 %v4816_v42  ;;  %v4841_v55 = vand.u32 4294901760, %v92_v52  ;;  %v7549_v56 = vand.u32 4294901760, %v4794_v24  ;;  %v7548_v57 = vand.u32 4294901760, %v4798_v26 }
  0x44   :  { %v208_v54 = vsub.f32 %v4786_v17, %v207_v49  ;;  %v4846_v58 = vsub.f32 %v99_v48, %v4832_v50  ;;  %v220_v59 = vsub.f32 %v4788_v18, %v219_v51  ;;  %v7547_v61 = vand.u32 4294901760, %v4801_v28 }
  0x45   :  { %v214_v60 = vsub.f32 %v4790_v19, %v213_v53  ;;  %v4856_v63 = vsub.f32 %v92_v52, %v4841_v55  ;;  %v226_v1 = vsub.f32 %v4794_v24, %v7549_v56  ;;  %v232_v2 = vsub.f32 %v4798_v26, %v7548_v57  ;;  %v830_v56 = vld [vmem:[#allocation7 + $0xa0] sm:$0xff] }
  0x46   :  { %v209_v62 = vand.u32 4294901760, %v208_v54  ;;  %3689 = vmatpush1.bf16.msra.mxu0 %v4820_v44  ;;  %v221_v3 = vand.u32 4294901760, %v220_v59  ;;  %v244_v5 = vsub.f32 %v4801_v28, %v7547_v61  ;;  %v7546_v6 = vand.u32 4294901760, %v4810_v38 }
  0x47   :  { %v215_v4 = vand.u32 4294901760, %v214_v60  ;;  %129 = vmatprep.subr.mxu0 %v4827_v47  ;;  %v7542_v7 = vand.u32 4294901760, %v4856_v63  ;;  %v227_v8 = vand.u32 4294901760, %v226_v1  ;;  %v233_v9 = vand.u32 4294901760, %v232_v2 }
  0x48   :  { %v7545_v10 = vand.u32 4294901760, %v4812_v39  ;;  %v3690_v11 = vpack.c.bf16 %v221_v3, %v209_v62  ;;  %v245_v12 = vand.u32 4294901760, %v244_v5  ;;  %v238_v13 = vsub.f32 %v4810_v38, %v7546_v6  ;;  %v4993_v6 = vld [vmem:[#allocation7 + $0x70] sm:$0xff] }
  0x49   :  { %v7544_v14 = vand.u32 4294901760, %v4814_v40  ;;  %v186_v15 = vsub.f32 %v4856_v63, %v7542_v7  ;;  %v3692_v20 = vpack.c.bf16 %v227_v8, %v215_v4  ;;  %v7543_v22 = vand.u32 4294901760, %v4818_v43  ;;  %8125 = vst [vmem:[#allocation30_spill] sm:$0xff] %v4993_v6 }
  0x4a   :  { %v250_v21 = vsub.f32 %v4812_v39, %v7545_v10  ;;  %131 = vmatpush1.msra.mxu0 %v4832_v50  ;;  %v3694_v29 = vpack.c.bf16 %v245_v12, %v233_v9  ;;  %v239_v30 = vand.u32 4294901760, %v238_v13  ;;  %v7541_v32 = vand.u32 4294901760, %v4822_v45 }
  0x4b   :  { %v256_v31 = vsub.f32 %v4814_v40, %v7544_v14  ;;  %3691 = vmatprep.subr.bf16.mxu0 %v3690_v11  ;;  %v187_v33 = vand.u32 4294901760, %v186_v15  ;;  %v268_v36 = vsub.f32 %v4818_v43, %v7543_v22  ;;  %v7540_v41 = vand.u32 4294901760, %v4824_v46  ;;  %v831_v14 = vld [vmem:[#allocation7 + $0xa8] sm:$0xff] }
  0x4c   :  { %v251_v34 = vand.u32 4294901760, %v250_v21  ;;  %v262_v52 = vsub.f32 %v4822_v45, %v7541_v32  ;;  %v95_v54 = vsel %vm90_vm1, %v63_v27, 0  ;;  %v4898_v59 = vsub.f32 %v4805_v35, %v4827_v47  ;;  %v4980_v32 = vld [vmem:[#allocation7 + $0x50] sm:$0xff] }
  0x4d   :  { %v257_v48 = vand.u32 4294901760, %v256_v31  ;;  %188 = vmatmul.mubr.f32.vlgmr.msra.gmra.mrb[0].mxu0 %v187_v33  ;;  %v269_v60 = vand.u32 4294901760, %v268_v36  ;;  %v274_v62 = vsub.f32 %v4824_v46, %v7540_v41  ;;  %v4903_v1 = vand.u32 4294901760, %v95_v54  ;;  %v815_v36 = vld [vmem:[#allocation7 + $0x28] sm:$0xff]  ;;  %8122 = vst [vmem:[#allocation27_spill] sm:$0xff] %v4980_v32 }
  0x4e   :  { %3693 = vmatpush1.bf16.msra.mxu0 %v3692_v20  ;;  %v3696_v2 = vpack.c.bf16 %v251_v34, %v239_v30  ;;  %v263_v3 = vand.u32 4294901760, %v262_v52  ;;  %193 = vmatprep.mubr.f32.mxu0 %v7557_v0  ;;  %v7538_v4 = vand.u32 4294901760, %v4898_v59  ;;  %v7537_v5 = vand.u32 4294901760, %v4846_v58  ;;  %v811_v34 = vld [vmem:[#allocation7 + $0x8] sm:$0xff] }
  0x4f   :  { %3695 = vmatprep.subr.bf16.mxu0 %v3694_v29  ;;  %v3698_v35 = vpack.c.bf16 %v269_v60, %v257_v48  ;;  %v275_v8 = vand.u32 4294901760, %v274_v62  ;;  %v4909_v9 = vsub.f32 %v95_v54, %v4903_v1  ;;  %v3702_v30 = vpack.c.bf16 %v4788_v18, %v4786_v17  ;;  %v810_v62 = vld [vmem:[#allocation7] sm:$0xff] }
  0x50   :  { %v280_v11 = vsub.f32 %v4898_v59, %v7538_v4  ;;  %v286_v15 = vsub.f32 %v4846_v58, %v7537_v5  ;;  %v3704_v31 = vpack.c.bf16 %v4794_v24, %v4790_v19  ;;  %v3706_v33 = vpack.c.bf16 %v4801_v28, %v4798_v26 }
  0x51   :  { %v7539_v12 = vand.u32 4294901760, %v4909_v9  ;;  %v3700_v13 = vpack.c.bf16 %v275_v8, %v263_v3  ;;  %v3708_v48 = vpack.c.bf16 %v4812_v39, %v4810_v38  ;;  %v3710_v52 = vpack.c.bf16 %v4818_v43, %v4814_v40 }
  0x52   :  { %3697 = vmatpush1.bf16.msra.mxu0 %v3696_v2  ;;  %v281_v21 = vand.u32 4294901760, %v280_v11  ;;  %v287_v29 = vand.u32 4294901760, %v286_v15  ;;  %v960_v54 = vand.u32 4294901760, %v811_v34  ;;  %v964_v60 = vand.u32 4294901760, %v815_v36  ;;  %v814_v2 = vld [vmem:[#allocation7 + $0x20] sm:$0xff] }
  0x53   :  { %3699 = vmatprep.subr.bf16.mxu0 %v3698_v35  ;;  %v197_v20 = vsub.f32 %v4909_v9, %v7539_v12  ;;  %v3712_v3 = vpack.c.bf16 %v4824_v46, %v4822_v45  ;;  %v819_v35 = vld [vmem:[#allocation7 + $0x48] sm:$0xff]  ;;  %v962_v15 = vand.u32 4294901760, %v810_v62  ;;  %v8132_v17 = vand.u32 4294901760, %v4794_v24 }
  0x54   :  { %v4938_v8 = vpack.c.bf16 %v964_v60, %v960_v54  ;;  %v4940_v11 = vsub.f32 %v811_v34, %v960_v54  ;;  %v818_v54 = vld [vmem:[#allocation7 + $0x40] sm:$0xff]  ;;  %v8146_v24 = vand.u32 4294901760, %v4993_v6 }
  0x55   :  { %v198_v27 = vand.u32 4294901760, %v197_v20  ;;  %v966_v20 = vand.u32 4294901760, %v814_v2  ;;  %v970_v12 = vand.u32 4294901760, %v818_v54  ;;  %v3728_v18 = vpack.c.bf16 %v8132_v17, %v213_v53  ;;  %v5046_v53 = vld [vmem:[#allocation7 + $0x98] sm:$0xff] }
  0x56   :  { %3701 = vmatpush1.bf16.msra.mxu0 %v3700_v13  ;;  %8107 = vst [vmem:[#allocation12_spill] sm:$0xff] %v4938_v8  ;;  %8108 = vst [vmem:[#allocation13_spill] sm:$0xff] %v4940_v11  ;;  %v4942_v13 = vsub.f32 %v815_v36, %v964_v60  ;;  %3751 = vmatprep.subr.bf16.mxu1 %v4938_v8  ;;  %v4954_v36 = vld [vmem:[#allocation7 + $0x38] sm:$0xff]  ;;  %v4961_v60 = vld [vmem:[#allocation7 + $0x30] sm:$0xff] }
  0x57   :  { %199 = vmatmul.mubr.f32.gmra.mrb[2].mxu0 %v198_v27  ;;  %282 = vmatprep.subr.mxu0 %v281_v21  ;;  %v823_v21 = vld [vmem:[#allocation7 + $0x68] sm:$0xff]  ;;  %v968_v27 = vand.u32 4294901760, %v819_v35  ;;  %8114 = vst [vmem:[#allocation19_spill] sm:$0xff] %v4954_v36  ;;  %8117 = vst [vmem:[#allocation22_spill] sm:$0xff] %v4961_v60  ;;  %v7552_v4 = vand.u32 4294901760, %v4954_v36  ;;  %v4985_v22 = vsub.f32 %v818_v54, %v970_v12 }
  0x58   :  { %339 = vmatprep.mubr.f32.mxu0 %v7557_v0  ;;  %8109 = vst [vmem:[#allocation14_spill] sm:$0xff] %v4942_v13  ;;  %v972_v34 = vand.u32 4294901760, %v823_v21  ;;  %8138 = vst [vmem:[#allocation39_spill] sm:$0xff] %v5046_v53 }
  0x59   :  { %8123 = vst [vmem:[#allocation28_spill] sm:$0xff] %v4985_v22  ;;  %v5002_v7 = vsub.f32 %v4954_v36, %v7552_v4  ;;  %v826_v4 = vld [vmem:[#allocation7 + $0x80] sm:$0xff]  ;;  %v8163_v36 = vand.u32 4294901760, %v4856_v63 }
  0x5a   :  { %288 = vmatpush1.msra.mxu0 %v287_v29  ;;  %v4945_v29 = vpack.c.bf16 %v966_v20, %v962_v15  ;;  %v4970_v5 = vsub.f32 %v823_v21, %v972_v34 }
  0x5b   :  { %3703 = vmatprep.subr.bf16.mxu0 %v3702_v30  ;;  %341 = vmatmul.mubr.f32.vlgmr.msra.gmra.mrb[0].mxu0 %v4841_v55  ;;  %v4947_v30 = vsub.f32 %v810_v62, %v962_v15  ;;  %v4963_v62 = vld [vmem:[#allocation7 + $0x58] sm:$0xff]  ;;  %8128 = vst [vmem:[#allocation33_spill] sm:$0xff] %v5002_v7 }
  0x5c   :  { %3705 = vmatpush1.bf16.msra.mxu0 %v3704_v31  ;;  %346 = vmatprep.mubr.f32.mxu0 %v7557_v0  ;;  %8110 = vst [vmem:[#allocation15_spill] sm:$0xff] %v4945_v29  ;;  %v4949_v31 = vsub.f32 %v814_v2, %v966_v20  ;;  %8118 = vst [vmem:[#allocation23_spill] sm:$0xff] %v4963_v62  ;;  %v4965_v2 = vpack.c.bf16 %v972_v34, %v968_v27  ;;  %v4968_v20 = vld [vmem:[#allocation7 + $0x78] sm:$0xff]  ;;  %v7553_v41 = vand.u32 4294901760, %v4963_v62  ;;  %v827_v34 = vld [vmem:[#allocation7 + $0x88] sm:$0xff] }
  0x5d   :  { %3707 = vmatprep.subr.bf16.mxu0 %v3706_v33  ;;  %8111 = vst [vmem:[#allocation16_spill] sm:$0xff] %v4947_v30  ;;  %v4951_v33 = vld [vmem:[#allocation7 + $0x18] sm:$0xff]  ;;  %3753 = vmatpush1.bf16.msra.mxu1 %v4945_v29  ;;  %8120 = vst [vmem:[#allocation25_spill] sm:$0xff] %v4968_v20 }
  0x5e   :  { %8112 = vst [vmem:[#allocation17_spill] sm:$0xff] %v4949_v31  ;;  %8113 = vst [vmem:[#allocation18_spill] sm:$0xff] %v4951_v33  ;;  %v7550_v15 = vand.u32 4294901760, %v4951_v33  ;;  %3755 = vmatprep.subr.bf16.mxu1 %v4965_v2 }
  0x5f   :  { %348 = vmatmul.mubr.f32.gmra.mrb[2].mxu0 %v4903_v1  ;;  %8119 = vst [vmem:[#allocation24_spill] sm:$0xff] %v4965_v2  ;;  %8121 = vst [vmem:[#allocation26_spill] sm:$0xff] %v4970_v5  ;;  %v8141_v2 = vand.u32 4294901760, %v4980_v32 }
  0x60   :  { %3709 = vmatpush1.bf16.msra.mxu0 %v3708_v48  ;;  %446 = vmatprep.mubr.f32.mxu0 %v7557_v0  ;;  %v4956_v48 = vld [vmem:[#allocation7 + $0x10] sm:$0xff]  ;;  %v4991_v10 = vsub.f32 %v4951_v33, %v7550_v15  ;;  %v976_v15 = vand.u32 4294901760, %v827_v34 }
  0x61   :  { %3711 = vmatprep.subr.bf16.mxu0 %v3710_v52  ;;  %8115 = vst [vmem:[#allocation20_spill] sm:$0xff] %v4956_v48  ;;  %v4959_v52 = vsub.f32 %v819_v35, %v968_v27  ;;  %v7551_v35 = vand.u32 4294901760, %v4956_v48  ;;  %v7554_v27 = vand.u32 4294901760, %v4961_v60  ;;  %v5057_v29 = vsub.f32 %v4980_v32, %v8141_v2  ;;  %v5123_v32 = vld [vmem:[#allocation7 + $0xb0] sm:$0xff] }
  0x62   :  { %8124 = vst [vmem:[#allocation29_spill] sm:$0xff] %v4991_v10  ;;  %8161 = vst [vmem:[#allocation49_spill] sm:$0xff] %v5123_v32 }
  0x63   :  { %8116 = vst [vmem:[#allocation21_spill] sm:$0xff] %v4959_v52  ;;  %v5007_v54 = vsub.f32 %v4956_v48, %v7551_v35  ;;  %v980_v35 = vand.u32 4294901760, %v831_v14  ;;  %8142 = vst [vmem:[#allocation42_spill] sm:$0xff] %v5057_v29  ;;  %v838_v48 = vld [vmem:[#allocation7 + $0xe0] sm:$0xff] }
  0x64   :  { %3713 = vmatpush1.bf16.msra.mxu0 %v3712_v3  ;;  %v822_v3 = vld [vmem:[#allocation7 + $0x60] sm:$0xff] }
  0x65   :  { %392 = vmatprep.subr.mxu0 %v4898_v59  ;;  %v974_v21 = vand.u32 4294901760, %v822_v3  ;;  %8129 = vst [vmem:[#allocation34_spill] sm:$0xff] %v5007_v54  ;;  %v5048_v17 = vpack.c.bf16 %v980_v35, %v976_v15 }
  0x67   :  { %v4995_v61 = vpack.c.bf16 %v974_v21, %v970_v12  ;;  %v4997_v57 = vsub.f32 %v822_v3, %v974_v21  ;;  %v3726_v12 = vpack.c.bf16 %v219_v51, %v207_v49  ;;  %v5018_v3 = vsub.f32 %v4961_v60, %v7554_v27  ;;  %8139 = vst [vmem:[#allocation40_spill] sm:$0xff] %v5048_v17  ;;  %v834_v60 = vld [vmem:[#allocation7 + $0xc0] sm:$0xff] }
  0x68   :  { %395 = vmatpush1.msra.mxu0 %v4846_v58  ;;  %v5023_v21 = vsub.f32 %v4963_v62, %v7553_v41  ;;  %v8133_v49 = vand.u32 4294901760, %v4968_v20  ;;  %v5038_v27 = vsub.f32 %v827_v34, %v976_v15  ;;  %v982_v34 = vand.u32 4294901760, %v830_v56  ;;  %v835_v41 = vld [vmem:[#allocation7 + $0xc8] sm:$0xff] }
  0x69   :  { %3715 = vmatprep.subr.bf16.mxu0 %v4784_v16  ;;  %449 = vmatmul.mubr.f32.vlgmr.msra.gmra.mrb[0].mxu0 %v4856_v63  ;;  %8126 = vst [vmem:[#allocation31_spill] sm:$0xff] %v4995_v61  ;;  %8127 = vst [vmem:[#allocation32_spill] sm:$0xff] %v4997_v57  ;;  %v8153_v62 = vand.u32 4294901760, %v4814_v40 }
  0x6a   :  { %3717 = vmatpush1.bf16.msra.mxu0 %v4792_v23  ;;  %454 = vmatprep.mubr.f32.mxu0 %v7557_v0  ;;  %8130 = vst [vmem:[#allocation35_spill] sm:$0xff] %v5018_v3  ;;  %8131 = vst [vmem:[#allocation36_spill] sm:$0xff] %v5023_v21  ;;  %v5035_v51 = vsub.f32 %v4968_v20, %v8133_v49  ;;  %v5050_v49 = vsub.f32 %v831_v14, %v980_v35  ;;  %v8148_v35 = vand.u32 4294901760, %v4991_v10 }
  0x6b   :  { %3719 = vmatprep.subr.bf16.mxu0 %v4796_v25  ;;  %3757 = vmatpush1.bf16.msra.mxu1 %v4995_v61  ;;  %8135 = vst [vmem:[#allocation38_spill] sm:$0xff] %v5038_v27  ;;  %v8136_v61 = vand.u32 4294901760, %v4798_v26  ;;  %v5059_v26 = vld [vmem:[#allocation7 + $0xb8] sm:$0xff]  ;;  %v5087_v2 = vsub.f32 %v830_v56, %v982_v34  ;;  %v984_v20 = vand.u32 4294901760, %v835_v41 }
  0x6c   :  { %8134 = vst [vmem:[#allocation37_spill] sm:$0xff] %v5035_v51  ;;  %8140 = vst [vmem:[#allocation41_spill] sm:$0xff] %v5050_v49  ;;  %3759 = vmatprep.subr.bf16.mxu1 %v5048_v17  ;;  %v2470_v14 = vsub.f32 %v4991_v10, %v8148_v35  ;;  %v8154_v35 = vand.u32 4294901760, %v4818_v43  ;;  %v8157_v40 = vand.u32 4294901760, %v5035_v51  ;;  %v8164_v33 = vand.u32 4294901760, %v5059_v26 }
  0x6d   :  { %457 = vmatmul.mubr.f32.gmra.mrb[2].mxu0 %v4909_v9  ;;  %8143 = vst [vmem:[#allocation43_spill] sm:$0xff] %v5059_v26  ;;  %8150 = vst [vmem:[#allocation46_spill] sm:$0xff] %v5087_v2 }
  0x6e   :  { %3721 = vmatpush1.bf16.msra.mxu0 %v4808_v37  ;;  %541 = vmatprep.mubr.f32.mxu0 %v7557_v0  ;;  %v8137_v0 = vand.u32 4294901760, %v4801_v28  ;;  %v8144_v28 = vand.u32 4294901760, %v4810_v38  ;;  %v5075_v38 = vsub.f32 %v4993_v6, %v8146_v24  ;;  %v8151_v24 = vand.u32 4294901760, %v5002_v7 }
  0x6f   :  { %3723 = vmatprep.subr.bf16.mxu0 %v4816_v42  ;;  %v3734_v17 = vpack.c.bf16 %v8154_v35, %v8153_v62  ;;  %v5113_v43 = vsub.f32 %v5035_v51, %v8157_v40  ;;  %v8158_v35 = vand.u32 4294901760, %v5046_v53  ;;  %v2471_v40 = vand.u32 4294901760, %v2470_v14 }
  0x70   :  { %v3730_v19 = vpack.c.bf16 %v8137_v0, %v8136_v61  ;;  %v978_v0 = vand.u32 4294901760, %v826_v4  ;;  %v8145_v61 = vand.u32 4294901760, %v4812_v39  ;;  %8147 = vst [vmem:[#allocation44_spill] sm:$0xff] %v5075_v38  ;;  %v2482_v6 = vsub.f32 %v5002_v7, %v8151_v24 }
  0x71   :  { %v5132_v62 = vsub.f32 %v5059_v26, %v8164_v33  ;;  %v5199_v33 = vld [vmem:[#allocation7 + $0x138] sm:$0xff] }
  0x72   :  { %v5065_v15 = vpack.c.bf16 %v8145_v61, %v8144_v28  ;;  %3725 = vmatpush1.bf16.msra.mxu0 %v4820_v44  ;;  %v5078_v28 = vsub.f32 %v826_v4, %v978_v0  ;;  %v839_v61 = vld [vmem:[#allocation7 + $0xe8] sm:$0xff]  ;;  %v5085_v8 = vpack.c.bf16 %v982_v34, %v978_v0  ;;  %v8152_v4 = vand.u32 4294901760, %v5007_v54  ;;  %8186 = vst [vmem:[#allocation64_spill] sm:$0xff] %v5199_v33 }
  0x73   :  { %488 = vmatprep.subr.mxu0 %v4827_v47  ;;  %v8155_v0 = vand.u32 4294901760, %v5018_v3  ;;  %v8156_v34 = vand.u32 4294901760, %v5023_v21  ;;  %8165 = vst [vmem:[#allocation51_spill] sm:$0xff] %v5132_v62 }
  0x74   :  { %8149 = vst [vmem:[#allocation45_spill] sm:$0xff] %v5085_v8  ;;  %v2476_v39 = vsub.f32 %v5007_v54, %v8152_v4  ;;  %3761 = vmatpush1.bf16.msra.mxu1 %v5085_v8  ;;  %v988_v4 = vand.u32 4294901760, %v839_v61  ;;  %v5125_v8 = vsub.f32 %v835_v41, %v984_v20  ;;  %v2483_v41 = vand.u32 4294901760, %v2482_v6 }
  0x75   :  { %v2488_v56 = vsub.f32 %v5018_v3, %v8155_v0  ;;  %v5106_v24 = vsub.f32 %v5023_v21, %v8156_v34  ;;  %v5119_v0 = vsub.f32 %v5046_v53, %v8158_v35  ;;  %v5121_v34 = vld [vmem:[#allocation7 + $0x90] sm:$0xff]  ;;  %v8168_v53 = vmov 0.0  }
  0x76   :  { %490 = vmatpush1.msra.mxu0 %v4832_v50  ;;  %8160 = vst [vmem:[#allocation48_spill] sm:$0xff] %v5121_v34  ;;  %8162 = vst [vmem:[#allocation50_spill] sm:$0xff] %v5125_v8  ;;  %v5134_v51 = vpack.c.bf16 %v988_v4, %v984_v20  ;;  %v5136_v35 = vsub.f32 %v839_v61, %v988_v4  ;;  %v2477_v21 = vand.u32 4294901760, %v2476_v39  ;;  %v990_v61 = vand.u32 4294901760, %v838_v48 }
  0x77   :  { %8159 = vst [vmem:[#allocation47_spill] sm:$0xff] %v5119_v0  ;;  %3727 = vmatprep.subr.bf16.mxu0 %v3726_v12  ;;  %545 = vmatmul.mubr.f32.vlgmr.msra.gmra.mrb[0].mxu0 %v8163_v36  ;;  %v8169_v12 = vand.u32 4294901760, %v5057_v29  ;;  %v986_v36 = vand.u32 4294901760, %v834_v60  ;;  %v2489_v14 = vand.u32 4294901760, %v2488_v56  ;;  %v8170_v4 = vand.u32 4294901760, %v4822_v45  ;;  %v5161_v45 = vld [vmem:[#allocation7 + $0xf8] sm:$0xff] }
  0x78   :  { %8166 = vst [vmem:[#allocation52_spill] sm:$0xff] %v5134_v51  ;;  %8167 = vst [vmem:[#allocation53_spill] sm:$0xff] %v5136_v35  ;;  %3729 = vmatpush1.bf16.msra.mxu0 %v3728_v18  ;;  %550 = vmatprep.mubr.f32.mxu0 %v8168_v53  ;;  %v843_v18 = vld [vmem:[#allocation7 + $0x108] sm:$0xff]  ;;  %v8171_v6 = vand.u32 4294901760, %v4824_v46  ;;  %v2495_v26 = vand.u32 4294901760, %v5106_v24  ;;  %v8173_v56 = vand.u32 4294901760, %v4909_v9 }
  0x79   :  { %v5142_v63 = vsub.f32 %v5057_v29, %v8169_v12  ;;  %3731 = vmatprep.subr.bf16.mxu0 %v3730_v19  ;;  %3763 = vmatprep.subr.bf16.mxu1 %v5134_v51  ;;  %v7597_v12 = vand.u32 4294901760, %v5119_v0  ;;  %v5153_v29 = vsub.f32 %v834_v60, %v986_v36  ;;  %v847_v19 = vld [vmem:[#allocation7 + $0x128] sm:$0xff]  ;;  %v2507_v20 = vand.u32 4294901760, %v5113_v43  ;;  %v5159_v51 = vld [vmem:[#allocation7 + $0xd8] sm:$0xff]  ;;  %8175 = vst [vmem:[#allocation56_spill] sm:$0xff] %v5161_v45 }
  0x7a   :  { %v3736_v39 = vpack.c.bf16 %v8171_v6, %v8170_v4  ;;  %8174 = vst [vmem:[#allocation55_spill] sm:$0xff] %v5159_v51  ;;  %v5163_v46 = vpack.c.bf16 %v990_v61, %v986_v36  ;;  %v5165_v4 = vsub.f32 %v838_v48, %v990_v61  ;;  %v5169_v60 = vpack.c.bf16 %v2483_v41, %v2471_v40  ;;  %v5175_v6 = vld [vmem:[#allocation7 + $0xd0] sm:$0xff]  ;;  %v5191_v61 = vld [vmem:[#allocation7 + $0x118] sm:$0xff] }
  0x7b   :  { %8172 = vst [vmem:[#allocation54_spill] sm:$0xff] %v5153_v29  ;;  %554 = vmatmul.mubr.f32.gmra.mrb[2].mxu0 %v8173_v56  ;;  %v2501_v9 = vand.u32 4294901760, %v5142_v63  ;;  %v8178_v24 = vand.u32 4294901760, %v5075_v38  ;;  %8179 = vst [vmem:[#allocation59_spill] sm:$0xff] %v5175_v6  ;;  %v992_v56 = vand.u32 4294901760, %v843_v18  ;;  %v5177_v36 = vpack.c.bf16 %v2489_v14, %v2477_v21  ;;  %v5189_v63 = vld [vmem:[#allocation7 + $0xf0] sm:$0xff] }
  0x7c   :  { %8176 = vst [vmem:[#allocation57_spill] sm:$0xff] %v5163_v46  ;;  %8177 = vst [vmem:[#allocation58_spill] sm:$0xff] %v5165_v4  ;;  %3733 = vmatpush1.bf16.msra.mxu0 %v5065_v15  ;;  %666 = vmatprep.mubr.f32.mxu0 %v8168_v53  ;;  %v8180_v48 = vand.u32 4294901760, %v5121_v34  ;;  %v8182_v40 = vand.u32 4294901760, %v5123_v32  ;;  %v2518_v21 = vsub.f32 %v5119_v0, %v7597_v12 }
  0x7d   :  { %v2512_v43 = vsub.f32 %v5075_v38, %v8178_v24  ;;  %3735 = vmatprep.subr.bf16.mxu0 %v3734_v17  ;;  %8184 = vst [vmem:[#allocation62_spill] sm:$0xff] %v5189_v63  ;;  %8185 = vst [vmem:[#allocation63_spill] sm:$0xff] %v5191_v61  ;;  %3765 = vmatpush1.bf16.msra.mxu1 %v5163_v46  ;;  %v996_v24 = vand.u32 4294901760, %v847_v19  ;;  %v842_v17 = vld [vmem:[#allocation7 + $0x100] sm:$0xff]  ;;  %v8197_v46 = vand.u32 4294901760, %v5175_v6 }
  0x7e   :  { %v5182_v15 = vsub.f32 %v5121_v34, %v8180_v48  ;;  %v5187_v41 = vsub.f32 %v5123_v32, %v8182_v40  ;;  %v5201_v40 = vsub.f32 %v843_v18, %v992_v56  ;;  %v846_v32 = vld [vmem:[#allocation7 + $0x120] sm:$0xff]  ;;  %v8188_v34 = vand.u32 4294901760, %v5132_v62 }
  0x7f   :  { %v5207_v3 = vpack.c.bf16 %v996_v24, %v992_v56  ;;  %v5209_v54 = vsub.f32 %v847_v19, %v996_v24  ;;  %v2513_v12 = vand.u32 4294901760, %v2512_v43  ;;  %v994_v0 = vand.u32 4294901760, %v842_v17  ;;  %v851_v56 = vld [vmem:[#allocation7 + $0x148] sm:$0xff] }
  0x80   :  { %8181 = vst [vmem:[#allocation60_spill] sm:$0xff] %v5182_v15  ;;  %8183 = vst [vmem:[#allocation61_spill] sm:$0xff] %v5187_v41  ;;  %v2530_v38 = vsub.f32 %v5132_v62, %v8188_v34  ;;  %3737 = vmatpush1.bf16.msra.mxu0 %v3736_v39  ;;  %v8191_v18 = vand.u32 4294901760, %v4898_v59  ;;  %v998_v19 = vand.u32 4294901760, %v846_v32  ;;  %v2519_v39 = vand.u32 4294901760, %v2518_v21  ;;  %v855_v34 = vld [vmem:[#allocation7 + $0x168] sm:$0xff] }
  0x81   :  { %8187 = vst [vmem:[#allocation65_spill] sm:$0xff] %v5201_v40  ;;  %8189 = vst [vmem:[#allocation66_spill] sm:$0xff] %v5207_v3  ;;  %3767 = vmatprep.subr.bf16.mxu1 %v5207_v3  ;;  %v8192_v43 = vand.u32 4294901760, %v5159_v51  ;;  %v8194_v48 = vand.u32 4294901760, %v5161_v45  ;;  %v5234_v14 = vsub.f32 %v5175_v6, %v8197_v46  ;;  %v1000_v46 = vand.u32 4294901760, %v851_v56  ;;  %v5289_v6 = vld [vmem:[#allocation7 + $0x178] sm:$0xff] }
  0x82   :  { %8190 = vst [vmem:[#allocation67_spill] sm:$0xff] %v5209_v54  ;;  %611 = vmatprep.subr.mxu0 %v8191_v18  ;;  %v5229_v18 = vsub.f32 %v842_v17, %v994_v0  ;;  %v2531_v40 = vand.u32 4294901760, %v2530_v38  ;;  %v5236_v21 = vpack.c.bf16 %v998_v19, %v994_v0  ;;  %v5238_v3 = vsub.f32 %v846_v32, %v998_v19  ;;  %v5268_v19 = vld [vmem:[#allocation7 + $0x110] sm:$0xff]  ;;  %v5341_v62 = vld [vmem:[#allocation7 + $0x1b8] sm:$0xff] }
  0x83   :  { %v5222_v24 = vsub.f32 %v5159_v51, %v8192_v43  ;;  %v5227_v59 = vsub.f32 %v5161_v45, %v8194_v48  ;;  %8198 = vst [vmem:[#allocation71_spill] sm:$0xff] %v5234_v14  ;;  %v8201_v43 = vand.u32 4294901760, %v4846_v58  ;;  %v5242_v51 = vpack.c.bf16 %v2507_v20, %v2495_v26  ;;  %8209 = vst [vmem:[#allocation77_spill] sm:$0xff] %v5268_v19 }
  0x84   :  { %8196 = vst [vmem:[#allocation70_spill] sm:$0xff] %v5229_v18  ;;  %8199 = vst [vmem:[#allocation72_spill] sm:$0xff] %v5236_v21  ;;  %v8202_v48 = vand.u32 4294901760, %v5189_v63  ;;  %v8204_v38 = vand.u32 4294901760, %v5191_v61  ;;  %v5256_v32 = vpack.c.bf16 %v2513_v12, %v2501_v9  ;;  %v8206_v58 = vand.u32 4294901760, %v5182_v15  ;;  %3769 = vmatpush1.bf16.msra.mxu1 %v5236_v21  ;;  %v5322_v21 = vld [vmem:[#allocation7 + $0x170] sm:$0xff] }
  0x85   :  { %8193 = vst [vmem:[#allocation68_spill] sm:$0xff] %v5222_v24  ;;  %8195 = vst [vmem:[#allocation69_spill] sm:$0xff] %v5227_v59  ;;  %615 = vmatpush1.msra.mxu0 %v8201_v43  ;;  %v8207_v0 = vand.u32 4294901760, %v5199_v33  ;;  %v1004_v43 = vand.u32 4294901760, %v855_v34 }
  0x86   :  { %8200 = vst [vmem:[#allocation73_spill] sm:$0xff] %v5238_v3  ;;  %v5247_v17 = vsub.f32 %v5189_v63, %v8202_v48  ;;  %v5252_v45 = vsub.f32 %v5191_v61, %v8204_v38  ;;  %3739 = vmatprep.subr.bf16.mxu0 %v4784_v16  ;;  %668 = vmatmul.mubr.f32.vlgmr.msra.gmra.mrb[0].mxu0 %v4841_v55  ;;  %v850_v48 = vld [vmem:[#allocation7 + $0x140] sm:$0xff]  ;;  %v8210_v16 = vand.u32 4294901760, %v5187_v41  ;;  %8214 = vst [vmem:[#allocation81_spill] sm:$0xff] %v5289_v6 }
  0x87   :  { %v5261_v26 = vsub.f32 %v5182_v15, %v8206_v58  ;;  %v5266_v20 = vsub.f32 %v5199_v33, %v8207_v0  ;;  %3741 = vmatpush1.bf16.msra.mxu0 %v4792_v23  ;;  %673 = vmatprep.mubr.f32.mxu0 %v8168_v53  ;;  %v5279_v58 = vld [vmem:[#allocation7 + $0x130] sm:$0xff]  ;;  %v5281_v0 = vld [vmem:[#allocation7 + $0x158] sm:$0xff]  ;;  %v5283_v33 = vsub.f32 %v851_v56, %v1000_v46  ;;  %v854_v61 = vld [vmem:[#allocation7 + $0x160] sm:$0xff]  ;;  %v1002_v15 = vand.u32 4294901760, %v850_v48 }
  0x88   :  { %8203 = vst [vmem:[#allocation74_spill] sm:$0xff] %v5247_v17  ;;  %8205 = vst [vmem:[#allocation75_spill] sm:$0xff] %v5252_v45  ;;  %v5275_v12 = vsub.f32 %v5187_v41, %v8210_v16  ;;  %3743 = vmatprep.subr.bf16.mxu0 %v4796_v25  ;;  %v5286_v23 = vpack.c.bf16 %v2531_v40, %v2519_v39  ;;  %v5292_v16 = vpack.c.bf16 %v1004_v43, %v1000_v46  ;;  %v863_v40 = vld [vmem:[#allocation7 + $0x1a8] sm:$0xff] }
  0x89   :  { %8208 = vst [vmem:[#allocation76_spill] sm:$0xff] %v5266_v20  ;;  %8211 = vst [vmem:[#allocation78_spill] sm:$0xff] %v5279_v58  ;;  %v5294_v38 = vsub.f32 %v855_v34, %v1004_v43  ;;  %v1006_v46 = vand.u32 4294901760, %v854_v61  ;;  %v859_v34 = vld [vmem:[#allocation7 + $0x188] sm:$0xff]  ;;  %v2525_v43 = vand.u32 4294901760, %v5261_v26  ;;  %v8217_v41 = vand.u32 4294901760, %v5222_v24 }
  0x8a   :  { %8212 = vst [vmem:[#allocation79_spill] sm:$0xff] %v5281_v0  ;;  %8213 = vst [vmem:[#allocation80_spill] sm:$0xff] %v5283_v33  ;;  %675 = vmatmul.mubr.f32.gmra.mrb[2].mxu0 %v4903_v1  ;;  %3771 = vmatprep.subr.bf16.mxu1 %v5292_v16  ;;  %v5311_v9 = vsub.f32 %v850_v48, %v1002_v15  ;;  %v8219_v39 = vand.u32 4294901760, %v5227_v59  ;;  %v5320_v26 = vld [vmem:[#allocation7 + $0x150] sm:$0xff]  ;;  %v8225_v48 = vand.u32 4294901760, %v5247_v17 }
  0x8b   :  { %8215 = vst [vmem:[#allocation82_spill] sm:$0xff] %v5292_v16  ;;  %8216 = vst [vmem:[#allocation83_spill] sm:$0xff] %v5294_v38  ;;  %3745 = vmatpush1.bf16.msra.mxu0 %v4808_v37  ;;  %759 = vmatprep.mubr.f32.mxu0 %v8168_v53  ;;  %v2542_v56 = vsub.f32 %v5222_v24, %v8217_v41  ;;  %v8220_v37 = vand.u32 4294901760, %v5234_v14  ;;  %v5324_v41 = vpack.c.bf16 %v1006_v46, %v1002_v15 }
  0x8c   :  { %8218 = vst [vmem:[#allocation84_spill] sm:$0xff] %v5311_v9  ;;  %3747 = vmatprep.subr.bf16.mxu0 %v4816_v42  ;;  %v2554_v63 = vsub.f32 %v5227_v59, %v8219_v39  ;;  %8221 = vst [vmem:[#allocation85_spill] sm:$0xff] %v5320_v26  ;;  %v5326_v25 = vsub.f32 %v854_v61, %v1006_v46  ;;  %v2560_v42 = vsub.f32 %v5247_v17, %v8225_v48 }
  0x8d   :  { %v2548_v16 = vsub.f32 %v5234_v14, %v8220_v37  ;;  %8222 = vst [vmem:[#allocation86_spill] sm:$0xff] %v5322_v21  ;;  %8223 = vst [vmem:[#allocation87_spill] sm:$0xff] %v5324_v41  ;;  %v8226_v24 = vand.u32 4294901760, %v5252_v45  ;;  %v8227_v59 = vand.u32 4294901760, %v5268_v19  ;;  %v5339_v14 = vld [vmem:[#allocation7 + $0x198] sm:$0xff]  ;;  %v1008_v15 = vand.u32 4294901760, %v859_v34  ;;  %3773 = vmatpush1.bf16.msra.mxu1 %v5324_v41 }
  0x8e   :  { %8224 = vst [vmem:[#allocation88_spill] sm:$0xff] %v5326_v25  ;;  %8229 = vst [vmem:[#allocation90_spill] sm:$0xff] %v5339_v14  ;;  %v8231_v61 = vand.u32 4294901760, %v5266_v20  ;;  %v8232_v48 = vand.u32 4294901760, %v5279_v58  ;;  %v7642_v41 = vand.u32 4294901760, %v5341_v62 }
  0x8f   :  { %v2566_v39 = vsub.f32 %v5252_v45, %v8226_v24  ;;  %v5337_v37 = vsub.f32 %v5268_v19, %v8227_v59  ;;  %8230 = vst [vmem:[#allocation91_spill] sm:$0xff] %v5341_v62  ;;  %v8234_v24 = vand.u32 4294901760, %v5281_v0  ;;  %v1012_v59 = vand.u32 4294901760, %v863_v40  ;;  %3749 = vmatpush1.bf16.msra.mxu0 %v4820_v44 }
  0x90   :  { %v2578_v46 = vsub.f32 %v5266_v20, %v8231_v61  ;;  %v5349_v17 = vsub.f32 %v5279_v58, %v8232_v48  ;;  %v8236_v19 = vand.u32 4294901760, %v5289_v6  ;;  %v5365_v58 = vsub.f32 %v859_v34, %v1008_v15  ;;  %706 = vmatprep.subr.mxu0 %v4827_v47  ;;  %v5378_v47 = vld [vmem:[#allocation7 + $0x1b0] sm:$0xff] }
  0x91   :  { %8228 = vst [vmem:[#allocation89_spill] sm:$0xff] %v5337_v37  ;;  %v5354_v45 = vsub.f32 %v5281_v0, %v8234_v24  ;;  %v7641_v24 = vand.u32 4294901760, %v5339_v14  ;;  %v5370_v0 = vpack.c.bf16 %v1012_v59, %v1008_v15  ;;  %v5372_v44 = vsub.f32 %v863_v40, %v1012_v59  ;;  %8242 = vst [vmem:[#allocation99_spill] sm:$0xff] %v5378_v47 }
  0x92   :  { %8233 = vst [vmem:[#allocation92_spill] sm:$0xff] %v5349_v17  ;;  %v5361_v25 = vsub.f32 %v5289_v6, %v8236_v19  ;;  %8238 = vst [vmem:[#allocation95_spill] sm:$0xff] %v5365_v58  ;;  %v2537_v20 = vand.u32 4294901760, %v5275_v12  ;;  %v2543_v19 = vand.u32 4294901760, %v2542_v56  ;;  %v2555_v6 = vand.u32 4294901760, %v2554_v63  ;;  %v5376_v58 = vld [vmem:[#allocation7 + $0x190] sm:$0xff] }
  0x93   :  { %8235 = vst [vmem:[#allocation93_spill] sm:$0xff] %v5354_v45  ;;  %8239 = vst [vmem:[#allocation96_spill] sm:$0xff] %v5370_v0  ;;  %v2549_v9 = vand.u32 4294901760, %v2548_v16  ;;  %v2561_v61 = vand.u32 4294901760, %v2560_v42  ;;  %v2567_v38 = vand.u32 4294901760, %v2566_v39  ;;  %v2579_v48 = vand.u32 4294901760, %v2578_v46  ;;  %3775 = vmatprep.subr.bf16.mxu1 %v5370_v0  ;;  %708 = vmatpush1.msra.mxu0 %v4832_v50 }
  0x94   :  { %8237 = vst [vmem:[#allocation94_spill] sm:$0xff] %v5361_v25  ;;  %8240 = vst [vmem:[#allocation97_spill] sm:$0xff] %v5372_v44  ;;  %v7643_v34 = vand.u32 4294901760, %v5337_v37  ;;  %v7644_v40 = vand.u32 4294901760, %v5349_v17  ;;  %v8243_v16 = vand.u32 4294901760, %v5320_v26  ;;  %v5390_v42 = vld [vmem:[#allocation7 + $0x1d8] sm:$0xff]  ;;  %761 = vmatmul.mubr.f32.vlgmr.msra.gmra.mrb[0].mxu0 %v4841_v55  ;;  %4199 = vmatprep.subr.bf16.mxu0 %v5169_v60  ;;  %v5404_v46 = vsub.f32 %v5339_v14, %v7641_v24 }
  0x95   :  { %8241 = vst [vmem:[#allocation98_spill] sm:$0xff] %v5376_v58  ;;  %8245 = vst [vmem:[#allocation101_spill] sm:$0xff] %v5390_v42  ;;  %v5392_v39 = vld [vmem:[#allocation7 + $0x1f8] sm:$0xff]  ;;  %v8247_v50 = vand.u32 4294901760, %v5322_v21  ;;  %v5409_v59 = vsub.f32 %v5341_v62, %v7642_v41  ;;  %766 = vmatprep.mubr.f32.mxu0 %v8168_v53  ;;  %4201 = vmatpush1.bf16.msra.mxu0 %v5177_v36  ;;  %v4208_v55 = vpack.c.bf16 %v2537_v20, %v2525_v43  ;;  %v5421_v53 = vld [vmem:[#allocation7 + $0x1d0] sm:$0xff] }
  0x96   :  { %v5388_v56 = vsub.f32 %v5320_v26, %v8243_v16  ;;  %8246 = vst [vmem:[#allocation102_spill] sm:$0xff] %v5392_v39  ;;  %8249 = vst [vmem:[#allocation104_spill] sm:$0xff] %v5404_v46  ;;  %v4210_v60 = vpack.c.bf16 %v2555_v6, %v2543_v19  ;;  %v7645_v16 = vand.u32 4294901760, %v5376_v58  ;;  %4203 = vmatprep.subr.bf16.mxu0 %v5242_v51  ;;  %v7650_v41 = vand.u32 4294901760, %v5390_v42  ;;  %v5423_v36 = vld [vmem:[#allocation7 + $0x1f0] sm:$0xff]  ;;  %v5434_v19 = vld [vmem:[#allocation7 + $0x218] sm:$0xff] }
  0x97   :  { %v5399_v15 = vsub.f32 %v5322_v21, %v8247_v50  ;;  %8250 = vst [vmem:[#allocation105_spill] sm:$0xff] %v5409_v59  ;;  %v7646_v50 = vand.u32 4294901760, %v5378_v47  ;;  %v4212_v63 = vpack.c.bf16 %v2561_v61, %v2549_v9  ;;  %v2572_v24 = vsub.f32 %v5337_v37, %v7643_v34  ;;  %8251 = vst [vmem:[#allocation106_spill] sm:$0xff] %v5421_v53  ;;  %v5436_v34 = vld [vmem:[#allocation7 + $0x238] sm:$0xff]  ;;  %v5618_v21 = vld [vmem:[#allocation7 + $0x1e8] sm:$0xff] }
  0x98   :  { %8244 = vst [vmem:[#allocation100_spill] sm:$0xff] %v5388_v56  ;;  %8252 = vst [vmem:[#allocation107_spill] sm:$0xff] %v5423_v36  ;;  %v4214_v6 = vpack.c.bf16 %v2579_v48, %v2567_v38  ;;  %v2584_v20 = vsub.f32 %v5349_v17, %v7644_v40  ;;  %v8253_v51 = vand.u32 4294901760, %v5354_v45  ;;  %v8254_v43 = vand.u32 4294901760, %v5361_v25  ;;  %768 = vmatmul.mubr.f32.gmra.mrb[2].mxu0 %v4903_v1  ;;  %v5909_v44 = vld [vmem:[#allocation7 + $0x328] sm:$0xff] }
  0x99   :  { %8248 = vst [vmem:[#allocation103_spill] sm:$0xff] %v5399_v15  ;;  %8255 = vst [vmem:[#allocation108_spill] sm:$0xff] %v5434_v19  ;;  %4205 = vmatpush1.bf16.msra.mxu0 %v5256_v32  ;;  %v5460_v32 = vsub.f32 %v5390_v42, %v7650_v41  ;;  %v8260_v12 = vand.u32 4294901760, %v5392_v39  ;;  %v2573_v38 = vand.u32 4294901760, %v2572_v24  ;;  %v8263_v41 = vand.u32 4294901760, %v5399_v15 }
  0x9a   :  { %v2590_v9 = vsub.f32 %v5354_v45, %v8253_v51  ;;  %v2602_v61 = vsub.f32 %v5361_v25, %v8254_v43  ;;  %8256 = vst [vmem:[#allocation109_spill] sm:$0xff] %v5436_v34  ;;  %v5447_v51 = vsub.f32 %v5376_v58, %v7645_v16  ;;  %v5452_v43 = vsub.f32 %v5378_v47, %v7646_v50  ;;  %v5835_v25 = vld [vmem:[#allocation7 + $0x2e8] sm:$0xff] }
  0x9b   :  { %4207 = vmatprep.subr.bf16.mxu0 %v5286_v23  ;;  %8259 = vst [vmem:[#allocation112_spill] sm:$0xff] %v5460_v32  ;;  %v5465_v16 = vsub.f32 %v5392_v39, %v8260_v12  ;;  %v2585_v1 = vand.u32 4294901760, %v2584_v20  ;;  %v8262_v23 = vand.u32 4294901760, %v5388_v56  ;;  %v2608_v42 = vsub.f32 %v5399_v15, %v8263_v41 }
  0x9c   :  { %8257 = vst [vmem:[#allocation110_spill] sm:$0xff] %v5447_v51  ;;  %8258 = vst [vmem:[#allocation111_spill] sm:$0xff] %v5452_v43  ;;  %v2591_v0 = vand.u32 4294901760, %v2590_v9  ;;  %v2603_v48 = vand.u32 4294901760, %v2602_v61  ;;  %v8264_v58 = vand.u32 4294901760, %v5404_v46  ;;  %v8265_v40 = vand.u32 4294901760, %v5409_v59 }
  0x9d   :  { %8261 = vst [vmem:[#allocation113_spill] sm:$0xff] %v5465_v16  ;;  %v2596_v47 = vsub.f32 %v5388_v56, %v8262_v23  ;;  %4209 = vmatpush1.bf16.msra.mxu0 %v4208_v55  ;;  %v8266_v9 = vand.u32 4294901760, %v5421_v53  ;;  %v8268_v41 = vand.u32 4294901760, %v5423_v36  ;;  %v8270_v55 = vand.u32 4294901760, %v5434_v19 }
  0x9e   :  { %v2614_v12 = vsub.f32 %v5404_v46, %v8264_v58  ;;  %v2626_v50 = vsub.f32 %v5409_v59, %v8265_v40  ;;  %4211 = vmatprep.subr.bf16.mxu0 %v4210_v60  ;;  %v8272_v20 = vand.u32 4294901760, %v5436_v34  ;;  %v4218_v39 = vpack.c.bf16 %v2603_v48, %v2591_v0  ;;  %v5758_v59 = vld [vmem:[#allocation7 + $0x288] sm:$0xff] }
  0x9f   :  { %v5486_v61 = vsub.f32 %v5421_v53, %v8266_v9  ;;  %v5491_v23 = vsub.f32 %v5423_v36, %v8268_v41  ;;  %v5498_v24 = vsub.f32 %v5434_v19, %v8270_v55  ;;  %v4216_v53 = vpack.c.bf16 %v2585_v1, %v2573_v38 }
  0xa0   :  { %v5503_v9 = vsub.f32 %v5436_v34, %v8272_v20  ;;  %v2597_v62 = vand.u32 4294901760, %v2596_v47  ;;  %v2609_v41 = vand.u32 4294901760, %v2608_v42  ;;  %v2615_v36 = vand.u32 4294901760, %v2614_v12 }
  0xa1   :  { %8267 = vst [vmem:[#allocation114_spill] sm:$0xff] %v5486_v61  ;;  %8269 = vst [vmem:[#allocation115_spill] sm:$0xff] %v5491_v23  ;;  %v2627_v60 = vand.u32 4294901760, %v2626_v50  ;;  %4213 = vmatpush1.bf16.msra.mxu0 %v4212_v63  ;;  %v8274_v58 = vand.u32 4294901760, %v5447_v51  ;;  %v8275_v14 = vand.u32 4294901760, %v5452_v43  ;;  %v7659_v19 = vand.u32 4294901760, %v5486_v61 }
  0xa2   :  { %8271 = vst [vmem:[#allocation116_spill] sm:$0xff] %v5498_v24  ;;  %8273 = vst [vmem:[#allocation117_spill] sm:$0xff] %v5503_v9  ;;  %v7661_v20 = vand.u32 4294901760, %v5491_v23  ;;  %4215 = vmatprep.subr.bf16.mxu0 %v4214_v6  ;;  %v8276_v0 = vand.u32 4294901760, %v5460_v32  ;;  %v8277_v42 = vand.u32 4294901760, %v5465_v16  ;;  %v7660_v50 = vand.u32 4294901760, %v5498_v24 }
  0xa3   :  { %v2620_v40 = vsub.f32 %v5447_v51, %v8274_v58  ;;  %v2632_v55 = vsub.f32 %v5452_v43, %v8275_v14  ;;  %v4220_v48 = vpack.c.bf16 %v2609_v41, %v2597_v62  ;;  %v4222_v1 = vpack.c.bf16 %v2627_v60, %v2615_v36 }
  0xa4   :  { %v2638_v47 = vsub.f32 %v5460_v32, %v8276_v0  ;;  %v2650_v63 = vsub.f32 %v5465_v16, %v8277_v42  ;;  %v2644_v6 = vsub.f32 %v5486_v61, %v7659_v19  ;;  %v2656_v58 = vsub.f32 %v5491_v23, %v7661_v20 }
  0xa5   :  { %4217 = vmatpush1.bf16.msra.mxu0 %v4216_v53  ;;  %v2621_v14 = vand.u32 4294901760, %v2620_v40  ;;  %v2633_v12 = vand.u32 4294901760, %v2632_v55  ;;  %v2662_v38 = vsub.f32 %v5498_v24, %v7660_v50  ;;  %v8278_v62 = vand.u32 4294901760, %v5503_v9  ;;  %v5535_v50 = vld [vmem:[#allocation7 + $0x230] sm:$0xff]  ;;  %v5676_v24 = vld [vmem:[#allocation7 + $0x220] sm:$0xff] }
  0xa6   :  { %4219 = vmatprep.subr.bf16.mxu0 %v4218_v39  ;;  %v2639_v0 = vand.u32 4294901760, %v2638_v47  ;;  %v2651_v42 = vand.u32 4294901760, %v2650_v63  ;;  %v2645_v40 = vand.u32 4294901760, %v2644_v6  ;;  %v2657_v41 = vand.u32 4294901760, %v2656_v58  ;;  %v5533_v63 = vld [vmem:[#allocation7 + $0x210] sm:$0xff]  ;;  %8280 = vst [vmem:[#allocation119_spill] sm:$0xff] %v5535_v50 }
  0xa7   :  { %v2674_v53 = vsub.f32 %v5503_v9, %v8278_v62  ;;  %v4224_v36 = vpack.c.bf16 %v2633_v12, %v2621_v14  ;;  %v2663_v55 = vand.u32 4294901760, %v2662_v38  ;;  %8279 = vst [vmem:[#allocation118_spill] sm:$0xff] %v5533_v63  ;;  %v7667_v62 = vand.u32 4294901760, %v5533_v63  ;;  %v5551_v14 = vld [vmem:[#allocation7 + $0x278] sm:$0xff]  ;;  %v5555_v58 = vld [vmem:[#allocation7 + $0x250] sm:$0xff]  ;;  %v5658_v9 = vld [vmem:[#allocation7 + $0x208] sm:$0xff] }
  0xa8   :  { %v4226_v60 = vpack.c.bf16 %v2651_v42, %v2639_v0  ;;  %v4228_v39 = vpack.c.bf16 %v2657_v41, %v2645_v40  ;;  %8284 = vst [vmem:[#allocation123_spill] sm:$0xff] %v5551_v14  ;;  %v7662_v6 = vand.u32 4294901760, %v5551_v14  ;;  %8285 = vst [vmem:[#allocation124_spill] sm:$0xff] %v5555_v58  ;;  %v5557_v0 = vld [vmem:[#allocation7 + $0x270] sm:$0xff] }
  0xa9   :  { %4221 = vmatpush1.bf16.msra.mxu0 %v4220_v48  ;;  %v2675_v19 = vand.u32 4294901760, %v2674_v53  ;;  %v7664_v48 = vand.u32 4294901760, %v5535_v50  ;;  %8286 = vst [vmem:[#allocation125_spill] sm:$0xff] %v5557_v0  ;;  %v7671_v40 = vand.u32 4294901760, %v5557_v0 }
  0xaa   :  { %4223 = vmatprep.subr.bf16.mxu0 %v4222_v1  ;;  %v5542_v1 = vsub.f32 %v5533_v63, %v7667_v62  ;;  %v5597_v62 = vld [vmem:[#allocation7 + $0x2b8] sm:$0xff]  ;;  %v5626_v63 = vld [vmem:[#allocation7 + $0x290] sm:$0xff] }
  0xab   :  { %v4230_v47 = vpack.c.bf16 %v2675_v19, %v2663_v55  ;;  %v5547_v38 = vsub.f32 %v5535_v50, %v7664_v48  ;;  %v5549_v19 = vld [vmem:[#allocation7 + $0x258] sm:$0xff]  ;;  %v5587_v20 = vsub.f32 %v5557_v0, %v7671_v40  ;;  %v5593_v48 = vld [vmem:[#allocation7 + $0x1a0] sm:$0xff]  ;;  %8292 = vst [vmem:[#allocation131_spill] sm:$0xff] %v5597_v62  ;;  %8296 = vst [vmem:[#allocation134_spill] sm:$0xff] %v5626_v63 }
  0xac   :  { %8281 = vst [vmem:[#allocation120_spill] sm:$0xff] %v5542_v1  ;;  %8283 = vst [vmem:[#allocation122_spill] sm:$0xff] %v5549_v19  ;;  %v7663_v12 = vand.u32 4294901760, %v5549_v19  ;;  %v7665_v42 = vand.u32 4294901760, %v5542_v1 }
  0xad   :  { %4225 = vmatpush1.bf16.msra.mxu0 %v4224_v36  ;;  %8282 = vst [vmem:[#allocation121_spill] sm:$0xff] %v5547_v38  ;;  %v7666_v53 = vand.u32 4294901760, %v5547_v38  ;;  %v7668_v36 = vand.u32 4294901760, %v5555_v58  ;;  %8290 = vst [vmem:[#allocation129_spill] sm:$0xff] %v5587_v20 }
  0xae   :  { %4227 = vmatprep.subr.bf16.mxu0 %v4226_v60  ;;  %v5566_v41 = vsub.f32 %v5549_v19, %v7663_v12  ;;  %v5571_v60 = vsub.f32 %v5551_v14, %v7662_v6  ;;  %v2668_v55 = vsub.f32 %v5542_v1, %v7665_v42  ;;  %v5589_v6 = vld [vmem:[#allocation7 + $0x298] sm:$0xff]  ;;  %v5591_v12 = vld [vmem:[#allocation7 + $0x180] sm:$0xff]  ;;  %v7683_v14 = vand.u32 4294901760, %v5593_v48 }
  0xaf   :  { %8291 = vst [vmem:[#allocation130_spill] sm:$0xff] %v5589_v6  ;;  %v8294_v26 = vand.u32 4294901760, %v5589_v6 }
  0xb0   :  { %8287 = vst [vmem:[#allocation126_spill] sm:$0xff] %v5566_v41  ;;  %8288 = vst [vmem:[#allocation127_spill] sm:$0xff] %v5571_v60  ;;  %v7678_v42 = vand.u32 4294901760, %v5566_v41  ;;  %v2669_v40 = vand.u32 4294901760, %v2668_v55 }
  0xb1   :  { %4229 = vmatpush1.bf16.msra.mxu0 %v4228_v39  ;;  %v2680_v39 = vsub.f32 %v5547_v38, %v7666_v53  ;;  %v7680_v53 = vand.u32 4294901760, %v5571_v60  ;;  %v8299_v38 = vand.u32 4294901760, %v5587_v20 }
  0xb2   :  { %4231 = vmatprep.subr.bf16.mxu0 %v4230_v47  ;;  %v5582_v47 = vsub.f32 %v5555_v58, %v7668_v36  ;;  %v7684_v58 = vand.u32 4294901760, %v5591_v12  ;;  %v2686_v19 = vsub.f32 %v5566_v41, %v7678_v42  ;;  %v5650_v42 = vld [vmem:[#allocation7 + $0x2b0] sm:$0xff] }
  0xb3   :  { %v2681_v0 = vand.u32 4294901760, %v2680_v39  ;;  %v2698_v50 = vsub.f32 %v5571_v60, %v7680_v53  ;;  %v5616_v39 = vld [vmem:[#allocation7 + $0x1c8] sm:$0xff]  ;;  %v5624_v53 = vsub.f32 %v5589_v6, %v8294_v26  ;;  %v7698_v60 = vand.u32 4294901760, %v5618_v21  ;;  %8300 = vst [vmem:[#allocation136_spill] sm:$0xff] %v5650_v42 }
  0xb4   :  { %8289 = vst [vmem:[#allocation128_spill] sm:$0xff] %v5582_v47  ;;  %v5614_v36 = vpack.c.bf16 %v7683_v14, %v7684_v58  ;;  %v7699_v34 = vand.u32 4294901760, %v5616_v39  ;;  %v2687_v14 = vand.u32 4294901760, %v2686_v19  ;;  %v8297_v6 = vand.u32 4294901760, %v5582_v47 }
  0xb5   :  { %v4232_v55 = vpack.c.bf16 %v2681_v0, %v2669_v40  ;;  %8295 = vst [vmem:[#allocation133_spill] sm:$0xff] %v5624_v53  ;;  %v2699_v58 = vand.u32 4294901760, %v2698_v50  ;;  %v5630_v0 = vld [vmem:[#allocation7 + $0x1c0] sm:$0xff]  ;;  %v8318_v61 = vand.u32 4294901760, %v5650_v42  ;;  %v8379_v3 = vand.u32 4294901760, %v5616_v39 }
  0xb6   :  { %8293 = vst [vmem:[#allocation132_spill] sm:$0xff] %v5614_v36  ;;  %v5632_v40 = vld [vmem:[#allocation7 + $0x1e0] sm:$0xff]  ;;  %3777 = vmatpush1.bf16.msra.mxu1 %v5614_v36  ;;  %v2692_v41 = vsub.f32 %v5582_v47, %v8297_v6  ;;  %v5644_v50 = vpack.c.bf16 %v7698_v60, %v7699_v34  ;;  %v2704_v36 = vsub.f32 %v5587_v20, %v8299_v38  ;;  %v8301_v26 = vand.u32 4294901760, %v5630_v0  ;;  %v5660_v60 = vld [vmem:[#allocation7 + $0x228] sm:$0xff] }
  0xb7   :  { %4233 = vmatpush1.bf16.msra.mxu0 %v4232_v55  ;;  %v4234_v19 = vpack.c.bf16 %v2699_v58, %v2687_v14  ;;  %v8302_v1 = vand.u32 4294901760, %v5632_v40  ;;  %v8304_v14 = vand.u32 4294901760, %v5597_v62  ;;  %v5674_v20 = vld [vmem:[#allocation7 + $0x200] sm:$0xff]  ;;  %v5685_v55 = vld [vmem:[#allocation7 + $0x2f8] sm:$0xff]  ;;  %v5956_v18 = vsub.f32 %v5616_v39, %v8379_v3 }
  0xb8   :  { %8298 = vst [vmem:[#allocation135_spill] sm:$0xff] %v5644_v50  ;;  %v2693_v47 = vand.u32 4294901760, %v2692_v41  ;;  %3779 = vmatprep.subr.bf16.mxu1 %v5644_v50  ;;  %v2705_v34 = vand.u32 4294901760, %v2704_v36  ;;  %v8306_v41 = vand.u32 4294901760, %v5624_v53  ;;  %8308 = vst [vmem:[#allocation140_spill] sm:$0xff] %v5685_v55 }
  0xb9   :  { %v5656_v6 = vpack.c.bf16 %v8302_v1, %v8301_v26  ;;  %v5665_v58 = vsub.f32 %v5597_v62, %v8304_v14  ;;  %4235 = vmatprep.subr.bf16.mxu0 %v4234_v19  ;;  %v5678_v14 = vld [vmem:[#allocation7 + $0x2d8] sm:$0xff]  ;;  %v8310_v62 = vand.u32 4294901760, %v5660_v60  ;;  %v8315_v1 = vand.u32 4294901760, %v5674_v20  ;;  %8380 = vst [vmem:[#allocation177_spill] sm:$0xff] %v5956_v18 }
  0xba   :  { %v2710_v26 = vsub.f32 %v5624_v53, %v8306_v41  ;;  %8307 = vst [vmem:[#allocation139_spill] sm:$0xff] %v5678_v14  ;;  %v4236_v50 = vpack.c.bf16 %v2705_v34, %v2693_v47  ;;  %v8309_v41 = vand.u32 4294901760, %v5658_v9  ;;  %v8316_v34 = vand.u32 4294901760, %v5676_v24 }
  0xbb   :  { %8303 = vst [vmem:[#allocation137_spill] sm:$0xff] %v5656_v6  ;;  %8305 = vst [vmem:[#allocation138_spill] sm:$0xff] %v5665_v58  ;;  %3781 = vmatpush1.bf16.msra.mxu1 %v5656_v6  ;;  %v8312_v6 = vand.u32 4294901760, %v5626_v63  ;;  %v8314_v36 = vand.u32 4294901760, %v5665_v58 }
  0xbc   :  { %v5691_v53 = vpack.c.bf16 %v8310_v62, %v8309_v41  ;;  %v2711_v23 = vand.u32 4294901760, %v2710_v26  ;;  %v5705_v47 = vpack.c.bf16 %v8316_v34, %v8315_v1  ;;  %v5710_v62 = vsub.f32 %v5650_v42, %v8318_v61  ;;  %v5712_v26 = vld [vmem:[#allocation7 + $0x248] sm:$0xff]  ;;  %4237 = vmatpush1.bf16.msra.mxu0 %v4236_v50  ;;  %v5724_v42 = vld [vmem:[#allocation7 + $0x240] sm:$0xff] }
  0xbd   :  { %v5696_v38 = vsub.f32 %v5626_v63, %v8312_v6  ;;  %v2722_v19 = vsub.f32 %v5665_v58, %v8314_v36  ;;  %v5714_v41 = vld [vmem:[#allocation7 + $0x268] sm:$0xff]  ;;  %v5717_v63 = vld [vmem:[#allocation7 + $0x2d0] sm:$0xff]  ;;  %v5726_v58 = vld [vmem:[#allocation7 + $0x260] sm:$0xff]  ;;  %v8321_v50 = vand.u32 4294901760, %v5678_v14  ;;  %v8325_v32 = vand.u32 4294901760, %v5712_v26 }
  0xbe   :  { %8311 = vst [vmem:[#allocation141_spill] sm:$0xff] %v5691_v53  ;;  %8317 = vst [vmem:[#allocation143_spill] sm:$0xff] %v5705_v47  ;;  %3783 = vmatprep.subr.bf16.mxu1 %v5691_v53  ;;  %v5736_v36 = vld [vmem:[#allocation7 + $0x2f0] sm:$0xff]  ;;  %v8328_v6 = vand.u32 4294901760, %v5685_v55 }
  0xbf   :  { %8313 = vst [vmem:[#allocation142_spill] sm:$0xff] %v5696_v38  ;;  %8319 = vst [vmem:[#allocation144_spill] sm:$0xff] %v5710_v62  ;;  %v2723_v16 = vand.u32 4294901760, %v2722_v19  ;;  %3785 = vmatpush1.bf16.msra.mxu1 %v5705_v47  ;;  %v5733_v53 = vsub.f32 %v5678_v14, %v8321_v50  ;;  %v8324_v61 = vand.u32 4294901760, %v5696_v38  ;;  %v8326_v19 = vand.u32 4294901760, %v5714_v41 }
  0xc0   :  { %8320 = vst [vmem:[#allocation145_spill] sm:$0xff] %v5717_v63  ;;  %8323 = vst [vmem:[#allocation147_spill] sm:$0xff] %v5736_v36  ;;  %v5750_v43 = vsub.f32 %v5685_v55, %v8328_v6  ;;  %v7743_v50 = vand.u32 4294901760, %v5726_v58  ;;  %v8330_v14 = vand.u32 4294901760, %v5710_v62 }
  0xc1   :  { %8322 = vst [vmem:[#allocation146_spill] sm:$0xff] %v5733_v53  ;;  %v2716_v34 = vsub.f32 %v5696_v38, %v8324_v61  ;;  %v5745_v47 = vpack.c.bf16 %v8326_v19, %v8325_v32  ;;  %v4238_v1 = vpack.c.bf16 %v2723_v16, %v2711_v23  ;;  %v5760_v32 = vld [vmem:[#allocation7 + $0x2a8] sm:$0xff]  ;;  %v5762_v19 = vld [vmem:[#allocation7 + $0x318] sm:$0xff]  ;;  %v8332_v16 = vand.u32 4294901760, %v5724_v42 }
  0xc2   :  { %8329 = vst [vmem:[#allocation149_spill] sm:$0xff] %v5750_v43  ;;  %v2728_v51 = vsub.f32 %v5710_v62, %v8330_v14  ;;  %8331 = vst [vmem:[#allocation150_spill] sm:$0xff] %v5762_v19  ;;  %v7753_v14 = vand.u32 4294901760, %v5736_v36  ;;  %v5773_v38 = vld [vmem:[#allocation7 + $0x338] sm:$0xff]  ;;  %v8335_v55 = vand.u32 4294901760, %v5733_v53  ;;  %v8343_v56 = vand.u32 4294901760, %v5762_v19 }
  0xc3   :  { %8327 = vst [vmem:[#allocation148_spill] sm:$0xff] %v5745_v47  ;;  %v2717_v46 = vand.u32 4294901760, %v2716_v34  ;;  %3787 = vmatprep.subr.bf16.mxu1 %v5745_v47  ;;  %v5770_v23 = vpack.c.bf16 %v7743_v50, %v8332_v16  ;;  %8334 = vst [vmem:[#allocation152_spill] sm:$0xff] %v5773_v38  ;;  %4239 = vmatprep.subr.bf16.mxu0 %v4238_v1  ;;  %v8336_v47 = vand.u32 4294901760, %v5717_v63  ;;  %v8338_v16 = vand.u32 4294901760, %v5750_v43 }
  0xc4   :  { %v2729_v61 = vand.u32 4294901760, %v2728_v51  ;;  %v2734_v34 = vsub.f32 %v5733_v53, %v8335_v55  ;;  %v5791_v51 = vsub.f32 %v5736_v36, %v7753_v14  ;;  %v7757_v55 = vand.u32 4294901760, %v5760_v32  ;;  %v5795_v53 = vld [vmem:[#allocation7 + $0x280] sm:$0xff]  ;;  %v5827_v14 = vld [vmem:[#allocation7 + $0x2c8] sm:$0xff] }
  0xc5   :  { %8333 = vst [vmem:[#allocation151_spill] sm:$0xff] %v5770_v23  ;;  %v5781_v6 = vsub.f32 %v5717_v63, %v8336_v47  ;;  %v2746_v50 = vsub.f32 %v5750_v43, %v8338_v16  ;;  %3789 = vmatpush1.bf16.msra.mxu1 %v5770_v23  ;;  %v5797_v47 = vld [vmem:[#allocation7 + $0x2a0] sm:$0xff]  ;;  %v7764_v16 = vand.u32 4294901760, %v5773_v38  ;;  %v5801_v23 = vld [vmem:[#allocation7 + $0x310] sm:$0xff]  ;;  %v8341_v36 = vand.u32 4294901760, %v5758_v59 }
  0xc6   :  { %8339 = vst [vmem:[#allocation154_spill] sm:$0xff] %v5791_v51  ;;  %v4240_v62 = vpack.c.bf16 %v2729_v61, %v2717_v46  ;;  %v2735_v63 = vand.u32 4294901760, %v2734_v34  ;;  %8340 = vst [vmem:[#allocation155_spill] sm:$0xff] %v5801_v23  ;;  %v5813_v46 = vsub.f32 %v5762_v19, %v8343_v56  ;;  %v5815_v61 = vld [vmem:[#allocation7 + $0x330] sm:$0xff]  ;;  %v8347_v19 = vand.u32 4294901760, %v5791_v51 }
  0xc7   :  { %8337 = vst [vmem:[#allocation153_spill] sm:$0xff] %v5781_v6  ;;  %v7759_v15 = vand.u32 4294901760, %v5781_v6  ;;  %v2747_v43 = vand.u32 4294901760, %v2746_v50  ;;  %v5808_v1 = vpack.c.bf16 %v7757_v55, %v8341_v36  ;;  %8345 = vst [vmem:[#allocation158_spill] sm:$0xff] %v5815_v61  ;;  %v5823_v34 = vsub.f32 %v5773_v38, %v7764_v16  ;;  %v5837_v16 = vld [vmem:[#allocation7 + $0x358] sm:$0xff] }
  0xc8   :  { %8344 = vst [vmem:[#allocation157_spill] sm:$0xff] %v5813_v46  ;;  %4241 = vmatpush1.bf16.msra.mxu0 %v4240_v62  ;;  %v2752_v62 = vsub.f32 %v5791_v51, %v8347_v19  ;;  %8348 = vst [vmem:[#allocation160_spill] sm:$0xff] %v5837_v16  ;;  %v8349_v38 = vand.u32 4294901760, %v5795_v53  ;;  %v7781_v19 = vand.u32 4294901760, %v5815_v61  ;;  %v8361_v37 = vand.u32 4294901760, %v5837_v16 }
  0xc9   :  { %8342 = vst [vmem:[#allocation156_spill] sm:$0xff] %v5808_v1  ;;  %v2740_v50 = vsub.f32 %v5781_v6, %v7759_v15  ;;  %8346 = vst [vmem:[#allocation159_spill] sm:$0xff] %v5823_v34  ;;  %v4242_v56 = vpack.c.bf16 %v2747_v43, %v2735_v63  ;;  %3791 = vmatprep.subr.bf16.mxu1 %v5808_v1  ;;  %v8350_v43 = vand.u32 4294901760, %v5797_v47  ;;  %v5847_v1 = vld [vmem:[#allocation7 + $0x378] sm:$0xff]  ;;  %v8353_v6 = vand.u32 4294901760, %v5813_v46 }
  0xca   :  { %8352 = vst [vmem:[#allocation162_spill] sm:$0xff] %v5847_v1  ;;  %v2753_v15 = vand.u32 4294901760, %v2752_v62 }
  0xcb   :  { %v2741_v36 = vand.u32 4294901760, %v2740_v50  ;;  %v5844_v63 = vpack.c.bf16 %v8350_v43, %v8349_v38  ;;  %4243 = vmatprep.subr.bf16.mxu0 %v4242_v56  ;;  %v2758_v51 = vsub.f32 %v5813_v46, %v8353_v6  ;;  %v8354_v50 = vand.u32 4294901760, %v5801_v23  ;;  %v5869_v46 = vld [vmem:[#allocation7 + $0x2c0] sm:$0xff] }
  0xcc   :  { %v8356_v38 = vand.u32 4294901760, %v5823_v34  ;;  %v5865_v56 = vsub.f32 %v5815_v61, %v7781_v19  ;;  %v7785_v6 = vand.u32 4294901760, %v5835_v25  ;;  %v8359_v61 = vand.u32 4294901760, %v5827_v14  ;;  %v5901_v19 = vld [vmem:[#allocation7 + $0x308] sm:$0xff] }
  0xcd   :  { %8351 = vst [vmem:[#allocation161_spill] sm:$0xff] %v5844_v63  ;;  %v5855_v55 = vsub.f32 %v5801_v23, %v8354_v50  ;;  %3793 = vmatpush1.bf16.msra.mxu1 %v5844_v63  ;;  %v5871_v50 = vld [vmem:[#allocation7 + $0x2e0] sm:$0xff]  ;;  %v4244_v45 = vpack.c.bf16 %v2753_v15, %v2741_v36  ;;  %v2759_v23 = vand.u32 4294901760, %v2758_v51  ;;  %v5875_v63 = vld [vmem:[#allocation7 + $0x350] sm:$0xff]  ;;  %v5887_v15 = vsub.f32 %v5837_v16, %v8361_v37 }
  0xce   :  { %v2770_v43 = vsub.f32 %v5823_v34, %v8356_v38  ;;  %8357 = vst [vmem:[#allocation164_spill] sm:$0xff] %v5865_v56  ;;  %v7791_v38 = vand.u32 4294901760, %v5847_v1  ;;  %8358 = vst [vmem:[#allocation165_spill] sm:$0xff] %v5875_v63  ;;  %v5882_v62 = vpack.c.bf16 %v7785_v6, %v8359_v61  ;;  %v5889_v51 = vld [vmem:[#allocation7 + $0x370] sm:$0xff]  ;;  %v8365_v16 = vand.u32 4294901760, %v5865_v56 }
  0xcf   :  { %8355 = vst [vmem:[#allocation163_spill] sm:$0xff] %v5855_v55  ;;  %v7787_v17 = vand.u32 4294901760, %v5855_v55  ;;  %8362 = vst [vmem:[#allocation167_spill] sm:$0xff] %v5887_v15  ;;  %4245 = vmatpush1.bf16.msra.mxu0 %v4244_v45  ;;  %v1056_v6 = vand.u32 4294901760, %v5901_v19 }
  0xd0   :  { %v2771_v34 = vand.u32 4294901760, %v2770_v43  ;;  %8360 = vst [vmem:[#allocation166_spill] sm:$0xff] %v5882_v62  ;;  %8363 = vst [vmem:[#allocation168_spill] sm:$0xff] %v5889_v51  ;;  %v5897_v43 = vsub.f32 %v5847_v1, %v7791_v38  ;;  %v2776_v45 = vsub.f32 %v5865_v56, %v8365_v16  ;;  %3795 = vmatprep.subr.bf16.mxu1 %v5882_v62  ;;  %v5911_v38 = vld [vmem:[#allocation7 + $0x398] sm:$0xff]  ;;  %v8367_v1 = vand.u32 4294901760, %v5869_v46 }
  0xd1   :  { %v2764_v36 = vsub.f32 %v5855_v55, %v7787_v17  ;;  %v7798_v17 = vand.u32 4294901760, %v5887_v15  ;;  %8366 = vst [vmem:[#allocation170_spill] sm:$0xff] %v5911_v38  ;;  %v7806_v16 = vand.u32 4294901760, %v5889_v51  ;;  %v8370_v56 = vand.u32 4294901760, %v5875_v63 }
  0xd2   :  { %8364 = vst [vmem:[#allocation169_spill] sm:$0xff] %v5897_v43  ;;  %v4246_v37 = vpack.c.bf16 %v2771_v34, %v2759_v23  ;;  %v8368_v23 = vand.u32 4294901760, %v5871_v50  ;;  %v2777_v62 = vand.u32 4294901760, %v2776_v45  ;;  %v8372_v33 = vand.u32 4294901760, %v5897_v43 }
  0xd3   :  { %v2765_v61 = vand.u32 4294901760, %v2764_v36  ;;  %v2782_v55 = vsub.f32 %v5887_v15, %v7798_v17  ;;  %v5927_v36 = vsub.f32 %v5875_v63, %v8370_v56  ;;  %v1060_v45 = vand.u32 4294901760, %v5909_v44 }
  0xd4   :  { %v5918_v34 = vpack.c.bf16 %v8368_v23, %v8367_v1  ;;  %4247 = vmatprep.subr.bf16.mxu0 %v4246_v37  ;;  %v2794_v1 = vsub.f32 %v5897_v43, %v8372_v33  ;;  %v5937_v37 = vsub.f32 %v5889_v51, %v7806_v16  ;;  %v5940_v23 = vld [vmem:[#allocation7 + $0x3b8] sm:$0xff]  ;;  %v8375_v17 = vand.u32 4294901760, %v5591_v12  ;;  %v906_v16 = vld [vmem:[#allocation7 + $0x300] sm:$0xff] }
  0xd5   :  { %8371 = vst [vmem:[#allocation172_spill] sm:$0xff] %v5927_v36  ;;  %8374 = vst [vmem:[#allocation174_spill] sm:$0xff] %v5940_v23  ;;  %v8377_v33 = vand.u32 4294901760, %v5593_v48  ;;  %v4248_v43 = vpack.c.bf16 %v2777_v62, %v2765_v61  ;;  %v2783_v15 = vand.u32 4294901760, %v2782_v55  ;;  %v910_v51 = vld [vmem:[#allocation7 + $0x320] sm:$0xff]  ;;  %v8381_v56 = vand.u32 4294901760, %v5618_v21 }
  0xd6   :  { %8369 = vst [vmem:[#allocation171_spill] sm:$0xff] %v5918_v34  ;;  %3797 = vmatpush1.bf16.msra.mxu1 %v5918_v34  ;;  %8373 = vst [vmem:[#allocation173_spill] sm:$0xff] %v5937_v37  ;;  %v5946_v63 = vsub.f32 %v5591_v12, %v8375_v17  ;;  %v2795_v17 = vand.u32 4294901760, %v2794_v1  ;;  %v7811_v12 = vand.u32 4294901760, %v5927_v36  ;;  %v5965_v62 = vpack.c.bf16 %v1060_v45, %v1056_v6 }
  0xd7   :  { %v5951_v34 = vsub.f32 %v5593_v48, %v8377_v33  ;;  %v5961_v54 = vsub.f32 %v5618_v21, %v8381_v56  ;;  %4249 = vmatpush1.bf16.msra.mxu0 %v4248_v43  ;;  %v8384_v61 = vand.u32 4294901760, %v5911_v38  ;;  %v1058_v1 = vand.u32 4294901760, %v906_v16 }
  0xd8   :  { %8376 = vst [vmem:[#allocation175_spill] sm:$0xff] %v5946_v63  ;;  %8383 = vst [vmem:[#allocation179_spill] sm:$0xff] %v5965_v62  ;;  %v4250_v39 = vpack.c.bf16 %v2795_v17, %v2783_v15  ;;  %v2788_v21 = vsub.f32 %v5927_v36, %v7811_v12  ;;  %v1062_v56 = vand.u32 4294901760, %v910_v51  ;;  %v8386_v43 = vand.u32 4294901760, %v5630_v0  ;;  %3799 = vmatprep.subr.bf16.mxu1 %v5965_v62 }
  0xd9   :  { %8378 = vst [vmem:[#allocation176_spill] sm:$0xff] %v5951_v34  ;;  %8382 = vst [vmem:[#allocation178_spill] sm:$0xff] %v5961_v54  ;;  %v5971_v3 = vsub.f32 %v5911_v38, %v8384_v61  ;;  %v8388_v48 = vand.u32 4294901760, %v5632_v40  ;;  %v8390_v61 = vand.u32 4294901760, %v5937_v37  ;;  %v8391_v12 = vand.u32 4294901760, %v5658_v9 }
  0xda   :  { %v5979_v33 = vsub.f32 %v5630_v0, %v8386_v43  ;;  %v8392_v0 = vand.u32 4294901760, %v5660_v60  ;;  %4251 = vmatprep.subr.bf16.mxu0 %v4250_v39  ;;  %v8397_v17 = vand.u32 4294901760, %v5712_v26  ;;  %v8405_v39 = vand.u32 4294901760, %v5758_v59 }
  0xdb   :  { %8385 = vst [vmem:[#allocation180_spill] sm:$0xff] %v5971_v3  ;;  %v5984_v55 = vsub.f32 %v5632_v40, %v8388_v48  ;;  %v2800_v15 = vsub.f32 %v5937_v37, %v8390_v61  ;;  %v5994_v38 = vsub.f32 %v5658_v9, %v8391_v12  ;;  %v8393_v40 = vand.u32 4294901760, %v5674_v20 }
  0xdc   :  { %8387 = vst [vmem:[#allocation181_spill] sm:$0xff] %v5979_v33  ;;  %v5999_v43 = vsub.f32 %v5660_v60, %v8392_v0  ;;  %v8395_v61 = vand.u32 4294901760, %v5676_v24  ;;  %v6014_v9 = vsub.f32 %v5712_v26, %v8397_v17  ;;  %v8399_v12 = vand.u32 4294901760, %v5714_v41 }
  0xdd   :  { %8389 = vst [vmem:[#allocation182_spill] sm:$0xff] %v5984_v55  ;;  %v6004_v48 = vsub.f32 %v5674_v20, %v8393_v40  ;;  %v8401_v0 = vand.u32 4294901760, %v5724_v42  ;;  %v8403_v40 = vand.u32 4294901760, %v5726_v58  ;;  %v6034_v26 = vsub.f32 %v5758_v59, %v8405_v39 }
  0xde   :  { %v6009_v62 = vsub.f32 %v5676_v24, %v8395_v61  ;;  %8398 = vst [vmem:[#allocation185_spill] sm:$0xff] %v6014_v9  ;;  %v6019_v60 = vsub.f32 %v5714_v41, %v8399_v12  ;;  %v8407_v17 = vand.u32 4294901760, %v5760_v32  ;;  %v8409_v61 = vand.u32 4294901760, %v5795_v53 }
  0xdf   :  { %8394 = vst [vmem:[#allocation183_spill] sm:$0xff] %v6004_v48  ;;  %v6024_v20 = vsub.f32 %v5724_v42, %v8401_v0  ;;  %v6029_v24 = vsub.f32 %v5726_v58, %v8403_v40  ;;  %8406 = vst [vmem:[#allocation189_spill] sm:$0xff] %v6034_v26  ;;  %v8411_v12 = vand.u32 4294901760, %v5797_v47  ;;  %v8413_v0 = vand.u32 4294901760, %v5827_v14 }
  0xe0   :  { %8396 = vst [vmem:[#allocation184_spill] sm:$0xff] %v6009_v62  ;;  %8400 = vst [vmem:[#allocation186_spill] sm:$0xff] %v6019_v60  ;;  %v6039_v41 = vsub.f32 %v5760_v32, %v8407_v17  ;;  %v6044_v42 = vsub.f32 %v5795_v53, %v8409_v61  ;;  %v8415_v40 = vand.u32 4294901760, %v5835_v25  ;;  %v8417_v39 = vand.u32 4294901760, %v5869_v46  ;;  %v6071_v61 = vld [vmem:[#allocation7 + $0x390] sm:$0xff] }
  0xe1   :  { %8402 = vst [vmem:[#allocation187_spill] sm:$0xff] %v6024_v20  ;;  %8404 = vst [vmem:[#allocation188_spill] sm:$0xff] %v6029_v24  ;;  %v6049_v58 = vsub.f32 %v5797_v47, %v8411_v12  ;;  %v6054_v59 = vsub.f32 %v5827_v14, %v8413_v0  ;;  %v8419_v17 = vand.u32 4294901760, %v5871_v50  ;;  %v6073_v12 = vld [vmem:[#allocation7 + $0x3b0] sm:$0xff]  ;;  %v2789_v14 = vand.u32 4294901760, %v2788_v21 }
  0xe2   :  { %8408 = vst [vmem:[#allocation190_spill] sm:$0xff] %v6039_v41  ;;  %8410 = vst [vmem:[#allocation191_spill] sm:$0xff] %v6044_v42  ;;  %v6059_v32 = vsub.f32 %v5835_v25, %v8415_v40  ;;  %v6064_v53 = vsub.f32 %v5869_v46, %v8417_v39  ;;  %v2801_v0 = vand.u32 4294901760, %v2800_v15  ;;  %v6076_v37 = vsub.f32 %v5901_v19, %v1056_v6  ;;  %v915_v40 = vld [vmem:[#allocation7 + $0x348] sm:$0xff]  ;;  %v6093_v19 = vld [vmem:[#allocation7 + $0x3d8] sm:$0xff] }
  0xe3   :  { %8412 = vst [vmem:[#allocation192_spill] sm:$0xff] %v6049_v58  ;;  %8414 = vst [vmem:[#allocation193_spill] sm:$0xff] %v6054_v59  ;;  %v6069_v47 = vsub.f32 %v5871_v50, %v8419_v17  ;;  %v6079_v25 = vsub.f32 %v5909_v44, %v1060_v45  ;;  %v919_v46 = vld [vmem:[#allocation7 + $0x368] sm:$0xff]  ;;  %v8425_v39 = vand.u32 4294901760, %v5971_v3  ;;  %v8426_v50 = vand.u32 4294901760, %v5940_v23  ;;  %v6095_v6 = vld [vmem:[#allocation7 + $0x3f8] sm:$0xff] }
  0xe4   :  { %8416 = vst [vmem:[#allocation194_spill] sm:$0xff] %v6059_v32  ;;  %8418 = vst [vmem:[#allocation195_spill] sm:$0xff] %v6064_v53  ;;  %v6091_v21 = vsub.f32 %v906_v16, %v1058_v1  ;;  %v4252_v44 = vpack.c.bf16 %v2801_v0, %v2789_v14  ;;  %v6097_v45 = vsub.f32 %v910_v51, %v1062_v56  ;;  %v7826_v15 = vand.u32 4294901760, %v6071_v61  ;;  %v918_v14 = vld [vmem:[#allocation7 + $0x360] sm:$0xff]  ;;  %v6115_v0 = vld [vmem:[#allocation7 + $0x3d0] sm:$0xff] }
  0xe5   :  { %8420 = vst [vmem:[#allocation196_spill] sm:$0xff] %v6069_v47  ;;  %8421 = vst [vmem:[#allocation197_spill] sm:$0xff] %v6071_v61  ;;  %v2806_v36 = vsub.f32 %v5971_v3, %v8425_v39  ;;  %v6087_v17 = vsub.f32 %v5940_v23, %v8426_v50  ;;  %v6089_v47 = vpack.c.bf16 %v1062_v56, %v1058_v1  ;;  %v7828_v39 = vand.u32 4294901760, %v6073_v12  ;;  %v914_v56 = vld [vmem:[#allocation7 + $0x340] sm:$0xff] }
  0xe6   :  { %8422 = vst [vmem:[#allocation198_spill] sm:$0xff] %v6073_v12  ;;  %8423 = vst [vmem:[#allocation199_spill] sm:$0xff] %v6076_v37  ;;  %v1064_v50 = vand.u32 4294901760, %v915_v40  ;;  %v1068_v23 = vand.u32 4294901760, %v919_v46  ;;  %4253 = vmatpush1.bf16.msra.mxu0 %v4252_v44  ;;  %v6106_v16 = vsub.f32 %v6071_v61, %v7826_v15  ;;  %v934_v37 = vld [vmem:[#allocation7 + $0x3e0] sm:$0xff] }
  0xe7   :  { %8424 = vst [vmem:[#allocation200_spill] sm:$0xff] %v6079_v25  ;;  %8427 = vst [vmem:[#allocation201_spill] sm:$0xff] %v6087_v17  ;;  %v2807_v3 = vand.u32 4294901760, %v2806_v36  ;;  %v7832_v25 = vand.u32 4294901760, %v6087_v17  ;;  %3801 = vmatpush1.bf16.msra.mxu1 %v6089_v47  ;;  %v6111_v51 = vsub.f32 %v6073_v12, %v7828_v39  ;;  %v8439_v36 = vand.u32 4294901760, %v6093_v19 }
  0xe8   :  { %8428 = vst [vmem:[#allocation202_spill] sm:$0xff] %v6089_v47  ;;  %8429 = vst [vmem:[#allocation203_spill] sm:$0xff] %v6091_v21  ;;  %v6120_v47 = vpack.c.bf16 %v1068_v23, %v1064_v50  ;;  %v6122_v15 = vsub.f32 %v915_v40, %v1064_v50  ;;  %v6124_v61 = vsub.f32 %v919_v46, %v1068_v23  ;;  %v7841_v39 = vand.u32 4294901760, %v6106_v16 }
  0xe9   :  { %8430 = vst [vmem:[#allocation204_spill] sm:$0xff] %v6093_v19  ;;  %8431 = vst [vmem:[#allocation205_spill] sm:$0xff] %v6095_v6  ;;  %v2818_v44 = vsub.f32 %v6087_v17, %v7832_v25  ;;  %v7844_v1 = vand.u32 4294901760, %v6111_v51  ;;  %v6131_v12 = vsub.f32 %v6093_v19, %v8439_v36  ;;  %v1066_v40 = vand.u32 4294901760, %v914_v56 }
  0xea   :  { %8432 = vst [vmem:[#allocation206_spill] sm:$0xff] %v6097_v45  ;;  %8433 = vst [vmem:[#allocation207_spill] sm:$0xff] %v6106_v16  ;;  %v8441_v45 = vand.u32 4294901760, %v6095_v6  ;;  %3803 = vmatprep.subr.bf16.mxu1 %v6120_v47  ;;  %v1070_v23 = vand.u32 4294901760, %v918_v14  ;;  %v2812_v50 = vsub.f32 %v6106_v16, %v7841_v39 }
  0xeb   :  { %8434 = vst [vmem:[#allocation208_spill] sm:$0xff] %v6111_v51  ;;  %8435 = vst [vmem:[#allocation209_spill] sm:$0xff] %v6115_v0  ;;  %v2819_v25 = vand.u32 4294901760, %v2818_v44  ;;  %v2824_v36 = vsub.f32 %v6111_v51, %v7844_v1  ;;  %v7847_v19 = vand.u32 4294901760, %v6131_v12  ;;  %v923_v44 = vld [vmem:[#allocation7 + $0x388] sm:$0xff]  ;;  %v6152_v46 = vsub.f32 %v914_v56, %v1066_v40 }
  0xec   :  { %8436 = vst [vmem:[#allocation210_spill] sm:$0xff] %v6120_v47  ;;  %8437 = vst [vmem:[#allocation211_spill] sm:$0xff] %v6122_v15  ;;  %v6136_v21 = vsub.f32 %v6095_v6, %v8441_v45  ;;  %v6148_v6 = vld [vmem:[#allocation7 + $0x3f0] sm:$0xff]  ;;  %v927_v47 = vld [vmem:[#allocation7 + $0x3a8] sm:$0xff]  ;;  %v6154_v15 = vsub.f32 %v918_v14, %v1070_v23  ;;  %v2813_v39 = vand.u32 4294901760, %v2812_v50  ;;  %v1072_v14 = vand.u32 4294901760, %v923_v44 }
  0xed   :  { %8438 = vst [vmem:[#allocation212_spill] sm:$0xff] %v6124_v61  ;;  %8440 = vst [vmem:[#allocation213_spill] sm:$0xff] %v6131_v12  ;;  %v4254_v17 = vpack.c.bf16 %v2819_v25, %v2807_v3  ;;  %v6150_v61 = vpack.c.bf16 %v1070_v23, %v1066_v40  ;;  %v2825_v16 = vand.u32 4294901760, %v2824_v36  ;;  %v2830_v1 = vsub.f32 %v6131_v12, %v7847_v19  ;;  %v922_v23 = vld [vmem:[#allocation7 + $0x380] sm:$0xff] }
  0xee   :  { %8442 = vst [vmem:[#allocation214_spill] sm:$0xff] %v6136_v21  ;;  %v7850_v45 = vand.u32 4294901760, %v6136_v21  ;;  %8443 = vst [vmem:[#allocation215_spill] sm:$0xff] %v6148_v6  ;;  %v7858_v3 = vand.u32 4294901760, %v6148_v6  ;;  %v8447_v25 = vand.u32 4294901760, %v6115_v0  ;;  %v1076_v40 = vand.u32 4294901760, %v927_v47 }
  0xef   :  { %8444 = vst [vmem:[#allocation216_spill] sm:$0xff] %v6150_v61  ;;  %8445 = vst [vmem:[#allocation217_spill] sm:$0xff] %v6152_v46  ;;  %4255 = vmatprep.subr.bf16.mxu0 %v4254_v17  ;;  %3805 = vmatpush1.bf16.msra.mxu1 %v6150_v61  ;;  %v926_v50 = vld [vmem:[#allocation7 + $0x3a0] sm:$0xff]  ;;  %v4256_v36 = vpack.c.bf16 %v2825_v16, %v2813_v39  ;;  %v2831_v19 = vand.u32 4294901760, %v2830_v1  ;;  %v931_v46 = vld [vmem:[#allocation7 + $0x3c8] sm:$0xff]  ;;  %v1074_v39 = vand.u32 4294901760, %v922_v23 }
  0xf0   :  { %8446 = vst [vmem:[#allocation218_spill] sm:$0xff] %v6154_v15  ;;  %v2842_v51 = vsub.f32 %v6136_v21, %v7850_v45  ;;  %v6167_v56 = vsub.f32 %v6115_v0, %v8447_v25  ;;  %v6173_v17 = vsub.f32 %v6148_v6, %v7858_v3  ;;  %v6175_v61 = vpack.c.bf16 %v1076_v40, %v1072_v14  ;;  %v935_v25 = vld [vmem:[#allocation7 + $0x3e8] sm:$0xff]  ;;  %v930_v6 = vld [vmem:[#allocation7 + $0x3c0] sm:$0xff] }
  0xf1   :  { %v6177_v21 = vsub.f32 %v923_v44, %v1072_v14  ;;  %4257 = vmatpush1.bf16.msra.mxu0 %v4256_v36  ;;  %v6179_v12 = vsub.f32 %v927_v47, %v1076_v40  ;;  %v1078_v16 = vand.u32 4294901760, %v926_v50  ;;  %v1080_v3 = vand.u32 4294901760, %v931_v46 }
  0xf2   :  { %8448 = vst [vmem:[#allocation219_spill] sm:$0xff] %v6167_v56  ;;  %v2843_v15 = vand.u32 4294901760, %v2842_v51  ;;  %v7861_v45 = vand.u32 4294901760, %v6167_v56  ;;  %8449 = vst [vmem:[#allocation220_spill] sm:$0xff] %v6173_v17  ;;  %v7865_v1 = vand.u32 4294901760, %v6173_v17  ;;  %3807 = vmatprep.subr.bf16.mxu1 %v6175_v61  ;;  %v6188_v14 = vsub.f32 %v922_v23, %v1074_v39 }
  0xf3   :  { %8450 = vst [vmem:[#allocation221_spill] sm:$0xff] %v6175_v61  ;;  %8451 = vst [vmem:[#allocation222_spill] sm:$0xff] %v6177_v21  ;;  %v6186_v44 = vpack.c.bf16 %v1078_v16, %v1074_v39  ;;  %v6190_v47 = vsub.f32 %v926_v50, %v1078_v16  ;;  %v6195_v36 = vsub.f32 %v931_v46, %v1080_v3  ;;  %v7869_v50 = vand.u32 4294901760, %v4940_v11 }
  0xf4   :  { %v4258_v0 = vpack.c.bf16 %v2843_v15, %v2831_v19  ;;  %8452 = vst [vmem:[#allocation223_spill] sm:$0xff] %v6179_v12  ;;  %v2836_v51 = vsub.f32 %v6167_v56, %v7861_v45  ;;  %8454 = vst [vmem:[#allocation225_spill] sm:$0xff] %v6188_v14  ;;  %v1084_v19 = vand.u32 4294901760, %v935_v25  ;;  %v2848_v40 = vsub.f32 %v6173_v17, %v7865_v1 }
  0xf5   :  { %8453 = vst [vmem:[#allocation224_spill] sm:$0xff] %v6186_v44  ;;  %8455 = vst [vmem:[#allocation226_spill] sm:$0xff] %v6190_v47  ;;  %3809 = vmatpush1.bf16.msra.mxu1 %v6186_v44  ;;  %v1086_v12 = vand.u32 4294901760, %v934_v37  ;;  %v7868_v39 = vand.u32 4294901760, %v4942_v13  ;;  %v4262_v16 = vpack.c.bf16 %v5002_v7, %v4991_v10  ;;  %v7872_v1 = vand.u32 4294901760, %v4947_v30 }
  0xf6   :  { %4259 = vmatprep.subr.bf16.mxu0 %v4258_v0  ;;  %v2837_v15 = vand.u32 4294901760, %v2836_v51  ;;  %8456 = vst [vmem:[#allocation227_spill] sm:$0xff] %v6195_v36  ;;  %v6198_v45 = vpack.c.bf16 %v1084_v19, %v1080_v3  ;;  %v6200_v61 = vsub.f32 %v935_v25, %v1084_v19  ;;  %v1082_v0 = vand.u32 4294901760, %v930_v6 }
  0xf7   :  { %v2849_v23 = vand.u32 4294901760, %v2848_v40  ;;  %v6211_v3 = vsub.f32 %v934_v37, %v1086_v12  ;;  %v1124_v19 = vsub.f32 %v4940_v11, %v7869_v50  ;;  %v1136_v40 = vsub.f32 %v4942_v13, %v7868_v39 }
  0xf8   :  { %8457 = vst [vmem:[#allocation228_spill] sm:$0xff] %v6198_v45  ;;  %8458 = vst [vmem:[#allocation229_spill] sm:$0xff] %v6200_v61  ;;  %3811 = vmatprep.subr.bf16.mxu1 %v6198_v45  ;;  %v6207_v46 = vpack.c.bf16 %v1086_v12, %v1082_v0  ;;  %v6209_v51 = vsub.f32 %v930_v6, %v1082_v0  ;;  %v7875_v45 = vand.u32 4294901760, %v4949_v31  ;;  %v7876_v6 = vand.u32 4294901760, %v4959_v52 }
  0xf9   :  { %8461 = vst [vmem:[#allocation232_spill] sm:$0xff] %v6211_v3  ;;  %v4260_v25 = vpack.c.bf16 %v2849_v23, %v2837_v15  ;;  %v7877_v37 = vand.u32 4294901760, %v4970_v5  ;;  %v1125_v12 = vand.u32 4294901760, %v1124_v19  ;;  %v1137_v15 = vand.u32 4294901760, %v1136_v40 }
  0xfa   :  { %8459 = vst [vmem:[#allocation230_spill] sm:$0xff] %v6207_v46  ;;  %8460 = vst [vmem:[#allocation231_spill] sm:$0xff] %v6209_v51  ;;  %3813 = vmatpush1.bf16.msra.mxu1 %v6207_v46  ;;  %v1130_v0 = vsub.f32 %v4947_v30, %v7872_v1  ;;  %v1142_v23 = vsub.f32 %v4949_v31, %v7875_v45  ;;  %v1148_v39 = vsub.f32 %v4959_v52, %v7876_v6  ;;  %v8518_v30 = vld [vmem:[#allocation67_spill] sm:$0xff] }
  0xfb   :  { %4261 = vmatpush1.bf16.msra.mxu0 %v4260_v25  ;;  %v1160_v50 = vsub.f32 %v4970_v5, %v7877_v37  ;;  %v7881_v25 = vand.u32 4294901760, %v4985_v22  ;;  %v3814_v19 = vpack.c.bf16 %v1137_v15, %v1125_v12  ;;  %v7879_v46 = vand.u32 4294901760, %v4997_v57 }
  0xfc   :  { %4263 = vmatprep.subr.bf16.mxu0 %v4262_v16  ;;  %v1131_v40 = vand.u32 4294901760, %v1130_v0  ;;  %v1143_v1 = vand.u32 4294901760, %v1142_v23  ;;  %v1149_v16 = vand.u32 4294901760, %v1148_v39  ;;  %v7880_v37 = vand.u32 4294901760, %v5038_v27 }
  0xfd   :  { %v1161_v44 = vand.u32 4294901760, %v1160_v50  ;;  %v1154_v45 = vsub.f32 %v4985_v22, %v7881_v25  ;;  %3815 = vmatprep.subr.bf16.mxu1 %v3814_v19  ;;  %v1166_v6 = vsub.f32 %v4997_v57, %v7879_v46  ;;  %v7882_v7 = vand.u32 4294901760, %v5050_v49 }
  0xfe   :  { %v6246_v12 = vpack.c.bf16 %v1143_v1, %v1131_v40  ;;  %v7883_v50 = vand.u32 4294901760, %v5078_v28  ;;  %v1172_v23 = vsub.f32 %v5038_v27, %v7880_v37  ;;  %v7885_v46 = vand.u32 4294901760, %v5087_v2  ;;  %v8520_v27 = vld [vmem:[#allocation70_spill] sm:$0xff] }
  0xff   :  { %v6248_v15 = vpack.c.bf16 %v1161_v44, %v1149_v16  ;;  %v1155_v0 = vand.u32 4294901760, %v1154_v45  ;;  %v1167_v39 = vand.u32 4294901760, %v1166_v6  ;;  %v1184_v19 = vsub.f32 %v5050_v49, %v7882_v7  ;;  %v8521_v49 = vld [vmem:[#allocation73_spill] sm:$0xff] }
 0x100   :  { %8462 = vst [vmem:[#allocation233_spill] sm:$0xff] %v6246_v12  ;;  %v1178_v1 = vsub.f32 %v5078_v28, %v7883_v50  ;;  %v7886_v44 = vand.u32 4294901760, %v5125_v8  ;;  %v7887_v45 = vand.u32 4294901760, %v5136_v35  ;;  %v1173_v6 = vand.u32 4294901760, %v1172_v23 }
 0x101   :  { %8463 = vst [vmem:[#allocation234_spill] sm:$0xff] %v6248_v15  ;;  %v6263_v40 = vpack.c.bf16 %v1167_v39, %v1155_v0  ;;  %v1185_v16 = vand.u32 4294901760, %v1184_v19  ;;  %v1190_v37 = vsub.f32 %v5087_v2, %v7885_v46  ;;  %v7888_v0 = vand.u32 4294901760, %v5153_v29 }
 0x102   :  { %v1179_v25 = vand.u32 4294901760, %v1178_v1  ;;  %v1196_v7 = vsub.f32 %v5125_v8, %v7886_v44  ;;  %v1208_v50 = vsub.f32 %v5136_v35, %v7887_v45  ;;  %v7891_v39 = vand.u32 4294901760, %v5165_v4 }
 0x103   :  { %8464 = vst [vmem:[#allocation235_spill] sm:$0xff] %v6263_v40  ;;  %v6274_v10 = vpack.c.bf16 %v1185_v16, %v1173_v6  ;;  %v1191_v15 = vand.u32 4294901760, %v1190_v37  ;;  %v8466_v40 = vld [vmem:[#allocation65_spill] sm:$0xff]  ;;  %v1202_v44 = vsub.f32 %v5153_v29, %v7888_v0  ;;  %v8468_v16 = vld [vmem:[#allocation67_spill] sm:$0xff] }
 0x104   :  { %v1197_v23 = vand.u32 4294901760, %v1196_v7  ;;  %v1209_v19 = vand.u32 4294901760, %v1208_v50  ;;  %v7892_v46 = vand.u32 4294901760, %v8466_v40  ;;  %v1214_v6 = vsub.f32 %v5165_v4, %v7891_v39  ;;  %v8470_v50 = vld [vmem:[#allocation70_spill] sm:$0xff] }
 0x105   :  { %8465 = vst [vmem:[#allocation236_spill] sm:$0xff] %v6274_v10  ;;  %v6279_v1 = vpack.c.bf16 %v1191_v15, %v1179_v25  ;;  %v7896_v37 = vand.u32 4294901760, %v8468_v16  ;;  %v7900_v10 = vand.u32 4294901760, %v8470_v50  ;;  %v1203_v25 = vand.u32 4294901760, %v1202_v44 }
 0x106   :  { %v6288_v45 = vpack.c.bf16 %v1209_v19, %v1197_v23  ;;  %v1220_v7 = vsub.f32 %v8466_v40, %v7892_v46  ;;  %v1215_v15 = vand.u32 4294901760, %v1214_v6  ;;  %v8472_v19 = vld [vmem:[#allocation80_spill] sm:$0xff]  ;;  %v8474_v6 = vld [vmem:[#allocation83_spill] sm:$0xff] }
 0x107   :  { %8467 = vst [vmem:[#allocation237_spill] sm:$0xff] %v6279_v1  ;;  %v1232_v0 = vsub.f32 %v8468_v16, %v7896_v37  ;;  %v8471_v1 = vld [vmem:[#allocation73_spill] sm:$0xff]  ;;  %v1226_v23 = vsub.f32 %v8470_v50, %v7900_v10  ;;  %v7904_v39 = vand.u32 4294901760, %v8472_v19  ;;  %v7905_v40 = vand.u32 4294901760, %v8474_v6  ;;  %v8475_v37 = vld [vmem:[#allocation84_spill] sm:$0xff] }
 0x108   :  { %8469 = vst [vmem:[#allocation238_spill] sm:$0xff] %v6288_v45  ;;  %v7901_v12 = vand.u32 4294901760, %v8471_v1  ;;  %v1221_v29 = vand.u32 4294901760, %v1220_v7  ;;  %v6302_v45 = vpack.c.bf16 %v1215_v15, %v1203_v25  ;;  %v7907_v16 = vand.u32 4294901760, %v8475_v37  ;;  %v8477_v25 = vld [vmem:[#allocation88_spill] sm:$0xff] }
 0x109   :  { %v1233_v46 = vand.u32 4294901760, %v1232_v0  ;;  %v1227_v4 = vand.u32 4294901760, %v1226_v23  ;;  %v1244_v7 = vsub.f32 %v8472_v19, %v7904_v39  ;;  %v1256_v0 = vsub.f32 %v8474_v6, %v7905_v40 }
 0x10a   :  { %8473 = vst [vmem:[#allocation239_spill] sm:$0xff] %v6302_v45  ;;  %v1238_v44 = vsub.f32 %v8471_v1, %v7901_v12  ;;  %v7908_v15 = vand.u32 4294901760, %v8477_v25  ;;  %v1250_v23 = vsub.f32 %v8475_v37, %v7907_v16  ;;  %v8478_v12 = vld [vmem:[#allocation95_spill] sm:$0xff]  ;;  %v7911_v40 = vand.u32 4294901760, %v5946_v63 }
 0x10b   :  { %v6312_v35 = vpack.c.bf16 %v1233_v46, %v1221_v29  ;;  %v1245_v45 = vand.u32 4294901760, %v1244_v7  ;;  %v7909_v1 = vand.u32 4294901760, %v8478_v12  ;;  %v1257_v39 = vand.u32 4294901760, %v1256_v0  ;;  %v8480_v46 = vld [vmem:[#allocation97_spill] sm:$0xff] }
 0x10c   :  { %v1239_v10 = vand.u32 4294901760, %v1238_v44  ;;  %v1262_v29 = vsub.f32 %v8477_v25, %v7908_v15  ;;  %v7910_v44 = vand.u32 4294901760, %v8480_v46  ;;  %v7913_v15 = vand.u32 4294901760, %v5956_v18 }
 0x10d   :  { %8476 = vst [vmem:[#allocation240_spill] sm:$0xff] %v6312_v35  ;;  %v1251_v35 = vand.u32 4294901760, %v1250_v23  ;;  %v1268_v7 = vsub.f32 %v8478_v12, %v7909_v1  ;;  %v6332_v6 = vpack.c.bf16 %v1257_v39, %v1245_v45  ;;  %v1274_v23 = vsub.f32 %v5946_v63, %v7911_v40 }
 0x10e   :  { %v6322_v50 = vpack.c.bf16 %v1239_v10, %v1227_v4  ;;  %v1263_v16 = vand.u32 4294901760, %v1262_v29  ;;  %v1280_v10 = vsub.f32 %v8480_v46, %v7910_v44  ;;  %v7912_v4 = vand.u32 4294901760, %v5951_v34 }
 0x10f   :  { %8481 = vst [vmem:[#allocation242_spill] sm:$0xff] %v6332_v6  ;;  %v1269_v0 = vand.u32 4294901760, %v1268_v7  ;;  %v7914_v39 = vand.u32 4294901760, %v5961_v54  ;;  %v1275_v29 = vand.u32 4294901760, %v1274_v23  ;;  %v1292_v7 = vsub.f32 %v5956_v18, %v7913_v15 }
 0x110   :  { %8479 = vst [vmem:[#allocation241_spill] sm:$0xff] %v6322_v50  ;;  %v6342_v50 = vpack.c.bf16 %v1263_v16, %v1251_v35  ;;  %v1281_v1 = vand.u32 4294901760, %v1280_v10  ;;  %v1286_v45 = vsub.f32 %v5951_v34, %v7912_v4  ;;  %v7915_v44 = vand.u32 4294901760, %v5979_v33 }
 0x111   :  { %v1304_v35 = vsub.f32 %v5961_v54, %v7914_v39  ;;  %v7916_v16 = vand.u32 4294901760, %v5984_v55  ;;  %v1293_v10 = vand.u32 4294901760, %v1292_v7  ;;  %v7917_v4 = vand.u32 4294901760, %v5994_v38 }
 0x112   :  { %8482 = vst [vmem:[#allocation243_spill] sm:$0xff] %v6342_v50  ;;  %v6352_v6 = vpack.c.bf16 %v1281_v1, %v1269_v0  ;;  %v1287_v40 = vand.u32 4294901760, %v1286_v45  ;;  %v1298_v23 = vsub.f32 %v5979_v33, %v7915_v44  ;;  %v7918_v0 = vand.u32 4294901760, %v5999_v43 }
 0x113   :  { %v1305_v15 = vand.u32 4294901760, %v1304_v35  ;;  %v1310_v1 = vsub.f32 %v5984_v55, %v7916_v16  ;;  %v1316_v7 = vsub.f32 %v5994_v38, %v7917_v4  ;;  %v7919_v39 = vand.u32 4294901760, %v6004_v48 }
 0x114   :  { %8483 = vst [vmem:[#allocation244_spill] sm:$0xff] %v6352_v6  ;;  %v6362_v50 = vpack.c.bf16 %v1287_v40, %v1275_v29  ;;  %v1299_v45 = vand.u32 4294901760, %v1298_v23  ;;  %v1328_v40 = vsub.f32 %v5999_v43, %v7918_v0  ;;  %v7920_v29 = vand.u32 4294901760, %v6009_v62 }
 0x115   :  { %v6372_v6 = vpack.c.bf16 %v1305_v15, %v1293_v10  ;;  %v1311_v44 = vand.u32 4294901760, %v1310_v1  ;;  %v1317_v35 = vand.u32 4294901760, %v1316_v7  ;;  %v1322_v23 = vsub.f32 %v6004_v48, %v7919_v39 }
 0x116   :  { %8484 = vst [vmem:[#allocation245_spill] sm:$0xff] %v6362_v50  ;;  %v7921_v16 = vand.u32 4294901760, %v6014_v9  ;;  %v1329_v4 = vand.u32 4294901760, %v1328_v40  ;;  %v1334_v15 = vsub.f32 %v6009_v62, %v7920_v29  ;;  %v7922_v10 = vand.u32 4294901760, %v6019_v60 }
 0x117   :  { %8485 = vst [vmem:[#allocation246_spill] sm:$0xff] %v6372_v6  ;;  %v6382_v50 = vpack.c.bf16 %v1311_v44, %v1299_v45  ;;  %v1323_v1 = vand.u32 4294901760, %v1322_v23  ;;  %v7923_v0 = vand.u32 4294901760, %v6024_v20  ;;  %v7924_v45 = vand.u32 4294901760, %v6029_v24 }
 0x118   :  { %v1340_v7 = vsub.f32 %v6014_v9, %v7921_v16  ;;  %v6392_v6 = vpack.c.bf16 %v1329_v4, %v1317_v35  ;;  %v1335_v39 = vand.u32 4294901760, %v1334_v15  ;;  %v1352_v44 = vsub.f32 %v6019_v60, %v7922_v10 }
 0x119   :  { %8486 = vst [vmem:[#allocation247_spill] sm:$0xff] %v6382_v50  ;;  %v1346_v23 = vsub.f32 %v6024_v20, %v7923_v0  ;;  %v7925_v29 = vand.u32 4294901760, %v6034_v26  ;;  %v1358_v4 = vsub.f32 %v6029_v24, %v7924_v45  ;;  %v7926_v35 = vand.u32 4294901760, %v6039_v41  ;;  %v8536_v20 = vld [vmem:[#allocation36_spill] sm:$0xff] }
 0x11a   :  { %8487 = vst [vmem:[#allocation248_spill] sm:$0xff] %v6392_v6  ;;  %v1341_v40 = vand.u32 4294901760, %v1340_v7  ;;  %v6402_v50 = vpack.c.bf16 %v1335_v39, %v1323_v1  ;;  %v1353_v16 = vand.u32 4294901760, %v1352_v44  ;;  %v7927_v10 = vand.u32 4294901760, %v6044_v42 }
 0x11b   :  { %v1347_v15 = vand.u32 4294901760, %v1346_v23  ;;  %v1364_v7 = vsub.f32 %v6034_v26, %v7925_v29  ;;  %v1359_v0 = vand.u32 4294901760, %v1358_v4  ;;  %v1376_v39 = vsub.f32 %v6039_v41, %v7926_v35 }
 0x11c   :  { %8488 = vst [vmem:[#allocation249_spill] sm:$0xff] %v6402_v50  ;;  %v6412_v6 = vpack.c.bf16 %v1353_v16, %v1341_v40  ;;  %v7928_v1 = vand.u32 4294901760, %v6049_v58  ;;  %v1370_v23 = vsub.f32 %v6044_v42, %v7927_v10  ;;  %v7933_v45 = vand.u32 4294901760, %v6054_v59 }
 0x11d   :  { %v1365_v44 = vand.u32 4294901760, %v1364_v7  ;;  %v6422_v50 = vpack.c.bf16 %v1359_v0, %v1347_v15  ;;  %v1377_v29 = vand.u32 4294901760, %v1376_v39  ;;  %v7934_v40 = vand.u32 4294901760, %v6059_v32  ;;  %v8492_v15 = vld [vmem:[#allocation196_spill] sm:$0xff] }
 0x11e   :  { %8489 = vst [vmem:[#allocation250_spill] sm:$0xff] %v6412_v6  ;;  %v1382_v16 = vsub.f32 %v6049_v58, %v7928_v1  ;;  %v1371_v4 = vand.u32 4294901760, %v1370_v23  ;;  %v1388_v7 = vsub.f32 %v6054_v59, %v7933_v45  ;;  %v7939_v35 = vand.u32 4294901760, %v6064_v53  ;;  %v8493_v1 = vld [vmem:[#allocation199_spill] sm:$0xff] }
 0x11f   :  { %8490 = vst [vmem:[#allocation251_spill] sm:$0xff] %v6422_v50  ;;  %v6432_v6 = vpack.c.bf16 %v1377_v29, %v1365_v44  ;;  %v1400_v0 = vsub.f32 %v6059_v32, %v7934_v40  ;;  %v7940_v39 = vand.u32 4294901760, %v8492_v15  ;;  %v7944_v58 = vand.u32 4294901760, %v8493_v1  ;;  %v8495_v44 = vld [vmem:[#allocation200_spill] sm:$0xff]  ;;  %v8496_v40 = vld [vmem:[#allocation203_spill] sm:$0xff] }
 0x120   :  { %v1383_v10 = vand.u32 4294901760, %v1382_v16  ;;  %v1389_v50 = vand.u32 4294901760, %v1388_v7  ;;  %v1394_v23 = vsub.f32 %v6064_v53, %v7939_v35  ;;  %v7948_v16 = vand.u32 4294901760, %v8495_v44  ;;  %v8506_v53 = vld [vmem:[#allocation217_spill] sm:$0xff] }
 0x121   :  { %8491 = vst [vmem:[#allocation252_spill] sm:$0xff] %v6432_v6  ;;  %v1401_v45 = vand.u32 4294901760, %v1400_v0  ;;  %v1406_v29 = vsub.f32 %v8492_v15, %v7940_v39  ;;  %v1412_v7 = vsub.f32 %v8493_v1, %v7944_v58  ;;  %v7949_v32 = vand.u32 4294901760, %v8496_v40  ;;  %v8501_v58 = vld [vmem:[#allocation211_spill] sm:$0xff] }
 0x122   :  { %v6442_v42 = vpack.c.bf16 %v1383_v10, %v1371_v4  ;;  %v1395_v6 = vand.u32 4294901760, %v1394_v23  ;;  %v1424_v10 = vsub.f32 %v8495_v44, %v7948_v16  ;;  %v8498_v4 = vld [vmem:[#allocation206_spill] sm:$0xff]  ;;  %v7953_v1 = vand.u32 4294901760, %v8501_v58 }
 0x123   :  { %v6452_v59 = vpack.c.bf16 %v1401_v45, %v1389_v50  ;;  %v1407_v35 = vand.u32 4294901760, %v1406_v29  ;;  %v7952_v0 = vand.u32 4294901760, %v8498_v4  ;;  %v1418_v23 = vsub.f32 %v8496_v40, %v7949_v32  ;;  %v8503_v29 = vld [vmem:[#allocation212_spill] sm:$0xff] }
 0x124   :  { %8494 = vst [vmem:[#allocation253_spill] sm:$0xff] %v6442_v42  ;;  %v1413_v42 = vand.u32 4294901760, %v1412_v7  ;;  %v1425_v50 = vand.u32 4294901760, %v1424_v10  ;;  %v7954_v16 = vand.u32 4294901760, %v8503_v29  ;;  %v1436_v7 = vsub.f32 %v8501_v58, %v7953_v1  ;;  %v8508_v10 = vld [vmem:[#allocation218_spill] sm:$0xff] }
 0x125   :  { %8497 = vst [vmem:[#allocation254_spill] sm:$0xff] %v6452_v59  ;;  %v6464_v41 = vpack.c.bf16 %v1407_v35, %v1395_v6  ;;  %v1430_v45 = vsub.f32 %v8498_v4, %v7952_v0  ;;  %v1419_v59 = vand.u32 4294901760, %v1418_v23  ;;  %v7955_v39 = vand.u32 4294901760, %v8506_v53 }
 0x126   :  { %v6476_v15 = vpack.c.bf16 %v1425_v50, %v1413_v42  ;;  %v1448_v35 = vsub.f32 %v8503_v29, %v7954_v16  ;;  %v7958_v0 = vand.u32 4294901760, %v8508_v10  ;;  %v7961_v44 = vand.u32 4294901760, %v6177_v21 }
 0x127   :  { %8502 = vst [vmem:[#allocation255_spill] sm:$0xff] %v6464_v41  ;;  %v1431_v6 = vand.u32 4294901760, %v1430_v45  ;;  %v1437_v41 = vand.u32 4294901760, %v1436_v7  ;;  %v1442_v23 = vsub.f32 %v8506_v53, %v7955_v39  ;;  %v8509_v45 = vld [vmem:[#allocation223_spill] sm:$0xff]  ;;  %v80_v40 = vlaneseq }
 0x128   :  { %8507 = vst [vmem:[#allocation212_spill] sm:$0xff] %v6476_v15  ;;  %v1449_v42 = vand.u32 4294901760, %v1448_v35  ;;  %v1454_v50 = vsub.f32 %v8508_v10, %v7958_v0  ;;  %v7962_v16 = vand.u32 4294901760, %v8509_v45  ;;  %v1460_v39 = vsub.f32 %v6177_v21, %v7961_v44 }
 0x129   :  { %v6488_v32 = vpack.c.bf16 %v1431_v6, %v1419_v59  ;;  %v1443_v7 = vand.u32 4294901760, %v1442_v23  ;;  %v7963_v15 = vand.u32 4294901760, %v6188_v14  ;;  %v7964_v6 = vand.u32 4294901760, %v6190_v47 }
 0x12a   :  { %v6498_v1 = vpack.c.bf16 %v1449_v42, %v1437_v41  ;;  %v1455_v56 = vand.u32 4294901760, %v1454_v50  ;;  %v1472_v59 = vsub.f32 %v8509_v45, %v7962_v16  ;;  %v1461_v35 = vand.u32 4294901760, %v1460_v39 }
 0x12b   :  { %v1466_v23 = vsub.f32 %v6188_v14, %v7963_v15  ;;  %v7965_v0 = vand.u32 4294901760, %v6195_v36  ;;  %v1478_v41 = vsub.f32 %v6190_v47, %v7964_v6  ;;  %v7966_v42 = vand.u32 4294901760, %v6200_v61  ;;  %v8548_v14 = vld [vmem:[#allocation69_spill] sm:$0xff] }
 0x12c   :  { %8510 = vst [vmem:[#allocation217_spill] sm:$0xff] %v6498_v1  ;;  %v6508_v17 = vpack.c.bf16 %v1455_v56, %v1443_v7  ;;  %v1473_v44 = vand.u32 4294901760, %v1472_v59  ;;  %v6514_v50 = vshrl.u32 %v80_v40, 7  ;;  %v7967_v15 = vand.u32 4294901760, %v6209_v51 }
 0x12d   :  { %v1467_v16 = vand.u32 4294901760, %v1466_v23  ;;  %v1484_v39 = vsub.f32 %v6195_v36, %v7965_v0  ;;  %v1479_v56 = vand.u32 4294901760, %v1478_v41  ;;  %v1496_v7 = vsub.f32 %v6200_v61, %v7966_v42  ;;  %v8513_v42 = vld [vmem:[#allocation53_spill] sm:$0xff] }
 0x12e   :  { %8511 = vst [vmem:[#allocation256_spill] sm:$0xff] %v6508_v17  ;;  %8512 = vst [vmem:[#allocation257_spill] sm:$0xff] %v6514_v50  ;;  %v6520_v1 = vpack.c.bf16 %v1473_v44, %v1461_v35  ;;  %v7968_v59 = vand.u32 4294901760, %v6211_v3  ;;  %v1490_v40 = vsub.f32 %v6209_v51, %v7967_v15  ;;  %v78_v15 = vld [vmem:[%s7533_s2] sm:$0x3]  ;;  %v8514_v52 = vsub.s32 0, %v6514_v50 }
 0x12f   :  { %v1485_v6 = vand.u32 4294901760, %v1484_v39  ;;  %v6531_v0 = vpack.c.bf16 %v1479_v56, %v1467_v16  ;;  %v1497_v17 = vand.u32 4294901760, %v1496_v7  ;;  %v8519_v22 = vsub.s32 1, %v6514_v50  ;;  %v8553_v51 = vld [vmem:[#allocation234_spill] sm:$0xff] }
 0x130   :  { %v1502_v44 = vsub.f32 %v6211_v3, %v7968_v59  ;;  %v1491_v41 = vand.u32 4294901760, %v1490_v40  ;;  %v83_v16 = vrot.slane %v78_v15, %v8514_v52 }
 0x131   :  { %v6545_v56 = vpack.c.bf16 %v1497_v17, %v1485_v6  ;;  %v8515_v17 = vld [vmem:[#allocation54_spill] sm:$0xff]  ;;  %v87_v40 = vrot.slane %v78_v15, %v8519_v22 }
 0x132   :  { %v1503_v7 = vand.u32 4294901760, %v1502_v44  ;;  %v8516_v6 = vld [vmem:[#allocation58_spill] sm:$0xff] }
 0x134   :  { %v6553_v23 = vpack.c.bf16 %v1503_v7, %v1491_v41  ;;  %v8522_v41 = vld [vmem:[#allocation83_spill] sm:$0xff] }
 0x167   :  { %v762_v8 = vpop.f32.mrb[0].mxu0 }
 0x168   :  { %v4518_v59 = vadd.f32 %v762_v8, %v83_v16  ;;  %v764_v5 = vpop.f32.mrb[1].mxu0 }
 0x169   :  { %v4519_v50 = vadd.f32 %v764_v5, %v87_v40 }
 0x16a   :  { %v778_v15 = vmul.f32 0.044715, %v4518_v59  ;;  %v774_v26 = vmul.f32 0.5, %v4518_v59 }
 0x16b   :  { %v779_v39 = vmul.f32 0.044715, %v4519_v50  ;;  %v769_v19 = vpop.f32.mrb[2].mxu0  ;;  %v775_v44 = vmul.f32 0.5, %v4519_v50 }
 0x16c   :  { %v782_v35 = vmul.f32 %v4518_v59, %v778_v15  ;;  %v4520_v37 = vadd.f32 %v769_v19, %v83_v16  ;;  %v771_v25 = vpop.f32.mrb[3].mxu0 }
 0x16d   :  { %v783_v52 = vmul.f32 %v4519_v50, %v779_v39  ;;  %v4521_v12 = vadd.f32 %v771_v25, %v87_v40 }
 0x16e   :  { %v786_v8 = vmul.f32 %v4518_v59, %v782_v35  ;;  %v780_v63 = vmul.f32 0.044715, %v4520_v37 }
 0x16f   :  { %v787_v22 = vmul.f32 %v4519_v50, %v783_v52  ;;  %v781_v18 = vmul.f32 0.044715, %v4521_v12 }
 0x170   :  { %v790_v54 = vadd.f32 %v4518_v59, %v786_v8  ;;  %v784_v34 = vmul.f32 %v4520_v37, %v780_v63  ;;  %v777_v59 = vmul.f32 0.5, %v4521_v12 }
 0x171   :  { %v791_v7 = vadd.f32 %v4519_v50, %v787_v22  ;;  %v785_v33 = vmul.f32 %v4521_v12, %v781_v18  ;;  %v8524_v22 = vld [vmem:[#allocation191_spill] sm:$0xff]  ;;  %v8525_v18 = vld [vmem:[#allocation192_spill] sm:$0xff]  ;;  %v8534_v50 = vld [vmem:[#allocation34_spill] sm:$0xff] }
 0x172   :  { %v794_v16 = vmul.f32 0.7978846, %v790_v54  ;;  %v788_v39 = vmul.f32 %v4520_v37, %v784_v34  ;;  %v8527_v34 = vld [vmem:[#allocation194_spill] sm:$0xff] }
 0x173   :  { %v795_v40 = vmul.f32 0.7978846, %v791_v7  ;;  %v789_v35 = vmul.f32 %v4521_v12, %v785_v33  ;;  %v8529_v7 = vld [vmem:[#allocation196_spill] sm:$0xff] }
 0x174   :  { %4601 = vtanh.f32 %v794_v16  ;;  %v792_v15 = vadd.f32 %v4520_v37, %v788_v39  ;;  %v776_v16 = vmul.f32 0.5, %v4520_v37 }
 0x175   :  { %4603 = vtanh.f32 %v795_v40  ;;  %v793_v5 = vadd.f32 %v4521_v12, %v789_v35 }
 0x176   :  { %v796_v63 = vmul.f32 0.7978846, %v792_v15 }
 0x177   :  { %v797_v48 = vmul.f32 0.7978846, %v793_v5 }
 0x178   :  { %4605 = vtanh.f32 %v796_v63 }
 0x179   :  { %4607 = vtanh.f32 %v797_v48  ;;  %v8537_v48 = vld [vmem:[#allocation37_spill] sm:$0xff] }
 0x17a   :  { %v4266_v58 = vpack.c.bf16 %v8537_v48, %v8536_v20 }
 0x17e   :  { %v4602_v35 = vpop.eup %4601 }
 0x17f   :  { %v4604_v15 = vpop.eup %4603  ;;  %v802_v52 = vadd.f32 1.0, %v4602_v35 }
 0x180   :  { %v803_v5 = vadd.f32 1.0, %v4604_v15  ;;  %v8535_v15 = vld [vmem:[#allocation35_spill] sm:$0xff] }
 0x181   :  { %v806_v63 = vmul.f32 %v802_v52, %v774_v26  ;;  %v4264_v26 = vpack.c.bf16 %v8535_v15, %v8534_v50 }
 0x182   :  { %v4606_v19 = vpop.eup %4605  ;;  %v807_v54 = vmul.f32 %v803_v5, %v775_v44  ;;  %v8541_v5 = vld [vmem:[#allocation51_spill] sm:$0xff] }
 0x183   :  { %v4608_v25 = vpop.eup %4607  ;;  %v6603_v40 = vand.u32 4294901760, %v806_v63  ;;  %v804_v39 = vadd.f32 1.0, %v4606_v19 }
 0x184   :  { %v6605_v8 = vand.u32 4294901760, %v807_v54  ;;  %v805_v35 = vadd.f32 1.0, %v4608_v25 }
 0x185   :  { %v808_v52 = vmul.f32 %v804_v39, %v776_v16  ;;  %v6612_v44 = vsub.f32 %v806_v63, %v6603_v40  ;;  %v8538_v39 = vld [vmem:[#allocation42_spill] sm:$0xff]  ;;  %v8539_v63 = vld [vmem:[#allocation44_spill] sm:$0xff] }
 0x186   :  { %8533 = vst [vmem:[#allocation53_spill] sm:$0xff] %v6605_v8  ;;  %v809_v33 = vmul.f32 %v805_v35, %v777_v59  ;;  %2852 = vmatprep.mubr.f32.mxu0 %v6605_v8  ;;  %v6618_v37 = vsub.f32 %v807_v54, %v6605_v8  ;;  %v4268_v59 = vpack.c.bf16 %v8539_v63, %v8538_v39  ;;  %v8540_v54 = vld [vmem:[#allocation47_spill] sm:$0xff]  ;;  %v8547_v39 = vld [vmem:[#allocation68_spill] sm:$0xff] }
 0x187   :  { %v6620_v12 = vand.u32 4294901760, %v808_v52  ;;  %2854 = vmatmul.mubr.f32.vlgmr.msra.gmra.mrb[4].mxu0 %v6603_v40  ;;  %v6624_v19 = vand.u32 4294901760, %v6612_v44  ;;  %v4270_v48 = vpack.c.bf16 %v8541_v5, %v8540_v54  ;;  %v8544_v5 = vld [vmem:[#allocation60_spill] sm:$0xff]  ;;  %v8545_v54 = vld [vmem:[#allocation61_spill] sm:$0xff]  ;;  %v4274_v47 = vpack.c.bf16 %v8548_v14, %v8547_v39 }
 0x188   :  { %v6628_v16 = vand.u32 4294901760, %v809_v33  ;;  %4265 = vmatpush1.bf16.msra.mxu0 %v4264_v26  ;;  %v6633_v35 = vand.u32 4294901760, %v6618_v37  ;;  %v4272_v36 = vpack.c.bf16 %v8545_v54, %v8544_v5  ;;  %v8556_v39 = vld [vmem:[#allocation76_spill] sm:$0xff] }
 0x189   :  { %4267 = vmatprep.subr.bf16.mxu0 %v4266_v58  ;;  %v1097_v20 = vsub.f32 %v6612_v44, %v6624_v19  ;;  %v6640_v15 = vsub.f32 %v808_v52, %v6620_v12 }
 0x18a   :  { %2860 = vmatprep.mubr.f32.mxu0 %v6628_v16  ;;  %v1091_v26 = vsub.f32 %v6618_v37, %v6633_v35  ;;  %v6648_v63 = vsub.f32 %v809_v33, %v6628_v16 }
 0x18b   :  { %2862 = vmatmul.mubr.f32.gmra.mrb[6].mxu0 %v6620_v12  ;;  %v6652_v58 = vand.u32 4294901760, %v6640_v15  ;;  %v6664_v33 = vand.u32 4294901760, %v1097_v20  ;;  %v8551_v20 = vld [vmem:[#allocation71_spill] sm:$0xff] }
 0x18c   :  { %4269 = vmatpush1.bf16.msra.mxu0 %v4268_v59  ;;  %3062 = vmatprep.mubr.f32.mxu0 %v6618_v37  ;;  %v6657_v25 = vand.u32 4294901760, %v1091_v26  ;;  %v6662_v61 = vand.u32 4294901760, %v6648_v63  ;;  %v8549_v26 = vld [vmem:[#allocation233_spill] sm:$0xff] }
 0x18d   :  { %8542 = vst [vmem:[#allocation54_spill] sm:$0xff] %v6652_v58  ;;  %4271 = vmatprep.subr.bf16.mxu0 %v4270_v48  ;;  %8546 = vst [vmem:[#allocation191_spill] sm:$0xff] %v6664_v33  ;;  %v1113_v52 = vsub.f32 %v6640_v15, %v6652_v58  ;;  %v8552_v48 = vld [vmem:[#allocation74_spill] sm:$0xff] }
 0x18e   :  { %8543 = vst [vmem:[#allocation67_spill] sm:$0xff] %v6657_v25  ;;  %1093 = vmatprep.mubr.f32.mxu1 %v6657_v25  ;;  %v1107_v59 = vsub.f32 %v6648_v63, %v6662_v61  ;;  %v4276_v5 = vpack.c.bf16 %v8552_v48, %v8551_v20  ;;  %v8555_v25 = vld [vmem:[#allocation75_spill] sm:$0xff]  ;;  %v8560_v48 = vld [vmem:[#allocation236_spill] sm:$0xff]  ;;  %v8566_v20 = vld [vmem:[#allocation238_spill] sm:$0xff] }
 0x18f   :  { %1099 = vmatmul.mubr.f32.vlgmr.msra.gmra.mrb[0].mxu1 %v6664_v33  ;;  %v6680_v14 = vand.u32 4294901760, %v1113_v52  ;;  %v4278_v3 = vpack.c.bf16 %v8556_v39, %v8555_v25  ;;  %v8557_v33 = vld [vmem:[#allocation235_spill] sm:$0xff]  ;;  %v8564_v39 = vld [vmem:[#allocation100_spill] sm:$0xff] }
 0x190   :  { %3817 = vmatpush1.bf16.msra.mxu1 %v8549_v26  ;;  %4273 = vmatpush1.bf16.msra.mxu0 %v4272_v36  ;;  %v6675_v54 = vand.u32 4294901760, %v1107_v59  ;;  %v8558_v36 = vld [vmem:[#allocation89_spill] sm:$0xff]  ;;  %v8559_v59 = vld [vmem:[#allocation92_spill] sm:$0xff]  ;;  %v8565_v25 = vld [vmem:[#allocation103_spill] sm:$0xff] }
 0x191   :  { %3819 = vmatprep.subr.bf16.mxu1 %v8553_v51  ;;  %4275 = vmatprep.subr.bf16.mxu0 %v4274_v47  ;;  %8554 = vst [vmem:[#allocation233_spill] sm:$0xff] %v6680_v14  ;;  %v4280_v26 = vpack.c.bf16 %v8559_v59, %v8558_v36  ;;  %v8561_v47 = vld [vmem:[#allocation93_spill] sm:$0xff]  ;;  %v8562_v51 = vld [vmem:[#allocation94_spill] sm:$0xff]  ;;  %v8569_v36 = vld [vmem:[#allocation239_spill] sm:$0xff] }
 0x192   :  { %8550 = vst [vmem:[#allocation34_spill] sm:$0xff] %v6675_v54  ;;  %1109 = vmatprep.mubr.f32.mxu1 %v6675_v54  ;;  %v4282_v52 = vpack.c.bf16 %v8562_v51, %v8561_v47  ;;  %v8563_v54 = vld [vmem:[#allocation237_spill] sm:$0xff]  ;;  %v8572_v51 = vld [vmem:[#allocation240_spill] sm:$0xff] }
 0x193   :  { %1115 = vmatmul.mubr.f32.gmra.mrb[2].mxu1 %v6680_v14  ;;  %v4284_v14 = vpack.c.bf16 %v8565_v25, %v8564_v39  ;;  %v8575_v47 = vld [vmem:[#allocation241_spill] sm:$0xff]  ;;  %v8578_v39 = vld [vmem:[#allocation242_spill] sm:$0xff] }
 0x194   :  { %3821 = vmatpush1.bf16.msra.mxu1 %v8557_v33  ;;  %4277 = vmatpush1.bf16.msra.mxu0 %v4276_v5  ;;  %v8567_v5 = vld [vmem:[#allocation104_spill] sm:$0xff]  ;;  %v8568_v33 = vld [vmem:[#allocation105_spill] sm:$0xff] }
 0x195   :  { %1506 = vmatprep.mubr.f32.mxu1 %v6605_v8  ;;  %3823 = vmatprep.subr.bf16.mxu1 %v8560_v48  ;;  %v4286_v59 = vpack.c.bf16 %v8568_v33, %v8567_v5  ;;  %v8570_v48 = vld [vmem:[#allocation110_spill] sm:$0xff]  ;;  %v8571_v8 = vld [vmem:[#allocation111_spill] sm:$0xff] }
 0x196   :  { %4279 = vmatprep.subr.bf16.mxu0 %v4278_v3  ;;  %v4288_v58 = vpack.c.bf16 %v8571_v8, %v8570_v48  ;;  %v8573_v3 = vld [vmem:[#allocation112_spill] sm:$0xff]  ;;  %v8581_v5 = vld [vmem:[#allocation243_spill] sm:$0xff] }
 0x197   :  { %v8584_v48 = vld [vmem:[#allocation244_spill] sm:$0xff] }
 0x198   :  { %3825 = vmatpush1.bf16.msra.mxu1 %v8563_v54  ;;  %4281 = vmatpush1.bf16.msra.mxu0 %v4280_v26  ;;  %v8574_v54 = vld [vmem:[#allocation113_spill] sm:$0xff] }
 0x199   :  { %3827 = vmatprep.subr.bf16.mxu1 %v8566_v20  ;;  %4283 = vmatprep.subr.bf16.mxu0 %v4282_v52  ;;  %v4290_v26 = vpack.c.bf16 %v8574_v54, %v8573_v3  ;;  %v8576_v20 = vld [vmem:[#allocation114_spill] sm:$0xff]  ;;  %v8577_v52 = vld [vmem:[#allocation115_spill] sm:$0xff]  ;;  %v8587_v3 = vld [vmem:[#allocation245_spill] sm:$0xff] }
 0x19a   :  { %v4292_v25 = vpack.c.bf16 %v8577_v52, %v8576_v20  ;;  %v8590_v20 = vld [vmem:[#allocation246_spill] sm:$0xff] }
 0x19c   :  { %3829 = vmatpush1.bf16.msra.mxu1 %v8569_v36  ;;  %4285 = vmatpush1.bf16.msra.mxu0 %v4284_v14  ;;  %v8579_v36 = vld [vmem:[#allocation116_spill] sm:$0xff]  ;;  %v8580_v14 = vld [vmem:[#allocation117_spill] sm:$0xff] }
 0x19d   :  { %3831 = vmatprep.subr.bf16.mxu1 %v8572_v51  ;;  %4287 = vmatprep.subr.bf16.mxu0 %v4286_v59  ;;  %v4294_v33 = vpack.c.bf16 %v8580_v14, %v8579_v36  ;;  %v8582_v51 = vld [vmem:[#allocation120_spill] sm:$0xff]  ;;  %v8583_v59 = vld [vmem:[#allocation121_spill] sm:$0xff]  ;;  %v8593_v36 = vld [vmem:[#allocation247_spill] sm:$0xff] }
 0x19e   :  { %v4296_v8 = vpack.c.bf16 %v8583_v59, %v8582_v51  ;;  %v8596_v51 = vld [vmem:[#allocation248_spill] sm:$0xff] }
 0x1a0   :  { %3833 = vmatpush1.bf16.msra.mxu1 %v8575_v47  ;;  %4289 = vmatpush1.bf16.msra.mxu0 %v4288_v58  ;;  %v8585_v47 = vld [vmem:[#allocation126_spill] sm:$0xff]  ;;  %v8586_v58 = vld [vmem:[#allocation127_spill] sm:$0xff] }
 0x1a1   :  { %3835 = vmatprep.subr.bf16.mxu1 %v8578_v39  ;;  %4291 = vmatprep.subr.bf16.mxu0 %v4290_v26  ;;  %v4298_v54 = vpack.c.bf16 %v8586_v58, %v8585_v47  ;;  %v8588_v39 = vld [vmem:[#allocation128_spill] sm:$0xff]  ;;  %v8589_v26 = vld [vmem:[#allocation129_spill] sm:$0xff] }
 0x1a2   :  { %v4300_v52 = vpack.c.bf16 %v8589_v26, %v8588_v39  ;;  %v8599_v47 = vld [vmem:[#allocation249_spill] sm:$0xff]  ;;  %v8602_v39 = vld [vmem:[#allocation250_spill] sm:$0xff] }
 0x1a4   :  { %3837 = vmatpush1.bf16.msra.mxu1 %v8581_v5  ;;  %4293 = vmatpush1.bf16.msra.mxu0 %v4292_v25  ;;  %v8591_v5 = vld [vmem:[#allocation133_spill] sm:$0xff]  ;;  %v8592_v25 = vld [vmem:[#allocation138_spill] sm:$0xff] }
 0x1a5   :  { %3839 = vmatprep.subr.bf16.mxu1 %v8584_v48  ;;  %4295 = vmatprep.subr.bf16.mxu0 %v4294_v33  ;;  %v4302_v14 = vpack.c.bf16 %v8592_v25, %v8591_v5  ;;  %v8594_v48 = vld [vmem:[#allocation142_spill] sm:$0xff]  ;;  %v8595_v33 = vld [vmem:[#allocation144_spill] sm:$0xff]  ;;  %v8605_v5 = vld [vmem:[#allocation251_spill] sm:$0xff] }
 0x1a6   :  { %v4304_v59 = vpack.c.bf16 %v8595_v33, %v8594_v48  ;;  %v8608_v48 = vld [vmem:[#allocation252_spill] sm:$0xff] }
 0x1a8   :  { %3841 = vmatpush1.bf16.msra.mxu1 %v8587_v3  ;;  %4297 = vmatpush1.bf16.msra.mxu0 %v4296_v8  ;;  %v8597_v3 = vld [vmem:[#allocation146_spill] sm:$0xff]  ;;  %v8598_v8 = vld [vmem:[#allocation149_spill] sm:$0xff] }
 0x1a9   :  { %3843 = vmatprep.subr.bf16.mxu1 %v8590_v20  ;;  %4299 = vmatprep.subr.bf16.mxu0 %v4298_v54  ;;  %v4306_v58 = vpack.c.bf16 %v8598_v8, %v8597_v3  ;;  %v8600_v20 = vld [vmem:[#allocation153_spill] sm:$0xff]  ;;  %v8601_v54 = vld [vmem:[#allocation154_spill] sm:$0xff] }
 0x1aa   :  { %v4308_v26 = vpack.c.bf16 %v8601_v54, %v8600_v20  ;;  %v8611_v3 = vld [vmem:[#allocation253_spill] sm:$0xff]  ;;  %v8614_v20 = vld [vmem:[#allocation254_spill] sm:$0xff] }
 0x1ac   :  { %3845 = vmatpush1.bf16.msra.mxu1 %v8593_v36  ;;  %4301 = vmatpush1.bf16.msra.mxu0 %v4300_v52  ;;  %v8603_v36 = vld [vmem:[#allocation157_spill] sm:$0xff]  ;;  %v8604_v52 = vld [vmem:[#allocation159_spill] sm:$0xff] }
 0x1ad   :  { %3847 = vmatprep.subr.bf16.mxu1 %v8596_v51  ;;  %4303 = vmatprep.subr.bf16.mxu0 %v4302_v14  ;;  %v4310_v25 = vpack.c.bf16 %v8604_v52, %v8603_v36  ;;  %v8606_v51 = vld [vmem:[#allocation163_spill] sm:$0xff]  ;;  %v8607_v14 = vld [vmem:[#allocation164_spill] sm:$0xff] }
 0x1ae   :  { %v4312_v33 = vpack.c.bf16 %v8607_v14, %v8606_v51  ;;  %v8617_v36 = vld [vmem:[#allocation255_spill] sm:$0xff] }
 0x1b0   :  { %3849 = vmatpush1.bf16.msra.mxu1 %v8599_v47  ;;  %4305 = vmatpush1.bf16.msra.mxu0 %v4304_v59  ;;  %v8609_v47 = vld [vmem:[#allocation167_spill] sm:$0xff]  ;;  %v8610_v59 = vld [vmem:[#allocation169_spill] sm:$0xff] }
 0x1b1   :  { %3851 = vmatprep.subr.bf16.mxu1 %v8602_v39  ;;  %4307 = vmatprep.subr.bf16.mxu0 %v4306_v58  ;;  %v4314_v8 = vpack.c.bf16 %v8610_v59, %v8609_v47  ;;  %v8612_v39 = vld [vmem:[#allocation172_spill] sm:$0xff]  ;;  %v8613_v58 = vld [vmem:[#allocation173_spill] sm:$0xff] }
 0x1b2   :  { %v4316_v54 = vpack.c.bf16 %v8613_v58, %v8612_v39  ;;  %v8622_v59 = vld [vmem:[#allocation217_spill] sm:$0xff]  ;;  %v8623_v58 = vld [vmem:[#allocation214_spill] sm:$0xff] }
 0x1b3   :  { %v8626_v39 = vld [vmem:[#allocation18_spill] sm:$0xff] }
 0x1b4   :  { %3853 = vmatpush1.bf16.msra.mxu1 %v8605_v5  ;;  %4309 = vmatpush1.bf16.msra.mxu0 %v4308_v26  ;;  %v8615_v5 = vld [vmem:[#allocation180_spill] sm:$0xff]  ;;  %v8616_v26 = vld [vmem:[#allocation201_spill] sm:$0xff] }
 0x1b5   :  { %3855 = vmatprep.subr.bf16.mxu1 %v8608_v48  ;;  %4311 = vmatprep.subr.bf16.mxu0 %v4310_v25  ;;  %v4318_v52 = vpack.c.bf16 %v8616_v26, %v8615_v5  ;;  %v8618_v48 = vld [vmem:[#allocation212_spill] sm:$0xff]  ;;  %v8627_v26 = vand.u32 4294901760, %v8626_v39  ;;  %v8628_v5 = vld [vmem:[#allocation19_spill] sm:$0xff] }
 0x1b6   :  { %v8619_v25 = vld [vmem:[#allocation208_spill] sm:$0xff]  ;;  %v8638_v39 = vld [vmem:[#allocation23_spill] sm:$0xff] }
 0x1b8   :  { %3857 = vmatpush1.bf16.msra.mxu1 %v8611_v3  ;;  %4313 = vmatpush1.bf16.msra.mxu0 %v4312_v33  ;;  %v8620_v3 = vld [vmem:[#allocation207_spill] sm:$0xff] }
 0x1b9   :  { %3859 = vmatprep.subr.bf16.mxu1 %v8614_v20  ;;  %4315 = vmatprep.subr.bf16.mxu0 %v4314_v8  ;;  %v8621_v33 = vpack.c.bf16 %v8619_v25, %v8620_v3  ;;  %v8624_v20 = vld [vmem:[#allocation213_spill] sm:$0xff] }
 0x1ba   :  { %v8625_v8 = vpack.c.bf16 %v8623_v58, %v8624_v20  ;;  %v8636_v58 = vld [vmem:[#allocation22_spill] sm:$0xff] }
 0x1bc   :  { %3861 = vmatpush1.bf16.msra.mxu1 %v8617_v36  ;;  %4317 = vmatpush1.bf16.msra.mxu0 %v4316_v54  ;;  %v8629_v36 = vand.u32 4294901760, %v8628_v5  ;;  %v8639_v5 = vand.u32 4294901760, %v8638_v39  ;;  %v8650_v39 = vld [vmem:[#allocation43_spill] sm:$0xff] }
 0x1bd   :  { %3863 = vmatprep.subr.bf16.mxu1 %v8618_v48  ;;  %4319 = vmatprep.subr.bf16.mxu0 %v4318_v52  ;;  %v8630_v48 = vld [vmem:[#allocation256_spill] sm:$0xff] }
 0x1be   :  { %v6761_v54 = vpack.c.bf16 %v8629_v36, %v8627_v26  ;;  %v8631_v52 = vld [vmem:[#allocation220_spill] sm:$0xff]  ;;  %v8640_v26 = vld [vmem:[#allocation25_spill] sm:$0xff] }
 0x1bf   :  { %v8641_v36 = vand.u32 4294901760, %v8640_v26 }
 0x1c0   :  { %3865 = vmatpush1.bf16.msra.mxu1 %v6488_v32  ;;  %4321 = vmatpush1.bf16.msra.mxu0 %v8621_v33  ;;  %v8632_v32 = vld [vmem:[#allocation219_spill] sm:$0xff] }
 0x1c1   :  { %3867 = vmatprep.subr.bf16.mxu1 %v8622_v59  ;;  %4323 = vmatprep.subr.bf16.mxu0 %v8625_v8  ;;  %v8633_v47 = vpack.c.bf16 %v8631_v52, %v8632_v32  ;;  %v8634_v59 = vld [vmem:[#allocation20_spill] sm:$0xff]  ;;  %v8637_v8 = vand.u32 4294901760, %v8636_v58  ;;  %v6779_v25 = vpack.c.bf16 %v8641_v36, %v8639_v5  ;;  %v8645_v58 = vld [vmem:[#allocation30_spill] sm:$0xff]  ;;  %v8651_v5 = vand.u32 4294901760, %v8650_v39 }
 0x1c2   :  { %v8635_v33 = vand.u32 4294901760, %v8634_v59 }
 0x1c3   :  { %8642 = vst [vmem:[#allocation234_spill] sm:$0xff] %v6779_v25 }
 0x1c4   :  { %3869 = vmatpush1.bf16.msra.mxu1 %v8630_v48  ;;  %4325 = vmatpush1.bf16.msra.mxu0 %v8633_v47  ;;  %v6773_v20 = vpack.c.bf16 %v8637_v8, %v8635_v33  ;;  %v8646_v48 = vand.u32 4294901760, %v8645_v58  ;;  %v8648_v33 = vld [vmem:[#allocation39_spill] sm:$0xff] }
 0x1c5   :  { %3871 = vmatprep.subr.bf16.mxu1 %v6520_v1  ;;  %4327 = vmatprep.subr.bf16.mxu0 %v6761_v54  ;;  %v8643_v1 = vld [vmem:[#allocation27_spill] sm:$0xff]  ;;  %v8649_v8 = vand.u32 4294901760, %v8648_v33 }
 0x1c6   :  { %v8644_v47 = vand.u32 4294901760, %v8643_v1  ;;  %v8656_v1 = vld [vmem:[#allocation49_spill] sm:$0xff] }
 0x1c7   :  { %3065 = vmatmul.mubr.f32.vlgmr.msra.gmra.mrb[4].mxu0 %v6612_v44  ;;  %v6797_v26 = vpack.c.bf16 %v8651_v5, %v8649_v8  ;;  %v8661_v8 = vld [vmem:[#allocation56_spill] sm:$0xff] }
 0x1c8   :  { %3873 = vmatpush1.bf16.msra.mxu1 %v6531_v0  ;;  %3072 = vmatprep.mubr.f32.mxu0 %v6648_v63  ;;  %v6790_v59 = vpack.c.bf16 %v8646_v48, %v8644_v47  ;;  %v8653_v0 = vpack.c.bf16 %v4942_v13, %v4940_v11  ;;  %v8657_v47 = vand.u32 4294901760, %v8656_v1  ;;  %v8659_v48 = vld [vmem:[#allocation55_spill] sm:$0xff]  ;;  %v8664_v5 = vld [vmem:[#allocation16_spill] sm:$0xff] }
 0x1c9   :  { %4329 = vmatpush1.bf16.msra.mxu0 %v6773_v20  ;;  %3875 = vmatprep.subr.bf16.mxu1 %v6545_v56  ;;  %8652 = vst [vmem:[#allocation236_spill] sm:$0xff] %v6797_v26  ;;  %v8654_v56 = vld [vmem:[#allocation48_spill] sm:$0xff]  ;;  %v8660_v33 = vand.u32 4294901760, %v8659_v48 }
 0x1ca   :  { %8647 = vst [vmem:[#allocation235_spill] sm:$0xff] %v6790_v59  ;;  %4331 = vmatprep.subr.bf16.mxu0 %v6779_v25  ;;  %v8655_v36 = vand.u32 4294901760, %v8654_v56  ;;  %v8666_v56 = vld [vmem:[#allocation26_spill] sm:$0xff]  ;;  %v8676_v13 = vld [vmem:[#allocation64_spill] sm:$0xff] }
 0x1cb   :  { %3075 = vmatmul.mubr.f32.gmra.mrb[6].mxu0 %v6640_v15  ;;  %v8677_v11 = vand.u32 4294901760, %v8676_v13 }
 0x1cc   :  { %3877 = vmatpush1.bf16.msra.mxu1 %v6553_v23  ;;  %3212 = vmatprep.mubr.f32.mxu0 %v6633_v35  ;;  %v6810_v58 = vpack.c.bf16 %v8657_v47, %v8655_v36  ;;  %v8662_v23 = vand.u32 4294901760, %v8661_v8  ;;  %v8667_v36 = vld [vmem:[#allocation21_spill] sm:$0xff]  ;;  %v8669_v47 = vld [vmem:[#allocation59_spill] sm:$0xff] }
 0x1cd   :  { %4333 = vmatpush1.bf16.msra.mxu0 %v6790_v59  ;;  %3879 = vmatprep.subr.bf16.mxu1 %v8653_v0  ;;  %v8665_v0 = vpack.c.bf16 %v4949_v31, %v8664_v5  ;;  %v8668_v1 = vpack.c.bf16 %v8666_v56, %v8667_v36  ;;  %v8670_v48 = vand.u32 4294901760, %v8669_v47 }
 0x1ce   :  { %8658 = vst [vmem:[#allocation237_spill] sm:$0xff] %v6810_v58  ;;  %4335 = vmatprep.subr.bf16.mxu0 %v6797_v26  ;;  %v6817_v39 = vpack.c.bf16 %v8662_v23, %v8660_v33  ;;  %v8671_v26 = vld [vmem:[#allocation62_spill] sm:$0xff]  ;;  %v8674_v23 = vld [vmem:[#allocation63_spill] sm:$0xff] }
 0x1cf   :  { %1508 = vmatmul.mubr.f32.vlgmr.msra.gmra.mrb[0].mxu1 %v6603_v40  ;;  %v8672_v8 = vand.u32 4294901760, %v8671_v26  ;;  %v8675_v59 = vand.u32 4294901760, %v8674_v23  ;;  %v8681_v26 = vld [vmem:[#allocation41_spill] sm:$0xff]  ;;  %v8686_v23 = vld [vmem:[#allocation78_spill] sm:$0xff] }
 0x1d0   :  { %8663 = vst [vmem:[#allocation238_spill] sm:$0xff] %v6817_v39  ;;  %1514 = vmatprep.mubr.f32.mxu1 %v6628_v16  ;;  %3881 = vmatpush1.bf16.msra.mxu1 %v8665_v0  ;;  %v8679_v0 = vld [vmem:[#allocation28_spill] sm:$0xff]  ;;  %v8687_v13 = vand.u32 4294901760, %v8686_v23 }
 0x1d1   :  { %4337 = vmatpush1.bf16.msra.mxu0 %v6810_v58  ;;  %3883 = vmatprep.subr.bf16.mxu1 %v8668_v1  ;;  %v6832_v33 = vpack.c.bf16 %v8672_v8, %v8670_v48  ;;  %v6839_v31 = vpack.c.bf16 %v8677_v11, %v8675_v59  ;;  %v8680_v58 = vpack.c.bf16 %v4997_v57, %v8679_v0  ;;  %v8682_v1 = vld [vmem:[#allocation38_spill] sm:$0xff]  ;;  %v8684_v48 = vld [vmem:[#allocation77_spill] sm:$0xff]  ;;  %v8689_v59 = vld [vmem:[#allocation79_spill] sm:$0xff] }
 0x1d2   :  { %4339 = vmatprep.subr.bf16.mxu0 %v6817_v39  ;;  %v8683_v47 = vpack.c.bf16 %v8681_v26, %v8682_v1  ;;  %v8685_v8 = vand.u32 4294901760, %v8684_v48  ;;  %v8690_v39 = vand.u32 4294901760, %v8689_v59  ;;  %v8691_v57 = vld [vmem:[#allocation81_spill] sm:$0xff]  ;;  %v8704_v59 = vld [vmem:[#allocation91_spill] sm:$0xff] }
 0x1d3   :  { %8673 = vst [vmem:[#allocation239_spill] sm:$0xff] %v6832_v33  ;;  %8678 = vst [vmem:[#allocation240_spill] sm:$0xff] %v6839_v31  ;;  %1516 = vmatmul.mubr.f32.gmra.mrb[2].mxu1 %v6620_v12 }
 0x1d4   :  { %3885 = vmatpush1.bf16.msra.mxu1 %v8680_v58  ;;  %1716 = vmatprep.mubr.f32.mxu1 %v6618_v37  ;;  %v6854_v11 = vpack.c.bf16 %v8687_v13, %v8685_v8  ;;  %v8692_v58 = vand.u32 4294901760, %v8691_v57  ;;  %v8694_v37 = vpack.c.bf16 %v5087_v2, %v5078_v28  ;;  %v8697_v8 = vld [vmem:[#allocation85_spill] sm:$0xff]  ;;  %v8699_v13 = vld [vmem:[#allocation86_spill] sm:$0xff] }
 0x1d5   :  { %4341 = vmatpush1.bf16.msra.mxu0 %v6832_v33  ;;  %3887 = vmatprep.subr.bf16.mxu1 %v8683_v47  ;;  %v8695_v47 = vld [vmem:[#allocation50_spill] sm:$0xff]  ;;  %v8698_v23 = vand.u32 4294901760, %v8697_v8 }
 0x1d6   :  { %8688 = vst [vmem:[#allocation241_spill] sm:$0xff] %v6854_v11  ;;  %4343 = vmatprep.subr.bf16.mxu0 %v6839_v31  ;;  %v6861_v0 = vpack.c.bf16 %v8692_v58, %v8690_v39  ;;  %v8696_v48 = vpack.c.bf16 %v8513_v42, %v8695_v47  ;;  %v8700_v31 = vand.u32 4294901760, %v8699_v13  ;;  %v8702_v57 = vld [vmem:[#allocation90_spill] sm:$0xff]  ;;  %v8705_v58 = vand.u32 4294901760, %v8704_v59  ;;  %v8712_v13 = vld [vmem:[#allocation99_spill] sm:$0xff] }
 0x1d7   :  { %v8703_v39 = vand.u32 4294901760, %v8702_v57  ;;  %v8715_v57 = vld [vmem:[#allocation101_spill] sm:$0xff]  ;;  %v8717_v59 = vld [vmem:[#allocation102_spill] sm:$0xff] }
 0x1d8   :  { %8693 = vst [vmem:[#allocation242_spill] sm:$0xff] %v6861_v0  ;;  %3889 = vmatpush1.bf16.msra.mxu1 %v8694_v37  ;;  %v6874_v33 = vpack.c.bf16 %v8700_v31, %v8698_v23  ;;  %v8707_v37 = vpack.c.bf16 %v8516_v6, %v8515_v17  ;;  %v8710_v31 = vld [vmem:[#allocation98_spill] sm:$0xff] }
 0x1d9   :  { %4345 = vmatpush1.bf16.msra.mxu0 %v6854_v11  ;;  %3891 = vmatprep.subr.bf16.mxu1 %v8696_v48  ;;  %v6881_v2 = vpack.c.bf16 %v8705_v58, %v8703_v39  ;;  %v8708_v48 = vld [vmem:[#allocation65_spill] sm:$0xff]  ;;  %v8711_v23 = vand.u32 4294901760, %v8710_v31  ;;  %v8716_v39 = vand.u32 4294901760, %v8715_v57  ;;  %v8718_v58 = vand.u32 4294901760, %v8717_v59  ;;  %v8728_v57 = vld [vmem:[#allocation108_spill] sm:$0xff] }
 0x1da   :  { %8701 = vst [vmem:[#allocation243_spill] sm:$0xff] %v6874_v33  ;;  %4347 = vmatprep.subr.bf16.mxu0 %v6861_v0  ;;  %v8709_v8 = vpack.c.bf16 %v8518_v30, %v8708_v48  ;;  %v8713_v0 = vand.u32 4294901760, %v8712_v13  ;;  %v8725_v13 = vld [vmem:[#allocation107_spill] sm:$0xff]  ;;  %v8730_v59 = vld [vmem:[#allocation109_spill] sm:$0xff] }
 0x1db   :  { %8706 = vst [vmem:[#allocation244_spill] sm:$0xff] %v6881_v2  ;;  %v6901_v6 = vpack.c.bf16 %v8718_v58, %v8716_v39  ;;  %v8729_v39 = vand.u32 4294901760, %v8728_v57  ;;  %v8731_v58 = vand.u32 4294901760, %v8730_v59  ;;  %v8743_v57 = vld [vmem:[#allocation122_spill] sm:$0xff]  ;;  %v8745_v59 = vld [vmem:[#allocation123_spill] sm:$0xff] }
 0x1dc   :  { %3893 = vmatpush1.bf16.msra.mxu1 %v8707_v37  ;;  %v6894_v11 = vpack.c.bf16 %v8713_v0, %v8711_v23  ;;  %v8720_v37 = vpack.c.bf16 %v8521_v49, %v8520_v27  ;;  %v8723_v0 = vld [vmem:[#allocation106_spill] sm:$0xff] }
 0x1dd   :  { %4349 = vmatpush1.bf16.msra.mxu0 %v6874_v33  ;;  %3895 = vmatprep.subr.bf16.mxu1 %v8709_v8  ;;  %8719 = vst [vmem:[#allocation246_spill] sm:$0xff] %v6901_v6  ;;  %v8721_v8 = vld [vmem:[#allocation80_spill] sm:$0xff]  ;;  %v8724_v23 = vand.u32 4294901760, %v8723_v0  ;;  %v6921_v49 = vpack.c.bf16 %v8731_v58, %v8729_v39  ;;  %v8744_v39 = vand.u32 4294901760, %v8743_v57  ;;  %v8746_v58 = vand.u32 4294901760, %v8745_v59  ;;  %v8759_v57 = vld [vmem:[#allocation130_spill] sm:$0xff] }
 0x1de   :  { %8714 = vst [vmem:[#allocation245_spill] sm:$0xff] %v6894_v11  ;;  %4351 = vmatprep.subr.bf16.mxu0 %v6881_v2  ;;  %v8722_v31 = vpack.c.bf16 %v8522_v41, %v8721_v8  ;;  %v8726_v2 = vand.u32 4294901760, %v8725_v13  ;;  %v8740_v13 = vld [vmem:[#allocation119_spill] sm:$0xff] }
 0x1df   :  { %8732 = vst [vmem:[#allocation248_spill] sm:$0xff] %v6921_v49  ;;  %v8761_v59 = vld [vmem:[#allocation131_spill] sm:$0xff] }
 0x1e0   :  { %3897 = vmatpush1.bf16.msra.mxu1 %v8720_v37  ;;  %v6914_v33 = vpack.c.bf16 %v8726_v2, %v8724_v23  ;;  %v8733_v37 = vld [vmem:[#allocation88_spill] sm:$0xff]  ;;  %v8738_v2 = vld [vmem:[#allocation118_spill] sm:$0xff] }
 0x1e1   :  { %4353 = vmatpush1.bf16.msra.mxu0 %v6894_v11  ;;  %3899 = vmatprep.subr.bf16.mxu1 %v8722_v31  ;;  %v8734_v11 = vld [vmem:[#allocation84_spill] sm:$0xff]  ;;  %v8736_v31 = vld [vmem:[#allocation95_spill] sm:$0xff]  ;;  %v8739_v23 = vand.u32 4294901760, %v8738_v2  ;;  %v8752_v2 = vld [vmem:[#allocation177_spill] sm:$0xff] }
 0x1e2   :  { %8727 = vst [vmem:[#allocation247_spill] sm:$0xff] %v6914_v33  ;;  %4355 = vmatprep.subr.bf16.mxu0 %v6901_v6  ;;  %v8735_v27 = vpack.c.bf16 %v8733_v37, %v8734_v11  ;;  %v8737_v0 = vpack.c.bf16 %v8480_v46, %v8736_v31  ;;  %v8741_v6 = vand.u32 4294901760, %v8740_v13  ;;  %v6941_v37 = vpack.c.bf16 %v8746_v58, %v8744_v39  ;;  %v8756_v13 = vld [vmem:[#allocation125_spill] sm:$0xff] }
 0x1e3   :  { %v8760_v39 = vand.u32 4294901760, %v8759_v57  ;;  %v8762_v58 = vand.u32 4294901760, %v8761_v59  ;;  %v8772_v57 = vld [vmem:[#allocation139_spill] sm:$0xff]  ;;  %v8774_v59 = vld [vmem:[#allocation140_spill] sm:$0xff] }
 0x1e4   :  { %3901 = vmatpush1.bf16.msra.mxu1 %v8735_v27  ;;  %v6934_v41 = vpack.c.bf16 %v8741_v6, %v8739_v23  ;;  %8747 = vst [vmem:[#allocation250_spill] sm:$0xff] %v6941_v37  ;;  %v8748_v27 = vld [vmem:[#allocation176_spill] sm:$0xff] }
 0x1e5   :  { %4357 = vmatpush1.bf16.msra.mxu0 %v6914_v33  ;;  %3903 = vmatprep.subr.bf16.mxu1 %v8737_v0  ;;  %v8749_v33 = vld [vmem:[#allocation175_spill] sm:$0xff]  ;;  %v8751_v0 = vld [vmem:[#allocation178_spill] sm:$0xff]  ;;  %v8754_v6 = vld [vmem:[#allocation124_spill] sm:$0xff] }
 0x1e6   :  { %8742 = vst [vmem:[#allocation249_spill] sm:$0xff] %v6934_v41  ;;  %4359 = vmatprep.subr.bf16.mxu0 %v6921_v49  ;;  %v8750_v11 = vpack.c.bf16 %v8748_v27, %v8749_v33  ;;  %v8753_v46 = vpack.c.bf16 %v8751_v0, %v8752_v2  ;;  %v8755_v23 = vand.u32 4294901760, %v8754_v6  ;;  %v8757_v49 = vand.u32 4294901760, %v8756_v13 }
 0x1e7   :  { %v6961_v27 = vpack.c.bf16 %v8762_v58, %v8760_v39  ;;  %v8773_v39 = vand.u32 4294901760, %v8772_v57  ;;  %v8775_v58 = vand.u32 4294901760, %v8774_v59  ;;  %v8785_v57 = vld [vmem:[#allocation150_spill] sm:$0xff]  ;;  %v8787_v59 = vld [vmem:[#allocation152_spill] sm:$0xff] }
 0x1e8   :  { %3905 = vmatpush1.bf16.msra.mxu1 %v8750_v11  ;;  %v6954_v31 = vpack.c.bf16 %v8757_v49, %v8755_v23  ;;  %v8764_v11 = vld [vmem:[#allocation181_spill] sm:$0xff]  ;;  %v8767_v49 = vld [vmem:[#allocation134_spill] sm:$0xff]  ;;  %v8769_v23 = vld [vmem:[#allocation136_spill] sm:$0xff] }
 0x1e9   :  { %4361 = vmatpush1.bf16.msra.mxu0 %v6934_v41  ;;  %3907 = vmatprep.subr.bf16.mxu1 %v8753_v46  ;;  %8763 = vst [vmem:[#allocation163_spill] sm:$0xff] %v6961_v27  ;;  %v8765_v41 = vpack.c.bf16 %v5984_v55, %v8764_v11  ;;  %v8766_v46 = vpack.c.bf16 %v5999_v43, %v5994_v38  ;;  %v8768_v6 = vand.u32 4294901760, %v8767_v49  ;;  %v8770_v13 = vand.u32 4294901760, %v8769_v23  ;;  %v8780_v49 = vld [vmem:[#allocation145_spill] sm:$0xff]  ;;  %v8782_v23 = vld [vmem:[#allocation147_spill] sm:$0xff] }
 0x1ea   :  { %8758 = vst [vmem:[#allocation251_spill] sm:$0xff] %v6954_v31  ;;  %4363 = vmatprep.subr.bf16.mxu0 %v6941_v37  ;;  %v6981_v55 = vpack.c.bf16 %v8775_v58, %v8773_v39  ;;  %v8786_v39 = vand.u32 4294901760, %v8785_v57  ;;  %v8788_v58 = vand.u32 4294901760, %v8787_v59  ;;  %v8800_v57 = vld [vmem:[#allocation160_spill] sm:$0xff]  ;;  %v8802_v59 = vld [vmem:[#allocation162_spill] sm:$0xff] }
 0x1eb   :  { %v6974_v37 = vpack.c.bf16 %v8770_v13, %v8768_v6  ;;  %v8781_v6 = vand.u32 4294901760, %v8780_v49  ;;  %v8783_v13 = vand.u32 4294901760, %v8782_v23  ;;  %v8793_v49 = vld [vmem:[#allocation189_spill] sm:$0xff] }
 0x1ec   :  { %3909 = vmatpush1.bf16.msra.mxu1 %v8765_v41  ;;  %8776 = vst [vmem:[#allocation252_spill] sm:$0xff] %v6981_v55  ;;  %v8777_v41 = vld [vmem:[#allocation183_spill] sm:$0xff] }
 0x1ed   :  { %4365 = vmatpush1.bf16.msra.mxu0 %v6954_v31  ;;  %3911 = vmatprep.subr.bf16.mxu1 %v8766_v46  ;;  %8771 = vst [vmem:[#allocation164_spill] sm:$0xff] %v6974_v37  ;;  %v8778_v31 = vpack.c.bf16 %v6009_v62, %v8777_v41  ;;  %v8779_v46 = vpack.c.bf16 %v6019_v60, %v6014_v9 }
 0x1ee   :  { %4367 = vmatprep.subr.bf16.mxu0 %v6961_v27  ;;  %v6994_v27 = vpack.c.bf16 %v8783_v13, %v8781_v6  ;;  %v7001_v62 = vpack.c.bf16 %v8788_v58, %v8786_v39  ;;  %v8795_v6 = vld [vmem:[#allocation155_spill] sm:$0xff]  ;;  %v8797_v13 = vld [vmem:[#allocation158_spill] sm:$0xff]  ;;  %v8801_v39 = vand.u32 4294901760, %v8800_v57  ;;  %v8803_v58 = vand.u32 4294901760, %v8802_v59 }
 0x1ef   :  { %v8796_v23 = vand.u32 4294901760, %v8795_v6  ;;  %v8813_v57 = vld [vmem:[#allocation170_spill] sm:$0xff] }
 0x1f0   :  { %3913 = vmatpush1.bf16.msra.mxu1 %v8778_v31  ;;  %8784 = vst [vmem:[#allocation253_spill] sm:$0xff] %v6994_v27  ;;  %8789 = vst [vmem:[#allocation254_spill] sm:$0xff] %v7001_v62  ;;  %v8790_v31 = vld [vmem:[#allocation187_spill] sm:$0xff]  ;;  %v8815_v59 = vld [vmem:[#allocation174_spill] sm:$0xff] }
 0x1f1   :  { %4369 = vmatpush1.bf16.msra.mxu0 %v6974_v37  ;;  %3915 = vmatprep.subr.bf16.mxu1 %v8779_v46  ;;  %v8791_v37 = vpack.c.bf16 %v6029_v24, %v8790_v31  ;;  %v8792_v46 = vld [vmem:[#allocation190_spill] sm:$0xff]  ;;  %v7021_v24 = vpack.c.bf16 %v8803_v58, %v8801_v39  ;;  %v8814_v39 = vand.u32 4294901760, %v8813_v57  ;;  %v8816_v58 = vand.u32 4294901760, %v8815_v59  ;;  %v8828_v57 = vld [vmem:[#allocation204_spill] sm:$0xff]  ;;  %v8830_v59 = vld [vmem:[#allocation205_spill] sm:$0xff] }
 0x1f2   :  { %4371 = vmatprep.subr.bf16.mxu0 %v6981_v55  ;;  %v8794_v60 = vpack.c.bf16 %v8792_v46, %v8793_v49  ;;  %v8798_v55 = vand.u32 4294901760, %v8797_v13  ;;  %v8810_v13 = vld [vmem:[#allocation168_spill] sm:$0xff] }
 0x1f3   :  { %8804 = vst [vmem:[#allocation212_spill] sm:$0xff] %v7021_v24 }
 0x1f4   :  { %3917 = vmatpush1.bf16.msra.mxu1 %v8791_v37  ;;  %v7014_v9 = vpack.c.bf16 %v8798_v55, %v8796_v23  ;;  %v8805_v37 = vpack.c.bf16 %v8525_v18, %v8524_v22  ;;  %v8808_v55 = vld [vmem:[#allocation165_spill] sm:$0xff]  ;;  %v7041_v18 = vpack.c.bf16 %v8816_v58, %v8814_v39  ;;  %v8829_v39 = vand.u32 4294901760, %v8828_v57 }
 0x1f5   :  { %4373 = vmatpush1.bf16.msra.mxu0 %v6994_v27  ;;  %3919 = vmatprep.subr.bf16.mxu1 %v8794_v60  ;;  %v8806_v60 = vld [vmem:[#allocation193_spill] sm:$0xff]  ;;  %v8809_v23 = vand.u32 4294901760, %v8808_v55  ;;  %v8821_v55 = vld [vmem:[#allocation199_spill] sm:$0xff]  ;;  %v8831_v58 = vand.u32 4294901760, %v8830_v59 }
 0x1f6   :  { %8799 = vst [vmem:[#allocation255_spill] sm:$0xff] %v7014_v9  ;;  %4375 = vmatprep.subr.bf16.mxu0 %v7001_v62  ;;  %v8807_v6 = vpack.c.bf16 %v8527_v34, %v8806_v60  ;;  %v8811_v62 = vand.u32 4294901760, %v8810_v13  ;;  %8817 = vst [vmem:[#allocation217_spill] sm:$0xff] %v7041_v18  ;;  %v8825_v13 = vld [vmem:[#allocation198_spill] sm:$0xff]  ;;  %v8842_v57 = vld [vmem:[#allocation29_spill] sm:$0xff] }
 0x1f7   :  { %v8844_v59 = vld [vmem:[#allocation33_spill] sm:$0xff] }
 0x1f8   :  { %3921 = vmatpush1.bf16.msra.mxu1 %v8805_v37  ;;  %v7034_v27 = vpack.c.bf16 %v8811_v62, %v8809_v23  ;;  %v8818_v37 = vld [vmem:[#allocation195_spill] sm:$0xff]  ;;  %v8823_v62 = vld [vmem:[#allocation197_spill] sm:$0xff] }
 0x1f9   :  { %4377 = vmatpush1.bf16.msra.mxu0 %v7014_v9  ;;  %3923 = vmatprep.subr.bf16.mxu1 %v8807_v6  ;;  %v8819_v9 = vpack.c.bf16 %v8529_v7, %v8818_v37  ;;  %v8820_v6 = vld [vmem:[#allocation200_spill] sm:$0xff]  ;;  %v8824_v23 = vand.u32 4294901760, %v8823_v62  ;;  %v7061_v7 = vpack.c.bf16 %v8831_v58, %v8829_v39  ;;  %v8843_v39 = vand.u32 4294901760, %v8842_v57 }
 0x1fa   :  { %8812 = vst [vmem:[#allocation207_spill] sm:$0xff] %v7034_v27  ;;  %4379 = vmatprep.subr.bf16.mxu0 %v7021_v24  ;;  %v8822_v34 = vpack.c.bf16 %v8820_v6, %v8821_v55  ;;  %v8826_v24 = vand.u32 4294901760, %v8825_v13  ;;  %v8839_v13 = vld [vmem:[#allocation215_spill] sm:$0xff]  ;;  %v8845_v58 = vand.u32 4294901760, %v8844_v59  ;;  %v8851_v57 = vld [vmem:[#allocation36_spill] sm:$0xff]  ;;  %v8853_v59 = vld [vmem:[#allocation37_spill] sm:$0xff] }
 0x1fb   :  { %8832 = vst [vmem:[#allocation19_spill] sm:$0xff] %v7061_v7 }
 0x1fc   :  { %3925 = vmatpush1.bf16.msra.mxu1 %v8819_v9  ;;  %v7054_v60 = vpack.c.bf16 %v8826_v24, %v8824_v23  ;;  %v8833_v9 = vld [vmem:[#allocation203_spill] sm:$0xff]  ;;  %v8837_v24 = vld [vmem:[#allocation209_spill] sm:$0xff] }
 0x1fd   :  { %4381 = vmatpush1.bf16.msra.mxu0 %v7034_v27  ;;  %3927 = vmatprep.subr.bf16.mxu1 %v8822_v34  ;;  %v8834_v27 = vpack.c.bf16 %v8498_v4, %v8833_v9  ;;  %v8835_v34 = vld [vmem:[#allocation211_spill] sm:$0xff]  ;;  %v8838_v23 = vand.u32 4294901760, %v8837_v24  ;;  %v4390_v4 = vpack.c.bf16 %v8845_v58, %v8843_v39  ;;  %v8854_v39 = vand.u32 4294901760, %v8853_v59 }
 0x1fe   :  { %8827 = vst [vmem:[#allocation18_spill] sm:$0xff] %v7054_v60  ;;  %4383 = vmatprep.subr.bf16.mxu0 %v7041_v18  ;;  %v8836_v62 = vpack.c.bf16 %v8503_v29, %v8835_v34  ;;  %v8840_v18 = vand.u32 4294901760, %v8839_v13  ;;  %v8849_v24 = vld [vmem:[#allocation35_spill] sm:$0xff] }
 0x200   :  { %3929 = vmatpush1.bf16.msra.mxu1 %v8834_v27  ;;  %v7074_v6 = vpack.c.bf16 %v8840_v18, %v8838_v23  ;;  %v8846_v27 = vpack.c.bf16 %v8508_v10, %v8506_v53  ;;  %v8848_v18 = vand.u32 4294901760, %v8534_v50  ;;  %v8850_v23 = vand.u32 4294901760, %v8849_v24 }
 0x201   :  { %4385 = vmatpush1.bf16.msra.mxu0 %v7054_v60  ;;  %3931 = vmatprep.subr.bf16.mxu1 %v8836_v62  ;;  %v8847_v62 = vpack.c.bf16 %v8509_v45, %v6177_v21  ;;  %v8856_v60 = vld [vmem:[#allocation225_spill] sm:$0xff]  ;;  %v8860_v45 = vld [vmem:[#allocation44_spill] sm:$0xff] }
 0x202   :  { %8841 = vst [vmem:[#allocation256_spill] sm:$0xff] %v7074_v6  ;;  %4387 = vmatprep.subr.bf16.mxu0 %v7061_v7  ;;  %v4392_v13 = vpack.c.bf16 %v8850_v23, %v8848_v18  ;;  %v8852_v7 = vand.u32 4294901760, %v8851_v57  ;;  %v8861_v24 = vand.u32 4294901760, %v8860_v45  ;;  %v8863_v23 = vld [vmem:[#allocation227_spill] sm:$0xff]  ;;  %v8874_v45 = vld [vmem:[#allocation60_spill] sm:$0xff] }
 0x204   :  { %3933 = vmatpush1.bf16.msra.mxu1 %v8846_v27  ;;  %v4394_v58 = vpack.c.bf16 %v8854_v39, %v8852_v7  ;;  %v8855_v27 = vld [vmem:[#allocation226_spill] sm:$0xff]  ;;  %v8865_v7 = vld [vmem:[#allocation47_spill] sm:$0xff] }
 0x205   :  { %4389 = vmatpush1.bf16.msra.mxu0 %v7074_v6  ;;  %3935 = vmatprep.subr.bf16.mxu1 %v8847_v62  ;;  %v8857_v6 = vpack.c.bf16 %v8855_v27, %v8856_v60  ;;  %v8858_v62 = vld [vmem:[#allocation42_spill] sm:$0xff]  ;;  %v8866_v59 = vand.u32 4294901760, %v8865_v7  ;;  %v8867_v39 = vld [vmem:[#allocation51_spill] sm:$0xff]  ;;  %v8879_v7 = vld [vmem:[#allocation68_spill] sm:$0xff] }
 0x206   :  { %4391 = vmatprep.subr.bf16.mxu0 %v4390_v4  ;;  %v8859_v50 = vand.u32 4294901760, %v8858_v62  ;;  %v8862_v4 = vld [vmem:[#allocation229_spill] sm:$0xff]  ;;  %v8868_v21 = vand.u32 4294901760, %v8867_v39  ;;  %v8869_v27 = vld [vmem:[#allocation54_spill] sm:$0xff]  ;;  %v8871_v60 = vld [vmem:[#allocation231_spill] sm:$0xff]  ;;  %v8880_v39 = vand.u32 4294901760, %v8879_v7 }
 0x207   :  { %v8864_v57 = vpack.c.bf16 %v8862_v4, %v8863_v23  ;;  %v8873_v62 = vld [vmem:[#allocation53_spill] sm:$0xff] }
 0x208   :  { %3216 = vmatmul.mubr.f32.vlgmr.msra.gmra.mrb[4].mxu0 %v6624_v19  ;;  %3937 = vmatpush1.bf16.msra.mxu1 %v8857_v6  ;;  %v4396_v18 = vpack.c.bf16 %v8861_v24, %v8859_v50  ;;  %v4398_v10 = vpack.c.bf16 %v8868_v21, %v8866_v59  ;;  %v8870_v6 = vld [vmem:[#allocation232_spill] sm:$0xff]  ;;  %v8875_v50 = vand.u32 4294901760, %v8874_v45  ;;  %v8876_v24 = vld [vmem:[#allocation61_spill] sm:$0xff]  ;;  %v8885_v45 = vld [vmem:[#allocation71_spill] sm:$0xff] }
 0x209   :  { %3224 = vmatprep.mubr.f32.mxu0 %v6662_v61  ;;  %4393 = vmatpush1.bf16.msra.mxu0 %v4392_v13  ;;  %v8872_v13 = vpack.c.bf16 %v8870_v6, %v8871_v60  ;;  %v8877_v4 = vand.u32 4294901760, %v8876_v24  ;;  %v8881_v21 = vld [vmem:[#allocation69_spill] sm:$0xff]  ;;  %v8886_v24 = vand.u32 4294901760, %v8885_v45  ;;  %v8891_v6 = vld [vmem:[#allocation76_spill] sm:$0xff] }
 0x20a   :  { %3939 = vmatprep.subr.bf16.mxu1 %v8864_v57  ;;  %4395 = vmatprep.subr.bf16.mxu0 %v4394_v58  ;;  %v8878_v58 = vld [vmem:[#allocation12_spill] sm:$0xff]  ;;  %v8882_v59 = vand.u32 4294901760, %v8881_v21  ;;  %v8892_v21 = vand.u32 4294901760, %v8891_v6 }
 0x20b   :  { %v4400_v57 = vpack.c.bf16 %v8877_v4, %v8875_v50  ;;  %v8887_v4 = vld [vmem:[#allocation74_spill] sm:$0xff]  ;;  %v8897_v45 = vld [vmem:[#allocation92_spill] sm:$0xff] }
 0x20c   :  { %3228 = vmatmul.mubr.f32.gmra.mrb[6].mxu0 %v8869_v27  ;;  %3941 = vmatpush1.bf16.msra.mxu1 %v8872_v13  ;;  %v4402_v23 = vpack.c.bf16 %v8882_v59, %v8880_v39  ;;  %v8884_v13 = vld [vmem:[#allocation24_spill] sm:$0xff]  ;;  %v8888_v50 = vand.u32 4294901760, %v8887_v4  ;;  %v8898_v4 = vand.u32 4294901760, %v8897_v45 }
 0x20d   :  { %4397 = vmatpush1.bf16.msra.mxu0 %v4396_v18  ;;  %3491 = vmatprep.mubr.f32.mxu0 %v8873_v62  ;;  %v8883_v18 = vld [vmem:[#allocation15_spill] sm:$0xff] }
 0x20e   :  { %3943 = vmatprep.subr.bf16.mxu1 %v8878_v58  ;;  %4399 = vmatprep.subr.bf16.mxu0 %v4398_v10  ;;  %v4404_v58 = vpack.c.bf16 %v8888_v50, %v8886_v24  ;;  %v8889_v10 = vld [vmem:[#allocation75_spill] sm:$0xff] }
 0x20f   :  { %1719 = vmatmul.mubr.f32.vlgmr.msra.gmra.mrb[0].mxu1 %v6612_v44  ;;  %v8890_v7 = vand.u32 4294901760, %v8889_v10  ;;  %v8893_v44 = vld [vmem:[#allocation31_spill] sm:$0xff]  ;;  %v8901_v10 = vld [vmem:[#allocation94_spill] sm:$0xff] }
 0x210   :  { %1726 = vmatprep.mubr.f32.mxu1 %v6648_v63  ;;  %3945 = vmatpush1.bf16.msra.mxu1 %v8883_v18  ;;  %v8894_v63 = vld [vmem:[#allocation40_spill] sm:$0xff]  ;;  %v8902_v6 = vand.u32 4294901760, %v8901_v10  ;;  %v8915_v10 = vld [vmem:[#allocation110_spill] sm:$0xff] }
 0x211   :  { %4401 = vmatpush1.bf16.msra.mxu0 %v4400_v57  ;;  %3947 = vmatprep.subr.bf16.mxu1 %v8884_v13  ;;  %v4406_v39 = vpack.c.bf16 %v8892_v21, %v8890_v7  ;;  %v8895_v57 = vld [vmem:[#allocation89_spill] sm:$0xff] }
 0x212   :  { %4403 = vmatprep.subr.bf16.mxu0 %v4402_v23  ;;  %v8896_v59 = vand.u32 4294901760, %v8895_v57  ;;  %v8899_v23 = vld [vmem:[#allocation93_spill] sm:$0xff]  ;;  %v8909_v57 = vld [vmem:[#allocation104_spill] sm:$0xff] }
 0x213   :  { %1729 = vmatmul.mubr.f32.gmra.mrb[2].mxu1 %v6640_v15  ;;  %v8900_v50 = vand.u32 4294901760, %v8899_v23  ;;  %v8903_v21 = vld [vmem:[#allocation45_spill] sm:$0xff]  ;;  %v8904_v15 = vld [vmem:[#allocation52_spill] sm:$0xff]  ;;  %v8910_v45 = vand.u32 4294901760, %v8909_v57 }
 0x214   :  { %3949 = vmatpush1.bf16.msra.mxu1 %v8893_v44  ;;  %1866 = vmatprep.mubr.f32.mxu1 %v6633_v35  ;;  %v4408_v24 = vpack.c.bf16 %v8898_v4, %v8896_v59  ;;  %v8905_v35 = vld [vmem:[#allocation100_spill] sm:$0xff]  ;;  %v8907_v44 = vld [vmem:[#allocation103_spill] sm:$0xff]  ;;  %v8911_v59 = vld [vmem:[#allocation105_spill] sm:$0xff] }
 0x215   :  { %4405 = vmatpush1.bf16.msra.mxu0 %v4404_v58  ;;  %3951 = vmatprep.subr.bf16.mxu1 %v8894_v63  ;;  %v4410_v7 = vpack.c.bf16 %v8902_v6, %v8900_v50  ;;  %v8906_v58 = vand.u32 4294901760, %v8905_v35  ;;  %v8908_v63 = vand.u32 4294901760, %v8907_v44  ;;  %v8913_v23 = vld [vmem:[#allocation57_spill] sm:$0xff]  ;;  %v8914_v50 = vld [vmem:[#allocation66_spill] sm:$0xff]  ;;  %v8917_v6 = vld [vmem:[#allocation111_spill] sm:$0xff] }
 0x216   :  { %4407 = vmatprep.subr.bf16.mxu0 %v4406_v39  ;;  %v8912_v39 = vand.u32 4294901760, %v8911_v59  ;;  %v8919_v35 = vld [vmem:[#allocation112_spill] sm:$0xff]  ;;  %v8925_v59 = vld [vmem:[#allocation114_spill] sm:$0xff] }
 0x217   :  { %v4412_v13 = vpack.c.bf16 %v8908_v63, %v8906_v58  ;;  %v8920_v44 = vand.u32 4294901760, %v8919_v35  ;;  %v8921_v63 = vld [vmem:[#allocation113_spill] sm:$0xff]  ;;  %v8923_v57 = vld [vmem:[#allocation72_spill] sm:$0xff]  ;;  %v8933_v35 = vld [vmem:[#allocation87_spill] sm:$0xff] }
 0x218   :  { %3953 = vmatpush1.bf16.msra.mxu1 %v8903_v21  ;;  %v4414_v4 = vpack.c.bf16 %v8912_v39, %v8910_v45  ;;  %v8924_v45 = vld [vmem:[#allocation82_spill] sm:$0xff]  ;;  %v8927_v39 = vld [vmem:[#allocation115_spill] sm:$0xff] }
 0x219   :  { %4409 = vmatpush1.bf16.msra.mxu0 %v4408_v24  ;;  %3955 = vmatprep.subr.bf16.mxu1 %v8904_v15  ;;  %v8916_v24 = vand.u32 4294901760, %v8915_v10  ;;  %v8918_v15 = vand.u32 4294901760, %v8917_v6  ;;  %v8929_v10 = vld [vmem:[#allocation116_spill] sm:$0xff] }
 0x21a   :  { %4411 = vmatprep.subr.bf16.mxu0 %v4410_v7  ;;  %v8922_v7 = vand.u32 4294901760, %v8921_v63  ;;  %v8930_v6 = vand.u32 4294901760, %v8929_v10  ;;  %v8935_v63 = vld [vmem:[#allocation120_spill] sm:$0xff] }
 0x21b   :  { %v4416_v21 = vpack.c.bf16 %v8918_v15, %v8916_v24  ;;  %v8931_v15 = vld [vmem:[#allocation117_spill] sm:$0xff]  ;;  %v8943_v10 = vld [vmem:[#allocation132_spill] sm:$0xff] }
 0x21c   :  { %3957 = vmatpush1.bf16.msra.mxu1 %v8913_v23  ;;  %v4418_v58 = vpack.c.bf16 %v8922_v7, %v8920_v44  ;;  %v8934_v44 = vld [vmem:[#allocation96_spill] sm:$0xff]  ;;  %v8937_v7 = vld [vmem:[#allocation121_spill] sm:$0xff] }
 0x21d   :  { %4413 = vmatpush1.bf16.msra.mxu0 %v4412_v13  ;;  %3959 = vmatprep.subr.bf16.mxu1 %v8914_v50  ;;  %v8926_v13 = vand.u32 4294901760, %v8925_v59  ;;  %v8928_v50 = vand.u32 4294901760, %v8927_v39  ;;  %v8939_v59 = vld [vmem:[#allocation126_spill] sm:$0xff] }
 0x21e   :  { %4415 = vmatprep.subr.bf16.mxu0 %v4414_v4  ;;  %v8932_v4 = vand.u32 4294901760, %v8931_v15  ;;  %v8940_v39 = vand.u32 4294901760, %v8939_v59  ;;  %v8945_v15 = vld [vmem:[#allocation128_spill] sm:$0xff]  ;;  %v8953_v59 = vld [vmem:[#allocation137_spill] sm:$0xff] }
 0x21f   :  { %v4420_v23 = vpack.c.bf16 %v8928_v50, %v8926_v13  ;;  %v8941_v50 = vld [vmem:[#allocation127_spill] sm:$0xff] }
 0x220   :  { %3961 = vmatpush1.bf16.msra.mxu1 %v8923_v57  ;;  %v4422_v24 = vpack.c.bf16 %v8932_v4, %v8930_v6  ;;  %v8944_v6 = vld [vmem:[#allocation135_spill] sm:$0xff]  ;;  %v8947_v4 = vld [vmem:[#allocation129_spill] sm:$0xff] }
 0x221   :  { %4417 = vmatpush1.bf16.msra.mxu0 %v4416_v21  ;;  %3963 = vmatprep.subr.bf16.mxu1 %v8924_v45  ;;  %v8936_v21 = vand.u32 4294901760, %v8935_v63  ;;  %v8938_v45 = vand.u32 4294901760, %v8937_v7  ;;  %v8949_v63 = vld [vmem:[#allocation133_spill] sm:$0xff] }
 0x222   :  { %4419 = vmatprep.subr.bf16.mxu0 %v4418_v58  ;;  %v8942_v58 = vand.u32 4294901760, %v8941_v50  ;;  %v8950_v7 = vand.u32 4294901760, %v8949_v63  ;;  %v8955_v50 = vld [vmem:[#allocation142_spill] sm:$0xff]  ;;  %v8963_v63 = vld [vmem:[#allocation143_spill] sm:$0xff] }
 0x223   :  { %v4424_v57 = vpack.c.bf16 %v8938_v45, %v8936_v21  ;;  %v8951_v45 = vld [vmem:[#allocation138_spill] sm:$0xff] }
 0x224   :  { %3965 = vmatpush1.bf16.msra.mxu1 %v8933_v35  ;;  %v4426_v13 = vpack.c.bf16 %v8942_v58, %v8940_v39  ;;  %v8954_v39 = vld [vmem:[#allocation141_spill] sm:$0xff]  ;;  %v8957_v58 = vld [vmem:[#allocation144_spill] sm:$0xff] }
 0x225   :  { %4421 = vmatpush1.bf16.msra.mxu0 %v4420_v23  ;;  %3967 = vmatprep.subr.bf16.mxu1 %v8934_v44  ;;  %v8946_v23 = vand.u32 4294901760, %v8945_v15  ;;  %v8948_v44 = vand.u32 4294901760, %v8947_v4  ;;  %v8959_v15 = vld [vmem:[#allocation146_spill] sm:$0xff] }
 0x226   :  { %4423 = vmatprep.subr.bf16.mxu0 %v4422_v24  ;;  %v8952_v24 = vand.u32 4294901760, %v8951_v45  ;;  %v8960_v4 = vand.u32 4294901760, %v8959_v15  ;;  %v8965_v45 = vld [vmem:[#allocation153_spill] sm:$0xff]  ;;  %v8973_v15 = vld [vmem:[#allocation151_spill] sm:$0xff] }
 0x227   :  { %v4428_v35 = vpack.c.bf16 %v8948_v44, %v8946_v23  ;;  %v8961_v44 = vld [vmem:[#allocation149_spill] sm:$0xff] }
 0x228   :  { %3969 = vmatpush1.bf16.msra.mxu1 %v8943_v10  ;;  %v4430_v21 = vpack.c.bf16 %v8952_v24, %v8950_v7  ;;  %v8964_v7 = vld [vmem:[#allocation148_spill] sm:$0xff]  ;;  %v8967_v24 = vld [vmem:[#allocation154_spill] sm:$0xff] }
 0x229   :  { %4425 = vmatpush1.bf16.msra.mxu0 %v4424_v57  ;;  %3971 = vmatprep.subr.bf16.mxu1 %v8944_v6  ;;  %v8956_v57 = vand.u32 4294901760, %v8955_v50  ;;  %v8958_v6 = vand.u32 4294901760, %v8957_v58  ;;  %v8969_v50 = vld [vmem:[#allocation157_spill] sm:$0xff] }
 0x22a   :  { %4427 = vmatprep.subr.bf16.mxu0 %v4426_v13  ;;  %v8962_v13 = vand.u32 4294901760, %v8961_v44  ;;  %v8970_v58 = vand.u32 4294901760, %v8969_v50  ;;  %v8976_v44 = vand.u32 4294901760, %v8607_v14  ;;  %v8981_v50 = vld [vmem:[#allocation161_spill] sm:$0xff] }
 0x22b   :  { %v4432_v10 = vpack.c.bf16 %v8958_v6, %v8956_v57  ;;  %v8971_v6 = vld [vmem:[#allocation159_spill] sm:$0xff] }
 0x22c   :  { %3973 = vmatpush1.bf16.msra.mxu1 %v8953_v59  ;;  %v4434_v23 = vpack.c.bf16 %v8962_v13, %v8960_v4  ;;  %v8974_v4 = vld [vmem:[#allocation156_spill] sm:$0xff] }
 0x22d   :  { %4429 = vmatpush1.bf16.msra.mxu0 %v4428_v35  ;;  %3975 = vmatprep.subr.bf16.mxu1 %v8954_v39  ;;  %v8966_v35 = vand.u32 4294901760, %v8965_v45  ;;  %v8968_v39 = vand.u32 4294901760, %v8967_v24  ;;  %v8977_v45 = vld [vmem:[#allocation167_spill] sm:$0xff] }
 0x22e   :  { %4431 = vmatprep.subr.bf16.mxu0 %v4430_v21  ;;  %v8972_v21 = vand.u32 4294901760, %v8971_v6  ;;  %v8978_v24 = vand.u32 4294901760, %v8977_v45  ;;  %v8983_v6 = vld [vmem:[#allocation172_spill] sm:$0xff]  ;;  %v8991_v45 = vld [vmem:[#allocation171_spill] sm:$0xff] }
 0x22f   :  { %v4436_v59 = vpack.c.bf16 %v8968_v39, %v8966_v35  ;;  %v8979_v39 = vld [vmem:[#allocation169_spill] sm:$0xff] }
 0x230   :  { %3977 = vmatpush1.bf16.msra.mxu1 %v8963_v63  ;;  %v4438_v57 = vpack.c.bf16 %v8972_v21, %v8970_v58  ;;  %v8982_v58 = vld [vmem:[#allocation166_spill] sm:$0xff]  ;;  %v8985_v21 = vld [vmem:[#allocation173_spill] sm:$0xff] }
 0x231   :  { %4433 = vmatpush1.bf16.msra.mxu0 %v4432_v10  ;;  %3979 = vmatprep.subr.bf16.mxu1 %v8964_v7  ;;  %v8975_v10 = vand.u32 4294901760, %v8606_v51  ;;  %v8987_v51 = vld [vmem:[#allocation180_spill] sm:$0xff] }
 0x232   :  { %4435 = vmatprep.subr.bf16.mxu0 %v4434_v23  ;;  %v8980_v23 = vand.u32 4294901760, %v8979_v39  ;;  %v8988_v14 = vand.u32 4294901760, %v8987_v51  ;;  %v8994_v39 = vld [vmem:[#allocation208_spill] sm:$0xff]  ;;  %v9000_v51 = vld [vmem:[#allocation202_spill] sm:$0xff] }
 0x233   :  { %v4440_v13 = vpack.c.bf16 %v8976_v44, %v8975_v10  ;;  %v8989_v10 = vld [vmem:[#allocation201_spill] sm:$0xff] }
 0x234   :  { %3981 = vmatpush1.bf16.msra.mxu1 %v8973_v15  ;;  %v4442_v35 = vpack.c.bf16 %v8980_v23, %v8978_v24  ;;  %v8992_v24 = vld [vmem:[#allocation179_spill] sm:$0xff]  ;;  %v8995_v23 = vand.u32 4294901760, %v8994_v39  ;;  %v9010_v39 = vld [vmem:[#allocation14_spill] sm:$0xff] }
 0x235   :  { %4437 = vmatpush1.bf16.msra.mxu0 %v4436_v59  ;;  %3983 = vmatprep.subr.bf16.mxu1 %v8974_v4  ;;  %v8984_v59 = vand.u32 4294901760, %v8983_v6  ;;  %v8986_v4 = vand.u32 4294901760, %v8985_v21  ;;  %v8996_v6 = vld [vmem:[#allocation213_spill] sm:$0xff] }
 0x236   :  { %4439 = vmatprep.subr.bf16.mxu0 %v4438_v57  ;;  %v8990_v57 = vand.u32 4294901760, %v8989_v10  ;;  %v8997_v21 = vand.u32 4294901760, %v8996_v6  ;;  %v9003_v10 = vand.u32 4294901760, %v8631_v52  ;;  %v9008_v52 = vld [vmem:[#allocation13_spill] sm:$0xff] }
 0x237   :  { %v4444_v15 = vpack.c.bf16 %v8986_v4, %v8984_v59  ;;  %v8998_v4 = vld [vmem:[#allocation214_spill] sm:$0xff] }
 0x238   :  { %3985 = vmatpush1.bf16.msra.mxu1 %v8981_v50  ;;  %v4446_v44 = vpack.c.bf16 %v8990_v57, %v8988_v14  ;;  %v9001_v14 = vld [vmem:[#allocation210_spill] sm:$0xff] }
 0x239   :  { %4441 = vmatpush1.bf16.msra.mxu0 %v4440_v13  ;;  %3987 = vmatprep.subr.bf16.mxu1 %v8982_v58  ;;  %v8993_v13 = vand.u32 4294901760, %v8620_v3  ;;  %v9004_v3 = vld [vmem:[#allocation216_spill] sm:$0xff] }
 0x23a   :  { %4443 = vmatprep.subr.bf16.mxu0 %v4442_v35  ;;  %v8999_v35 = vand.u32 4294901760, %v8998_v4  ;;  %v9013_v4 = vand.u32 4294901760, %v8664_v5  ;;  %v9020_v5 = vld [vmem:[#allocation28_spill] sm:$0xff] }
 0x23b   :  { %v4448_v58 = vpack.c.bf16 %v8995_v23, %v8993_v13  ;;  %v9006_v13 = vld [vmem:[#allocation224_spill] sm:$0xff]  ;;  %v9011_v23 = vand.u32 4294901760, %v9010_v39  ;;  %v9021_v39 = vand.u32 4294901760, %v9020_v5  ;;  %v9031_v5 = vld [vmem:[#allocation239_spill] sm:$0xff] }
 0x23c   :  { %3989 = vmatpush1.bf16.msra.mxu1 %v8991_v45  ;;  %v4450_v59 = vpack.c.bf16 %v8999_v35, %v8997_v21  ;;  %v9012_v21 = vld [vmem:[#allocation230_spill] sm:$0xff]  ;;  %v9014_v35 = vld [vmem:[#allocation17_spill] sm:$0xff] }
 0x23d   :  { %4445 = vmatpush1.bf16.msra.mxu0 %v4444_v15  ;;  %3991 = vmatprep.subr.bf16.mxu1 %v8992_v24  ;;  %v9002_v15 = vand.u32 4294901760, %v8632_v32  ;;  %v9007_v32 = vld [vmem:[#allocation228_spill] sm:$0xff] }
 0x23e   :  { %4447 = vmatprep.subr.bf16.mxu0 %v4446_v44  ;;  %v9005_v44 = vld [vmem:[#allocation221_spill] sm:$0xff] }
 0x23f   :  { %v4452_v57 = vpack.c.bf16 %v9003_v10, %v9002_v15  ;;  %v9016_v10 = vld [vmem:[#allocation235_spill] sm:$0xff] }
 0x240   :  { %3993 = vmatpush1.bf16.msra.mxu1 %v9000_v51 }
 0x241   :  { %4449 = vmatpush1.bf16.msra.mxu0 %v4448_v58  ;;  %3995 = vmatprep.subr.bf16.mxu1 %v9001_v14  ;;  %v9009_v58 = vand.u32 4294901760, %v9008_v52  ;;  %v9018_v52 = vand.u32 4294901760, %v8666_v56  ;;  %v9026_v56 = vand.u32 4294901760, %v8681_v26  ;;  %v9033_v26 = vand.u32 4294901760, %v8513_v42  ;;  %v9042_v42 = vld [vmem:[#allocation70_spill] sm:$0xff] }
 0x242   :  { %4451 = vmatprep.subr.bf16.mxu0 %v4450_v59  ;;  %v9015_v59 = vand.u32 4294901760, %v9014_v35 }
 0x243   :  { %v4006_v6 = vpack.c.bf16 %v9011_v23, %v9009_v58  ;;  %v9019_v58 = vld [vmem:[#allocation236_spill] sm:$0xff] }
 0x244   :  { %3997 = vmatpush1.bf16.msra.mxu1 %v9004_v3  ;;  %v4008_v15 = vpack.c.bf16 %v9015_v59, %v9013_v4  ;;  %v9022_v23 = vld [vmem:[#allocation32_spill] sm:$0xff]  ;;  %v9024_v59 = vld [vmem:[#allocation237_spill] sm:$0xff] }
 0x245   :  { %4453 = vmatpush1.bf16.msra.mxu0 %v4452_v57  ;;  %3999 = vmatprep.subr.bf16.mxu1 %v9005_v44  ;;  %v9017_v57 = vand.u32 4294901760, %v8667_v36  ;;  %v9023_v4 = vand.u32 4294901760, %v9022_v23  ;;  %v9025_v36 = vand.u32 4294901760, %v8682_v1  ;;  %v9036_v23 = vld [vmem:[#allocation58_spill] sm:$0xff] }
 0x246   :  { %4455 = vmatprep.subr.bf16.mxu0 %v6761_v54 }
 0x247   :  { %v4012_v35 = vpack.c.bf16 %v9023_v4, %v9021_v39  ;;  %v9034_v39 = vld [vmem:[#allocation240_spill] sm:$0xff]  ;;  %v9037_v4 = vand.u32 4294901760, %v9036_v23 }
 0x248   :  { %3493 = vmatmul.mubr.f32.vlgmr.msra.gmra.mrb[4].mxu0 %v6603_v40  ;;  %4001 = vmatpush1.bf16.msra.mxu1 %v9006_v13 }
 0x249   :  { %3499 = vmatprep.mubr.f32.mxu0 %v6628_v16  ;;  %4457 = vmatpush1.bf16.msra.mxu0 %v6773_v20 }
 0x24a   :  { %4003 = vmatprep.subr.bf16.mxu1 %v9007_v32  ;;  %4459 = vmatprep.subr.bf16.mxu0 %v6779_v25  ;;  %v4010_v25 = vpack.c.bf16 %v9018_v52, %v9017_v57  ;;  %v9027_v57 = vld [vmem:[#allocation238_spill] sm:$0xff] }
 0x24c   :  { %3501 = vmatmul.mubr.f32.gmra.mrb[6].mxu0 %v6620_v12  ;;  %4005 = vmatpush1.bf16.msra.mxu1 %v9012_v21 }
 0x24d   :  { %4461 = vmatpush1.bf16.msra.mxu0 %v9016_v10  ;;  %3636 = vmatprep.mubr.f32.mxu0 %v8873_v62 }
 0x24e   :  { %4007 = vmatprep.subr.bf16.mxu1 %v4006_v6  ;;  %4463 = vmatprep.subr.bf16.mxu0 %v9019_v58  ;;  %v4014_v6 = vpack.c.bf16 %v9026_v56, %v9025_v36  ;;  %v9039_v36 = vand.u32 4294901760, %v8708_v48  ;;  %v9040_v56 = vand.u32 4294901760, %v8518_v30  ;;  %v9050_v48 = vld [vmem:[#allocation244_spill] sm:$0xff] }
 0x24f   :  { %1870 = vmatmul.mubr.f32.vlgmr.msra.gmra.mrb[0].mxu1 %v6624_v19  ;;  %v9029_v19 = vld [vmem:[#allocation46_spill] sm:$0xff]  ;;  %v9051_v30 = vld [vmem:[#allocation84_spill] sm:$0xff] }
 0x250   :  { %1878 = vmatprep.mubr.f32.mxu1 %v6662_v61  ;;  %4009 = vmatpush1.bf16.msra.mxu1 %v4008_v15  ;;  %v9028_v61 = vand.u32 4294901760, %v5078_v28  ;;  %v9030_v15 = vand.u32 4294901760, %v9029_v19  ;;  %v9038_v28 = vld [vmem:[#allocation241_spill] sm:$0xff]  ;;  %v9052_v23 = vand.u32 4294901760, %v9051_v30  ;;  %v9064_v30 = vld [vmem:[#allocation247_spill] sm:$0xff] }
 0x251   :  { %4465 = vmatpush1.bf16.msra.mxu0 %v9024_v59  ;;  %4011 = vmatprep.subr.bf16.mxu1 %v4010_v25  ;;  %v9032_v25 = vand.u32 4294901760, %v8695_v47  ;;  %v9041_v47 = vld [vmem:[#allocation242_spill] sm:$0xff]  ;;  %v9044_v19 = vld [vmem:[#allocation73_spill] sm:$0xff] }
 0x252   :  { %4467 = vmatprep.subr.bf16.mxu0 %v9027_v57  ;;  %v4016_v52 = vpack.c.bf16 %v9030_v15, %v9028_v61  ;;  %v9043_v61 = vand.u32 4294901760, %v9042_v42  ;;  %v9045_v15 = vand.u32 4294901760, %v9044_v19  ;;  %v9056_v42 = vld [vmem:[#allocation95_spill] sm:$0xff]  ;;  %v9058_v19 = vld [vmem:[#allocation97_spill] sm:$0xff] }
 0x253   :  { %1882 = vmatmul.mubr.f32.gmra.mrb[2].mxu1 %v8869_v27  ;;  %v4018_v1 = vpack.c.bf16 %v9033_v26, %v9032_v25  ;;  %v9035_v27 = vand.u32 4294901760, %v8515_v17  ;;  %v9046_v17 = vld [vmem:[#allocation243_spill] sm:$0xff]  ;;  %v9047_v25 = vand.u32 4294901760, %v8721_v8  ;;  %v9060_v8 = vld [vmem:[#allocation246_spill] sm:$0xff] }
 0x254   :  { %4013 = vmatpush1.bf16.msra.mxu1 %v4012_v35  ;;  %2145 = vmatprep.mubr.f32.mxu1 %v8873_v62  ;;  %v9048_v26 = vld [vmem:[#allocation83_spill] sm:$0xff] }
 0x255   :  { %4469 = vmatpush1.bf16.msra.mxu0 %v9031_v5  ;;  %4015 = vmatprep.subr.bf16.mxu1 %v4014_v6  ;;  %v4020_v35 = vpack.c.bf16 %v9037_v4, %v9035_v27  ;;  %v4022_v6 = vpack.c.bf16 %v9040_v56, %v9039_v36  ;;  %v9053_v4 = vld [vmem:[#allocation88_spill] sm:$0xff]  ;;  %v9055_v56 = vld [vmem:[#allocation245_spill] sm:$0xff] }
 0x256   :  { %4471 = vmatprep.subr.bf16.mxu0 %v9034_v39 }
 0x258   :  { %4017 = vmatpush1.bf16.msra.mxu1 %v4016_v52  ;;  %v4024_v52 = vpack.c.bf16 %v9045_v15, %v9043_v61  ;;  %v9057_v61 = vand.u32 4294901760, %v9056_v42  ;;  %v9068_v42 = vand.u32 4294901760, %v8764_v11  ;;  %v9078_v11 = vld [vmem:[#allocation251_spill] sm:$0xff] }
 0x259   :  { %4473 = vmatpush1.bf16.msra.mxu0 %v9038_v28  ;;  %4019 = vmatprep.subr.bf16.mxu1 %v4018_v1  ;;  %v9049_v1 = vand.u32 4294901760, %v9048_v26  ;;  %v9062_v26 = vld [vmem:[#allocation176_spill] sm:$0xff] }
 0x25a   :  { %4475 = vmatprep.subr.bf16.mxu0 %v9041_v47 }
 0x25b   :  { %v4026_v27 = vpack.c.bf16 %v9049_v1, %v9047_v25  ;;  %v9061_v25 = vand.u32 4294901760, %v8749_v33  ;;  %v9071_v33 = vld [vmem:[#allocation249_spill] sm:$0xff] }
 0x25c   :  { %4021 = vmatpush1.bf16.msra.mxu1 %v4020_v35  ;;  %v9054_v35 = vand.u32 4294901760, %v9053_v4 }
 0x25d   :  { %4477 = vmatpush1.bf16.msra.mxu0 %v9046_v17  ;;  %4023 = vmatprep.subr.bf16.mxu1 %v4022_v6  ;;  %v9059_v6 = vand.u32 4294901760, %v9058_v19 }
 0x25e   :  { %4479 = vmatprep.subr.bf16.mxu0 %v9050_v48  ;;  %v4028_v36 = vpack.c.bf16 %v9054_v35, %v9052_v23  ;;  %v9065_v23 = vand.u32 4294901760, %v8752_v2  ;;  %v9067_v35 = vld [vmem:[#allocation248_spill] sm:$0xff]  ;;  %v9074_v2 = vld [vmem:[#allocation250_spill] sm:$0xff] }
 0x25f   :  { %v4030_v15 = vpack.c.bf16 %v9059_v6, %v9057_v61  ;;  %v9069_v61 = vld [vmem:[#allocation182_spill] sm:$0xff]  ;;  %v9072_v6 = vand.u32 4294901760, %v5994_v38  ;;  %v9083_v38 = vld [vmem:[#allocation163_spill] sm:$0xff] }
 0x260   :  { %4025 = vmatpush1.bf16.msra.mxu1 %v4024_v52  ;;  %v9063_v52 = vand.u32 4294901760, %v9062_v26  ;;  %v9076_v26 = vld [vmem:[#allocation184_spill] sm:$0xff] }
 0x261   :  { %4481 = vmatpush1.bf16.msra.mxu0 %v9055_v56  ;;  %4027 = vmatprep.subr.bf16.mxu1 %v4026_v27  ;;  %v9066_v27 = vand.u32 4294901760, %v8751_v0  ;;  %v9075_v0 = vand.u32 4294901760, %v8777_v41  ;;  %v9087_v41 = vld [vmem:[#allocation164_spill] sm:$0xff] }
 0x262   :  { %4483 = vmatprep.subr.bf16.mxu0 %v9060_v8  ;;  %v4032_v1 = vpack.c.bf16 %v9063_v52, %v9061_v25  ;;  %v9077_v52 = vand.u32 4294901760, %v9076_v26  ;;  %v9090_v26 = vld [vmem:[#allocation252_spill] sm:$0xff] }
 0x263   :  { %v4034_v4 = vpack.c.bf16 %v9066_v27, %v9065_v23  ;;  %v9079_v23 = vld [vmem:[#allocation185_spill] sm:$0xff] }
 0x264   :  { %4029 = vmatpush1.bf16.msra.mxu1 %v4028_v36  ;;  %v9070_v36 = vand.u32 4294901760, %v9069_v61  ;;  %v9080_v27 = vand.u32 4294901760, %v9079_v23  ;;  %v9092_v23 = vld [vmem:[#allocation192_spill] sm:$0xff] }
 0x265   :  { %4485 = vmatpush1.bf16.msra.mxu0 %v9064_v30  ;;  %4031 = vmatprep.subr.bf16.mxu1 %v4030_v15  ;;  %v9073_v15 = vand.u32 4294901760, %v5999_v43  ;;  %v9084_v43 = vand.u32 4294901760, %v8790_v31  ;;  %v9094_v31 = vld [vmem:[#allocation253_spill] sm:$0xff] }
 0x266   :  { %4487 = vmatprep.subr.bf16.mxu0 %v9067_v35  ;;  %v4036_v19 = vpack.c.bf16 %v9070_v36, %v9068_v42  ;;  %v9081_v42 = vld [vmem:[#allocation186_spill] sm:$0xff]  ;;  %v9085_v36 = vld [vmem:[#allocation188_spill] sm:$0xff] }
 0x267   :  { %v4038_v25 = vpack.c.bf16 %v9073_v15, %v9072_v6  ;;  %v9088_v15 = vand.u32 4294901760, %v8793_v49  ;;  %v9099_v49 = vld [vmem:[#allocation254_spill] sm:$0xff] }
 0x268   :  { %4033 = vmatpush1.bf16.msra.mxu1 %v4032_v1  ;;  %v4040_v1 = vpack.c.bf16 %v9077_v52, %v9075_v0  ;;  %v9091_v52 = vand.u32 4294901760, %v8524_v22  ;;  %v9103_v22 = vld [vmem:[#allocation255_spill] sm:$0xff] }
 0x269   :  { %4489 = vmatpush1.bf16.msra.mxu0 %v9071_v33  ;;  %4035 = vmatprep.subr.bf16.mxu1 %v4034_v4  ;;  %v9082_v4 = vand.u32 4294901760, %v9081_v42  ;;  %v9095_v42 = vld [vmem:[#allocation193_spill] sm:$0xff] }
 0x26a   :  { %4491 = vmatprep.subr.bf16.mxu0 %v9074_v2 }
 0x26b   :  { %v4042_v61 = vpack.c.bf16 %v9082_v4, %v9080_v27  ;;  %v9096_v4 = vand.u32 4294901760, %v9095_v42  ;;  %v9108_v42 = vand.u32 4294901760, %v8833_v9  ;;  %v9118_v9 = vld [vmem:[#allocation18_spill] sm:$0xff] }
 0x26c   :  { %4037 = vmatpush1.bf16.msra.mxu1 %v4036_v19  ;;  %v9086_v19 = vand.u32 4294901760, %v9085_v36 }
 0x26d   :  { %4493 = vmatpush1.bf16.msra.mxu0 %v9078_v11  ;;  %4039 = vmatprep.subr.bf16.mxu1 %v4038_v25  ;;  %v9089_v25 = vand.u32 4294901760, %v8792_v46  ;;  %v9100_v46 = vand.u32 4294901760, %v8818_v37  ;;  %v9111_v37 = vld [vmem:[#allocation207_spill] sm:$0xff] }
 0x26e   :  { %4495 = vmatprep.subr.bf16.mxu0 %v9083_v38  ;;  %v4044_v6 = vpack.c.bf16 %v9086_v19, %v9084_v43  ;;  %v9097_v43 = vld [vmem:[#allocation194_spill] sm:$0xff]  ;;  %v9101_v19 = vld [vmem:[#allocation196_spill] sm:$0xff] }
 0x26f   :  { %v4046_v0 = vpack.c.bf16 %v9089_v25, %v9088_v15  ;;  %v9104_v25 = vand.u32 4294901760, %v8821_v55  ;;  %v9114_v55 = vld [vmem:[#allocation217_spill] sm:$0xff] }
 0x270   :  { %4041 = vmatpush1.bf16.msra.mxu1 %v4040_v1  ;;  %v9093_v1 = vand.u32 4294901760, %v9092_v23 }
 0x271   :  { %4497 = vmatpush1.bf16.msra.mxu0 %v9087_v41  ;;  %4043 = vmatprep.subr.bf16.mxu1 %v4042_v61  ;;  %v9098_v61 = vand.u32 4294901760, %v9097_v43 }
 0x272   :  { %4499 = vmatprep.subr.bf16.mxu0 %v9090_v26  ;;  %v4048_v27 = vpack.c.bf16 %v9093_v1, %v9091_v52  ;;  %v9105_v52 = vld [vmem:[#allocation200_spill] sm:$0xff] }
 0x273   :  { %v4050_v36 = vpack.c.bf16 %v9098_v61, %v9096_v4  ;;  %v9107_v1 = vld [vmem:[#allocation212_spill] sm:$0xff]  ;;  %v9109_v4 = vld [vmem:[#allocation206_spill] sm:$0xff]  ;;  %v9112_v61 = vand.u32 4294901760, %v8835_v34  ;;  %v9123_v34 = vld [vmem:[#allocation19_spill] sm:$0xff] }
 0x274   :  { %4045 = vmatpush1.bf16.msra.mxu1 %v4044_v6  ;;  %v9102_v6 = vand.u32 4294901760, %v9101_v19  ;;  %v9115_v19 = vand.u32 4294901760, %v8506_v53  ;;  %v9128_v53 = vld [vmem:[#allocation256_spill] sm:$0xff] }
 0x275   :  { %4501 = vmatpush1.bf16.msra.mxu0 %v9094_v31  ;;  %4047 = vmatprep.subr.bf16.mxu1 %v4046_v0  ;;  %v9106_v0 = vand.u32 4294901760, %v9105_v52  ;;  %v9119_v52 = vld [vmem:[#allocation222_spill] sm:$0xff] }
 0x276   :  { %4503 = vmatprep.subr.bf16.mxu0 %v9099_v49  ;;  %v4052_v15 = vpack.c.bf16 %v9102_v6, %v9100_v46  ;;  %v9116_v6 = vld [vmem:[#allocation218_spill] sm:$0xff] }
 0x277   :  { %v4054_v23 = vpack.c.bf16 %v9106_v0, %v9104_v25  ;;  %v9120_v0 = vand.u32 4294901760, %v9119_v52  ;;  %v9133_v52 = vand.u32 4294901760, %v8871_v60  ;;  %v9138_v60 = vld [vmem:[#allocation31_spill] sm:$0xff] }
 0x278   :  { %4049 = vmatpush1.bf16.msra.mxu1 %v4048_v27  ;;  %v9110_v27 = vand.u32 4294901760, %v9109_v4 }
 0x279   :  { %4505 = vmatpush1.bf16.msra.mxu0 %v9103_v22  ;;  %4051 = vmatprep.subr.bf16.mxu1 %v4050_v36  ;;  %v9113_v36 = vand.u32 4294901760, %v8503_v29  ;;  %v9124_v29 = vld [vmem:[#allocation225_spill] sm:$0xff] }
 0x27a   :  { %4507 = vmatprep.subr.bf16.mxu0 %v9107_v1  ;;  %v4056_v43 = vpack.c.bf16 %v9110_v27, %v9108_v42  ;;  %v9121_v42 = vld [vmem:[#allocation223_spill] sm:$0xff]  ;;  %v9125_v27 = vand.u32 4294901760, %v9124_v29  ;;  %v9140_v29 = vld [vmem:[#allocation45_spill] sm:$0xff] }
 0x27b   :  { %v4058_v46 = vpack.c.bf16 %v9113_v36, %v9112_v61  ;;  %v9126_v61 = vld [vmem:[#allocation226_spill] sm:$0xff] }
 0x27c   :  { %4053 = vmatpush1.bf16.msra.mxu1 %v4052_v15  ;;  %v9117_v15 = vand.u32 4294901760, %v9116_v6 }
 0x27d   :  { %4509 = vmatpush1.bf16.msra.mxu0 %v9111_v37  ;;  %4055 = vmatprep.subr.bf16.mxu1 %v4054_v23  ;;  %v9122_v23 = vand.u32 4294901760, %v9121_v42 }
 0x27e   :  { %4511 = vmatprep.subr.bf16.mxu0 %v9114_v55  ;;  %v4060_v25 = vpack.c.bf16 %v9117_v15, %v9115_v19  ;;  %v9129_v19 = vld [vmem:[#allocation227_spill] sm:$0xff]  ;;  %v9131_v15 = vld [vmem:[#allocation229_spill] sm:$0xff] }
 0x27f   :  { %v4062_v4 = vpack.c.bf16 %v9122_v23, %v9120_v0  ;;  %v9130_v6 = vand.u32 4294901760, %v9129_v19  ;;  %v9134_v0 = vld [vmem:[#allocation232_spill] sm:$0xff]  ;;  %v9146_v19 = vld [vmem:[#allocation87_spill] sm:$0xff] }
 0x280   :  { %4057 = vmatpush1.bf16.msra.mxu1 %v4056_v43  ;;  %v9127_v43 = vand.u32 4294901760, %v9126_v61  ;;  %v9136_v23 = vld [vmem:[#allocation12_spill] sm:$0xff]  ;;  %v9142_v61 = vld [vmem:[#allocation57_spill] sm:$0xff] }
 0x281   :  { %4513 = vmatpush1.bf16.msra.mxu0 %v9118_v9  ;;  %4059 = vmatprep.subr.bf16.mxu1 %v4058_v46  ;;  %v9132_v46 = vand.u32 4294901760, %v9131_v15  ;;  %v9148_v15 = vld [vmem:[#allocation132_spill] sm:$0xff] }
 0x282   :  { %4515 = vmatprep.subr.bf16.mxu0 %v9123_v34  ;;  %v4064_v36 = vpack.c.bf16 %v9127_v43, %v9125_v27  ;;  %v9141_v27 = vld [vmem:[#allocation52_spill] sm:$0xff]  ;;  %v9143_v43 = vld [vmem:[#allocation66_spill] sm:$0xff] }
 0x283   :  { %v4066_v9 = vpack.c.bf16 %v9132_v46, %v9130_v6  ;;  %v9147_v6 = vld [vmem:[#allocation96_spill] sm:$0xff]  ;;  %v9150_v46 = vld [vmem:[#allocation137_spill] sm:$0xff] }
 0x284   :  { %4061 = vmatpush1.bf16.msra.mxu1 %v4060_v25  ;;  %v9135_v25 = vand.u32 4294901760, %v9134_v0  ;;  %v9152_v0 = vld [vmem:[#allocation151_spill] sm:$0xff] }
 0x285   :  { %4517 = vmatpush1.bf16.msra.mxu0 %v9128_v53  ;;  %4063 = vmatprep.subr.bf16.mxu1 %v4062_v4  ;;  %v9137_v4 = vld [vmem:[#allocation24_spill] sm:$0xff] }
 0x286   :  { %v4068_v42 = vpack.c.bf16 %v9135_v25, %v9133_v52  ;;  %v9151_v52 = vld [vmem:[#allocation141_spill] sm:$0xff]  ;;  %v9153_v25 = vld [vmem:[#allocation156_spill] sm:$0xff] }
 0x288   :  { %3638 = vmatmul.mubr.f32.vlgmr.msra.gmra.mrb[4].mxu0 %v6603_v40  ;;  %4065 = vmatpush1.bf16.msra.mxu1 %v4064_v36  ;;  %v9144_v36 = vld [vmem:[#allocation72_spill] sm:$0xff] }
 0x289   :  { %3644 = vmatprep.mubr.f32.mxu0 %v6628_v16  ;;  %4067 = vmatprep.subr.bf16.mxu1 %v4066_v9  ;;  %v9139_v9 = vld [vmem:[#allocation40_spill] sm:$0xff] }
 0x28c   :  { %3646 = vmatmul.mubr.f32.gmra.mrb[6].mxu0 %v6620_v12  ;;  %4069 = vmatpush1.bf16.msra.mxu1 %v4068_v42  ;;  %v9154_v42 = vld [vmem:[#allocation166_spill] sm:$0xff] }
 0x28d   :  { %4071 = vmatprep.subr.bf16.mxu1 %v9136_v23 }
 0x28f   :  { %2147 = vmatmul.mubr.f32.vlgmr.msra.gmra.mrb[0].mxu1 %v6603_v40 }
 0x290   :  { %2153 = vmatprep.mubr.f32.mxu1 %v6628_v16  ;;  %4073 = vmatpush1.bf16.msra.mxu1 %v8883_v18  ;;  %v9145_v18 = vld [vmem:[#allocation82_spill] sm:$0xff] }
 0x291   :  { %4075 = vmatprep.subr.bf16.mxu1 %v9137_v4 }
 0x293   :  { %2155 = vmatmul.mubr.f32.gmra.mrb[2].mxu1 %v6620_v12 }
 0x294   :  { %4077 = vmatpush1.bf16.msra.mxu1 %v9138_v60  ;;  %2290 = vmatprep.mubr.f32.mxu1 %v8873_v62  ;;  %v9149_v62 = vld [vmem:[#allocation135_spill] sm:$0xff] }
 0x295   :  { %4079 = vmatprep.subr.bf16.mxu1 %v9139_v9 }
 0x298   :  { %4081 = vmatpush1.bf16.msra.mxu1 %v9140_v29 }
 0x299   :  { %4083 = vmatprep.subr.bf16.mxu1 %v9141_v27 }
 0x29c   :  { %4085 = vmatpush1.bf16.msra.mxu1 %v9142_v61 }
 0x29d   :  { %4087 = vmatprep.subr.bf16.mxu1 %v9143_v43 }
 0x2a0   :  { %4089 = vmatpush1.bf16.msra.mxu1 %v9144_v36 }
 0x2a1   :  { %4091 = vmatprep.subr.bf16.mxu1 %v9145_v18 }
 0x2a4   :  { %4093 = vmatpush1.bf16.msra.mxu1 %v9146_v19 }
 0x2a5   :  { %4095 = vmatprep.subr.bf16.mxu1 %v9147_v6 }
 0x2a8   :  { %4097 = vmatpush1.bf16.msra.mxu1 %v9148_v15 }
 0x2a9   :  { %4099 = vmatprep.subr.bf16.mxu1 %v9149_v62 }
 0x2ac   :  { %4101 = vmatpush1.bf16.msra.mxu1 %v9150_v46 }
 0x2ad   :  { %4103 = vmatprep.subr.bf16.mxu1 %v9151_v52 }
 0x2b0   :  { %4105 = vmatpush1.bf16.msra.mxu1 %v8963_v63  ;;  %v9155_v63 = vld [vmem:[#allocation234_spill] sm:$0xff] }
 0x2b1   :  { %4107 = vmatprep.subr.bf16.mxu1 %v8964_v7  ;;  %v9156_v7 = vld [vmem:[#allocation67_spill] sm:$0xff] }
 0x2b4   :  { %4109 = vmatpush1.bf16.msra.mxu1 %v9152_v0 }
 0x2b5   :  { %4111 = vmatprep.subr.bf16.mxu1 %v9153_v25 }
 0x2b8   :  { %4113 = vmatpush1.bf16.msra.mxu1 %v8981_v50 }
 0x2b9   :  { %4115 = vmatprep.subr.bf16.mxu1 %v9154_v42 }
 0x2bc   :  { %4117 = vmatpush1.bf16.msra.mxu1 %v8991_v45 }
 0x2bd   :  { %4119 = vmatprep.subr.bf16.mxu1 %v8992_v24 }
 0x2c0   :  { %4121 = vmatpush1.bf16.msra.mxu1 %v9000_v51  ;;  %v938_v51 = vld [vmem:[%s7535_s4] sm:$0xf]  ;;  %s4713_s4 = smov [#allocation8]  }
 0x2c1   :  { %4123 = vmatprep.subr.bf16.mxu1 %v9001_v14  ;;  %v9161_v14 = vld [vmem:[#allocation257_spill] sm:$0xff]  ;;  %s3665_s10 = sshll.u32 %s4713_s4, 4  ;;  %s3666_s10 = int_to_ptr.vmem [resolvable:$true] %s3665_s10 }
 0x2c2   :  { %s4675_s11 = scalar_lea.vmem %s3666_s10, 1024  ;;  %p4680_p11 = scmp.lt.s32.totalorder %s3666_s10, %s3666_s10 }
 0x2c3   :  { %p4676_p10 = scmp.ne.s32.totalorder %s3666_s10, %s4675_s11  ;;  %p4681_p12 = scmp.lt.s32.totalorder %s4675_s11, %s4675_s11 }
 0x2c4   :  { %4125 = vmatpush1.bf16.msra.mxu1 %v9004_v3  ;;  %v9162_v3 = vsub.s32 0, %v9161_v14 }
 0x2c5   :  { %4127 = vmatprep.subr.bf16.mxu1 %v9005_v44  ;;  %p4682_p13 = por %p4681_p12, %p4680_p11 }
 0x2c6   :  { %v943_v44 = vrot.slane %v938_v51, %v9162_v3 }
 0x2c7   :  { %p4683_p0 = pnand %p4682_p13, %p4676_p10 }
 0x2c8   :  { %4129 = vmatpush1.bf16.msra.mxu1 %v9006_v13  ;;  %v9163_v13 = vsub.s32 1, %v9161_v14 }
 0x2c9   :  { %4131 = vmatprep.subr.bf16.mxu1 %v9007_v32 }
 0x2ca   :  { %v947_v32 = vrot.slane %v938_v51, %v9163_v13 }
 0x2cc   :  { %4133 = vmatpush1.bf16.msra.mxu1 %v9012_v21 }
 0x2cd   :  { %4135 = vmatprep.subr.bf16.mxu1 %v6761_v54 }
 0x2cf   :  { %2292 = vmatmul.mubr.f32.vlgmr.msra.gmra.mrb[0].mxu1 %v6603_v40  ;;  %v9157_v40 = vld [vmem:[#allocation18_spill] sm:$0xff] }
 0x2d0   :  { %2298 = vmatprep.mubr.f32.mxu1 %v6628_v16  ;;  %4137 = vmatpush1.bf16.msra.mxu1 %v6773_v20  ;;  %v9159_v16 = vld [vmem:[#allocation34_spill] sm:$0xff]  ;;  %v9160_v20 = vld [vmem:[#allocation233_spill] sm:$0xff] }
 0x2d1   :  { %4139 = vmatprep.subr.bf16.mxu1 %v9155_v63 }
 0x2d3   :  { %2300 = vmatmul.mubr.f32.gmra.mrb[2].mxu1 %v6620_v12  ;;  %v9158_v12 = vld [vmem:[#allocation191_spill] sm:$0xff] }
 0x2d4   :  { %4141 = vmatpush1.bf16.msra.mxu1 %v9016_v10  ;;  %2439 = vmatprep.mubr.f32.mxu1 %v9156_v7 }
 0x2d5   :  { %4143 = vmatprep.subr.bf16.mxu1 %v9019_v58 }
 0x2d8   :  { %4145 = vmatpush1.bf16.msra.mxu1 %v9024_v59 }
 0x2d9   :  { %4147 = vmatprep.subr.bf16.mxu1 %v9027_v57 }
 0x2dc   :  { %4149 = vmatpush1.bf16.msra.mxu1 %v9031_v5 }
 0x2dd   :  { %4151 = vmatprep.subr.bf16.mxu1 %v9034_v39 }
 0x2e0   :  { %4153 = vmatpush1.bf16.msra.mxu1 %v9038_v28 }
 0x2e1   :  { %4155 = vmatprep.subr.bf16.mxu1 %v9041_v47  ;;  %v950_v47 = vsub.s32 2, %v9161_v14 }
 0x2e4   :  { %4157 = vmatpush1.bf16.msra.mxu1 %v9046_v17  ;;  %v954_v17 = vsub.s32 3, %v9161_v14 }
 0x2e5   :  { %4159 = vmatprep.subr.bf16.mxu1 %v9050_v48  ;;  %v951_v48 = vrot.slane %v938_v51, %v950_v47 }
 0x2e8   :  { %4161 = vmatpush1.bf16.msra.mxu1 %v9055_v56  ;;  %v955_v56 = vrot.slane %v938_v51, %v954_v17 }
 0x2e9   :  { %4163 = vmatprep.subr.bf16.mxu1 %v9060_v8 }
 0x2ec   :  { %4165 = vmatpush1.bf16.msra.mxu1 %v9064_v30 }
 0x2ed   :  { %4167 = vmatprep.subr.bf16.mxu1 %v9067_v35 }
 0x2f0   :  { %4169 = vmatpush1.bf16.msra.mxu1 %v9071_v33 }
 0x2f1   :  { %4171 = vmatprep.subr.bf16.mxu1 %v9074_v2 }
 0x2f4   :  { %4173 = vmatpush1.bf16.msra.mxu1 %v9078_v11 }
 0x2f5   :  { %4175 = vmatprep.subr.bf16.mxu1 %v9083_v38 }
 0x2f8   :  { %4177 = vmatpush1.bf16.msra.mxu1 %v9087_v41 }
 0x2f9   :  { %4179 = vmatprep.subr.bf16.mxu1 %v9090_v26 }
 0x2fc   :  { %4181 = vmatpush1.bf16.msra.mxu1 %v9094_v31 }
 0x2fd   :  { %4183 = vmatprep.subr.bf16.mxu1 %v9099_v49 }
 0x300   :  { %4185 = vmatpush1.bf16.msra.mxu1 %v9103_v22 }
 0x301   :  { %4187 = vmatprep.subr.bf16.mxu1 %v9107_v1 }
 0x304   :  { %4189 = vmatpush1.bf16.msra.mxu1 %v9111_v37 }
 0x305   :  { %4191 = vmatprep.subr.bf16.mxu1 %v9114_v55 }
 0x308   :  { %4193 = vmatpush1.bf16.msra.mxu1 %v9157_v40 }
 0x309   :  { %4195 = vmatprep.subr.bf16.mxu1 %v9123_v34 }
 0x30c   :  { %4197 = vmatpush1.bf16.msra.mxu1 %v9128_v53 }
 0x30f   :  { %2445 = vmatmul.mubr.f32.vlgmr.msra.gmra.mrb[4].mxu1 %v9158_v12 }
 0x310   :  { %2455 = vmatprep.mubr.f32.mxu1 %v9159_v16 }
 0x313   :  { %2461 = vmatmul.mubr.f32.gmra.mrb[6].mxu1 %v9160_v20 }
 0x35b   :  { %v3639_v54 = vpop.f32.mrb[4].mxu0 }
 0x35c   :  { %v3641_v50 = vpop.f32.mrb[5].mxu0 }
 0x35f   :  { %v3647_v45 = vpop.f32.mrb[6].mxu0 }
 0x360   :  { %v3649_v24 = vpop.f32.mrb[7].mxu0 }
 0x3a2   :  { %v2293_v21 = vpop.f32.mrb[0].mxu1 }
 0x3a3   :  { %v4522_v10 = vadd.f32 %v2293_v21, %v943_v44  ;;  %v2295_v58 = vpop.f32.mrb[1].mxu1 }
 0x3a4   :  { %v4523_v59 = vadd.f32 %v2295_v58, %v947_v32 }
 0x3a5   :  { %3652 = vst [vmem:[#allocation8] sm:$0xff] %v4522_v10 }
 0x3a6   :  { %3653 = vst [vmem:[#allocation8 + $0x8] sm:$0xff] %v4523_v59  ;;  %v2301_v57 = vpop.f32.mrb[2].mxu1 }
 0x3a7   :  { %v4524_v5 = vadd.f32 %v2301_v57, %v943_v44  ;;  %v2303_v39 = vpop.f32.mrb[3].mxu1 }
 0x3a8   :  { %v4525_v28 = vadd.f32 %v2303_v39, %v947_v32 }
 0x3a9   :  { %3656 = vst [vmem:[#allocation8 + $0x20] sm:$0xff] %v4524_v5 }
 0x3aa   :  { %3657 = vst [vmem:[#allocation8 + $0x28] sm:$0xff] %v4525_v28 }
 0x3e2   :  { %v2446_v8 = vpop.f32.mrb[4].mxu1 }
 0x3e3   :  { %v2447_v30 = vadd.f32 %v2446_v8, %v951_v48  ;;  %v2448_v35 = vpop.f32.mrb[5].mxu1 }
 0x3e4   :  { %v2449_v33 = vadd.f32 %v2448_v35, %v955_v56 }
 0x3e5   :  { %v4527_v2 = vadd.f32 %v3639_v54, %v2447_v30 }
 0x3e6   :  { %v4529_v11 = vadd.f32 %v3641_v50, %v2449_v33  ;;  %v2462_v38 = vpop.f32.mrb[6].mxu1 }
 0x3e7   :  { %3654 = vst [vmem:[#allocation8 + $0x10] sm:$0xff] %v4527_v2  ;;  %v2463_v41 = vadd.f32 %v2462_v38, %v951_v48  ;;  %v2464_v26 = vpop.f32.mrb[7].mxu1 }
 0x3e8   :  { %3655 = vst [vmem:[#allocation8 + $0x18] sm:$0xff] %v4529_v11  ;;  %v2465_v31 = vadd.f32 %v2464_v26, %v955_v56 }
 0x3e9   :  { %v4531_v49 = vadd.f32 %v3647_v45, %v2463_v41 }
 0x3ea   :  { %v4533_v22 = vadd.f32 %v3649_v24, %v2465_v31 }
 0x3eb   :  { %3658 = vst [vmem:[#allocation8 + $0x30] sm:$0xff] %v4531_v49 }
 0x3ec   :  { %3659 = vst [vmem:[#allocation8 + $0x38] sm:$0xff] %v4533_v22 }
 0x3ed   :  { %4686 = shalt.err (!%p4683_p0)
}
 0x3ee   :  { %s4687_s14 = scalar_lea.hbm %s7536_s5, 1024 }
 0x3ef   :  { %p4688_p1 = scmp.ne.s32.totalorder %s7536_s5, %s4687_s14  ;;  %p4691_p2 = scmp.lt.u32.totalorder %s4687_s14, %s7536_s5 }
 0x3f1   :  { %p4693_p3 = pnand %p4691_p2, %p4688_p1 }
 0x3f3   :  { %4696 = shalt.err (!%p4693_p3)
}
 0x3f4   :  { %3671 = dma.vmem_to_hbm [thread:$0]  %s3666_s10, 1024, %s7536_s5, [#allocation4], %s4710_s0, %s4710_s0, %s4711_s30  }
 0x3f5   :  { %4701 = dma.done.wait [#allocation4], 1024  }
 0x3f6   :  { %4702 = vsyncadd [#allocation4], 4294966272 }
 0x3f7   :  { %3675 = vsyncpa [#allocation3], 1 }
 0x3f8   :  { %3676 = vsyncpa [#allocation6], 1 }
 0x3f9   :  { %3677 = vsyncpa [#allocation4], 1 }

</bundles_post_ra>
